<compile_context>
chip_gen: v7x
topology: tpu7x:2x2x1
jax: 0.10.0
libtpu: 0.0.40
codegen_flags: <defaults>
</compile_context>

<pallas_src>
import jax
import jax.numpy as jnp
from jax.experimental import pallas as pl
from jax.experimental.pallas import tpu as pltpu

INPUT_SIZE = 128          # lane-aligned choice of the module's `input_size`
EXTEND     = 4096         # fixed by the module
HIDDEN     = 64           # fixed by the module
N          = 16           # fixed by the module
DK         = EXTEND // N  # 256
BATCH      = 8


def external_attention_kernel(x_ref, wext_ref, bext_ref, mk_ref, mv_ref,
                              wproj_ref, bproj_ref, o_ref,
                              hs_sc, at_sc, vf_sc):
    tb = x_ref.shape[0]

    # ---- extend: one fused (tb, D) @ (D, EXTEND) matmul ---------------------
    h = jnp.dot(x_ref[...], wext_ref[...],
                preferred_element_type=jnp.float32)                  # (tb, EXTEND)
    h = h + bext_ref[...]

    # ---- restack groups along rows (group-major) for batched Mk/Mv ---------
    # Static, 256-lane-aligned slices -> plain tile copies, no relayout risk.
    for g in range(N):
        hs_sc[pl.ds(g * tb, tb), :] = h[:, g * DK:(g + 1) * DK].astype(jnp.bfloat16)

    # ---- Mk logits for all groups in one (N*tb,256)@(256,64) matmul --------
    a = jnp.dot(hs_sc[...], mk_ref[...],
                preferred_element_type=jnp.float32)                  # (N*tb, HIDDEN)

    # ---- softmax over the group axis (dim=-2) + hidden-axis renorm ---------
    a_g = [a[g * tb:(g + 1) * tb, :] for g in range(N)]              # 16 x (tb, H)
    m = a_g[0]
    for g in range(1, N):
        m = jnp.maximum(m, a_g[g])
    e_g = [jnp.exp(a_g[g] - m) for g in range(N)]
    denom = e_g[0]
    for g in range(1, N):
        denom = denom + e_g[g]
    inv_denom = 1.0 / denom
    for g in range(N):
        t = e_g[g] * inv_denom                                       # softmax(dim=-2)
        t = t / (1e-9 + jnp.sum(t, axis=-1, keepdims=True))          # hidden renorm
        at_sc[pl.ds(g * tb, tb), :] = t.astype(jnp.bfloat16)

    # TODO(synk): attn_drop / proj_drop are identity (eval mode); training-time dropout not implemented.

    # ---- Mv values for all groups in one (N*tb,64)@(64,256) matmul ---------
    v = jnp.dot(at_sc[...], mv_ref[...],
                preferred_element_type=jnp.float32)                  # (N*tb, DK)

    # ---- reassemble (tb, EXTEND) in bf16 and do the long-K projection ------
    for g in range(N):
        vf_sc[:, pl.ds(g * DK, DK)] = v[g * tb:(g + 1) * tb, :].astype(jnp.bfloat16)

    out = jnp.dot(vf_sc[...], wproj_ref[...],
                  preferred_element_type=jnp.float32)                # (tb, D)
    o_ref[...] = out + bproj_ref[...]


def external_attention(x, w_ext, b_ext, mk, mv, w_proj, b_proj):
    B, D = x.shape
    assert D % 128 == 0, "input_size must be lane-aligned (multiple of 128)"

    # bf16 weight storage: halves HBM weight bytes; f32 accumulation kept on MXU.
    wdt = jnp.bfloat16
    wext_b  = w_ext.astype(wdt)                                # (D, EXTEND)
    bext_b  = b_ext.reshape(1, EXTEND).astype(jnp.float32)
    mk_b    = mk.astype(wdt)                                   # (DK, HIDDEN)
    mv_b    = mv.astype(wdt)                                   # (HIDDEN, DK)
    wproj_b = w_proj.astype(wdt)                               # (EXTEND, D)
    bproj_b = b_proj.reshape(1, D).astype(jnp.float32)

    # Batch tiling: bigger tiles once B allows it (MXU row occupancy on v6e/v7x's
    # 256-row MXU); single sublane-padded tile for small B.
    if B >= 256:
        tile_b = 256
    elif B >= 128:
        tile_b = 128
    else:
        tile_b = max(8, ((B + 7) // 8) * 8)
    b_pad = ((B + tile_b - 1) // tile_b) * tile_b
    xb = x.astype(wdt)
    if b_pad != B:
        xb = jnp.pad(xb, ((0, b_pad - B), (0, 0)))

    grid = (b_pad // tile_b,)

    out = pl.pallas_call(
        external_attention_kernel,
        out_shape=jax.ShapeDtypeStruct((b_pad, D), jnp.float32),
        grid_spec=pltpu.PrefetchScalarGridSpec(
            num_scalar_prefetch=0,
            grid=grid,
            in_specs=[
                # x: one batch tile per grid step
                pl.BlockSpec((tile_b, D), lambda b: (b, 0)),
                # Weights/biases: grid-invariant full-array blocks (fetched once).
                pl.BlockSpec((D, EXTEND), lambda b: (0, 0)),       # W_ext
                pl.BlockSpec((1, EXTEND), lambda b: (0, 0)),       # b_ext
                pl.BlockSpec((DK, HIDDEN), lambda b: (0, 0)),      # Mk
                pl.BlockSpec((HIDDEN, DK), lambda b: (0, 0)),      # Mv
                pl.BlockSpec((EXTEND, D), lambda b: (0, 0)),       # W_proj
                pl.BlockSpec((1, D), lambda b: (0, 0)),            # b_proj
            ],
            out_specs=pl.BlockSpec((tile_b, D), lambda b: (b, 0)),
            scratch_shapes=[
                pltpu.VMEM((N * tile_b, DK), jnp.bfloat16),        # group-stacked h
                pltpu.VMEM((N * tile_b, HIDDEN), jnp.bfloat16),    # group-stacked attn
                pltpu.VMEM((tile_b, EXTEND), jnp.bfloat16),        # reassembled v
            ],
        ),
        # Worst-case working set (tile_b=256) is ~15-20 MiB; 32 MiB gives headroom
        # on every generation (v5e/v6e 128 MiB physical, v7x 64 MiB physical).
        compiler_params=pltpu.CompilerParams(
            dimension_semantics=("parallel",),
            vmem_limit_bytes=32 * 1024 * 1024),
    )(xb, wext_b, bext_b, mk_b, mv_b, wproj_b, bproj_b)

    return out[:B]


def reference(x, w_ext, b_ext, mk, mv, w_proj, b_proj):
    B = x.shape[0]
    h = x @ w_ext + b_ext
    h = h.reshape(B, N, DK)
    attn = h @ mk
    attn = jax.nn.softmax(attn, axis=-2)
    attn = attn / (1e-9 + attn.sum(axis=-1, keepdims=True))
    v = (attn @ mv).reshape(B, EXTEND)
    return v @ w_proj + b_proj


def init_params(key):
    # nn.Linear weights: normal(std=0.001); biases: 0 (per init_weights()).
    k1, k2, k3, k4 = jax.random.split(key, 4)
    w_ext  = 0.001 * jax.random.normal(k1, (INPUT_SIZE, EXTEND), jnp.float32)  # extend.weight^T
    b_ext  = jnp.zeros((EXTEND,), jnp.float32)
    mk     = 0.001 * jax.random.normal(k2, (DK, HIDDEN), jnp.float32)          # Mk.weight^T
    mv     = 0.001 * jax.random.normal(k3, (HIDDEN, DK), jnp.float32)          # Mv.weight^T
    w_proj = 0.001 * jax.random.normal(k4, (EXTEND, INPUT_SIZE), jnp.float32)  # proj.weight^T
    b_proj = jnp.zeros((INPUT_SIZE,), jnp.float32)
    return w_ext, b_ext, mk, mv, w_proj, b_proj


if __name__ == "__main__":
    key = jax.random.PRNGKey(0)
    kx, kp = jax.random.split(key)
    x = jax.random.normal(kx, (BATCH, INPUT_SIZE), jnp.float32)
    params = init_params(kp)

    out = external_attention(x, *params)
    out = jax.block_until_ready(out)

    ref = reference(x, *params)
    assert out.shape == (BATCH, INPUT_SIZE)
    # bf16 weight/activation storage in the kernel vs f32 reference -> looser rtol.
    assert jnp.allclose(out, ref, rtol=2e-2, atol=1e-6), "mismatch vs pure-JAX reference"

    print("KERNEL_OK")
</pallas_src>

<mosaic_0001>
module attributes {stable_mosaic.version = 11 : i64} {
  func.func @external_attention_kernel(%arg0: i32, %arg1: memref<8x128xbf16, #tpu.memory_space<vmem>>, %arg2: memref<128x4096xbf16, #tpu.memory_space<vmem>>, %arg3: memref<1x4096xf32, #tpu.memory_space<vmem>>, %arg4: memref<256x64xbf16, #tpu.memory_space<vmem>>, %arg5: memref<64x256xbf16, #tpu.memory_space<vmem>>, %arg6: memref<4096x128xbf16, #tpu.memory_space<vmem>>, %arg7: memref<1x128xf32, #tpu.memory_space<vmem>>, %arg8: memref<8x128xf32, #tpu.memory_space<vmem>>, %arg9: memref<128x256xbf16, #tpu.memory_space<vmem>>, %arg10: memref<128x64xbf16, #tpu.memory_space<vmem>>, %arg11: memref<8x4096xbf16, #tpu.memory_space<vmem>>) attributes {dimension_semantics = [#tpu.dimension_semantics<parallel>], iteration_bounds = array<i64: 1>, scalar_prefetch = 0 : i64, scratch_operands = 3 : i64, tpu.core_type = #tpu.core_type<tc>, window_params = [{transform_indices = @transform_0, window_bounds = array<i64: 8, 128>}, {pipeline_mode = #tpu.pipeline_mode<synchronous>, transform_indices = @transform_1, window_bounds = array<i64: 128, 4096>}, {pipeline_mode = #tpu.pipeline_mode<synchronous>, transform_indices = @transform_2, window_bounds = array<i64: 1, 4096>}, {pipeline_mode = #tpu.pipeline_mode<synchronous>, transform_indices = @transform_3, window_bounds = array<i64: 256, 64>}, {pipeline_mode = #tpu.pipeline_mode<synchronous>, transform_indices = @transform_4, window_bounds = array<i64: 64, 256>}, {pipeline_mode = #tpu.pipeline_mode<synchronous>, transform_indices = @transform_5, window_bounds = array<i64: 4096, 128>}, {pipeline_mode = #tpu.pipeline_mode<synchronous>, transform_indices = @transform_6, window_bounds = array<i64: 1, 128>}, {transform_indices = @transform_7, window_bounds = array<i64: 8, 128>}]} {
    %c0 = arith.constant 0 : index
    %c0_0 = arith.constant 0 : index
    %0 = vector.load %arg1[%c0, %c0_0] : memref<8x128xbf16, #tpu.memory_space<vmem>>, vector<8x128xbf16>
    %c0_1 = arith.constant 0 : index
    %c0_2 = arith.constant 0 : index
    %1 = vector.load %arg2[%c0_1, %c0_2] : memref<128x4096xbf16, #tpu.memory_space<vmem>>, vector<128x4096xbf16>
    %cst = arith.constant dense<0.000000e+00> : vector<8x4096xf32>
    %2 = tpu.matmul %0, %1, %cst {dimension_numbers = #tpu.dot_dimension_numbers<[1], [0], [0], [1], [0, 0, 1, 1], [], []>} : vector<8x128xbf16>, vector<128x4096xbf16>, vector<8x4096xf32> -> vector<8x4096xf32>
    %c0_3 = arith.constant 0 : index
    %c0_4 = arith.constant 0 : index
    %3 = vector.load %arg3[%c0_3, %c0_4] : memref<1x4096xf32, #tpu.memory_space<vmem>>, vector<1x4096xf32>
    %4 = vector.broadcast %3 : vector<1x4096xf32> to vector<8x4096xf32>
    %5 = arith.addf %2, %4 : vector<8x4096xf32>
    %6 = vector.extract_strided_slice %5 {offsets = [0, 0], sizes = [8, 256], strides = [1, 1]} : vector<8x4096xf32> to vector<8x256xf32>
    %7 = arith.truncf %6 : vector<8x256xf32> to vector<8x256xbf16>
    %c0_5 = arith.constant 0 : index
    %c0_6 = arith.constant 0 : index
    %8 = vector.load %arg9[%c0_5, %c0_6] : memref<128x256xbf16, #tpu.memory_space<vmem>>, vector<8x256xbf16>
    tpu.vector_store %arg9[%c0_5, %c0_6], %7 {strides = array<i32>} : memref<128x256xbf16, #tpu.memory_space<vmem>>, vector<8x256xbf16>,
    %9 = vector.extract_strided_slice %5 {offsets = [0, 256], sizes = [8, 256], strides = [1, 1]} : vector<8x4096xf32> to vector<8x256xf32>
    %10 = arith.truncf %9 : vector<8x256xf32> to vector<8x256xbf16>
    %c8 = arith.constant 8 : index
    %c0_7 = arith.constant 0 : index
    %11 = vector.load %arg9[%c8, %c0_7] : memref<128x256xbf16, #tpu.memory_space<vmem>>, vector<8x256xbf16>
    tpu.vector_store %arg9[%c8, %c0_7], %10 {strides = array<i32>} : memref<128x256xbf16, #tpu.memory_space<vmem>>, vector<8x256xbf16>,
    %12 = vector.extract_strided_slice %5 {offsets = [0, 512], sizes = [8, 256], strides = [1, 1]} : vector<8x4096xf32> to vector<8x256xf32>
    %13 = arith.truncf %12 : vector<8x256xf32> to vector<8x256xbf16>
    %c16 = arith.constant 16 : index
    %c0_8 = arith.constant 0 : index
    %14 = vector.load %arg9[%c16, %c0_8] : memref<128x256xbf16, #tpu.memory_space<vmem>>, vector<8x256xbf16>
    tpu.vector_store %arg9[%c16, %c0_8], %13 {strides = array<i32>} : memref<128x256xbf16, #tpu.memory_space<vmem>>, vector<8x256xbf16>,
    %15 = vector.extract_strided_slice %5 {offsets = [0, 768], sizes = [8, 256], strides = [1, 1]} : vector<8x4096xf32> to vector<8x256xf32>
    %16 = arith.truncf %15 : vector<8x256xf32> to vector<8x256xbf16>
    %c24 = arith.constant 24 : index
    %c0_9 = arith.constant 0 : index
    %17 = vector.load %arg9[%c24, %c0_9] : memref<128x256xbf16, #tpu.memory_space<vmem>>, vector<8x256xbf16>
    tpu.vector_store %arg9[%c24, %c0_9], %16 {strides = array<i32>} : memref<128x256xbf16, #tpu.memory_space<vmem>>, vector<8x256xbf16>,
    %18 = vector.extract_strided_slice %5 {offsets = [0, 1024], sizes = [8, 256], strides = [1, 1]} : vector<8x4096xf32> to vector<8x256xf32>
    %19 = arith.truncf %18 : vector<8x256xf32> to vector<8x256xbf16>
    %c32 = arith.constant 32 : index
    %c0_10 = arith.constant 0 : index
    %20 = vector.load %arg9[%c32, %c0_10] : memref<128x256xbf16, #tpu.memory_space<vmem>>, vector<8x256xbf16>
    tpu.vector_store %arg9[%c32, %c0_10], %19 {strides = array<i32>} : memref<128x256xbf16, #tpu.memory_space<vmem>>, vector<8x256xbf16>,
    %21 = vector.extract_strided_slice %5 {offsets = [0, 1280], sizes = [8, 256], strides = [1, 1]} : vector<8x4096xf32> to vector<8x256xf32>
    %22 = arith.truncf %21 : vector<8x256xf32> to vector<8x256xbf16>
    %c40 = arith.constant 40 : index
    %c0_11 = arith.constant 0 : index
    %23 = vector.load %arg9[%c40, %c0_11] : memref<128x256xbf16, #tpu.memory_space<vmem>>, vector<8x256xbf16>
    tpu.vector_store %arg9[%c40, %c0_11], %22 {strides = array<i32>} : memref<128x256xbf16, #tpu.memory_space<vmem>>, vector<8x256xbf16>,
    %24 = vector.extract_strided_slice %5 {offsets = [0, 1536], sizes = [8, 256], strides = [1, 1]} : vector<8x4096xf32> to vector<8x256xf32>
    %25 = arith.truncf %24 : vector<8x256xf32> to vector<8x256xbf16>
    %c48 = arith.constant 48 : index
    %c0_12 = arith.constant 0 : index
    %26 = vector.load %arg9[%c48, %c0_12] : memref<128x256xbf16, #tpu.memory_space<vmem>>, vector<8x256xbf16>
    tpu.vector_store %arg9[%c48, %c0_12], %25 {strides = array<i32>} : memref<128x256xbf16, #tpu.memory_space<vmem>>, vector<8x256xbf16>,
    %27 = vector.extract_strided_slice %5 {offsets = [0, 1792], sizes = [8, 256], strides = [1, 1]} : vector<8x4096xf32> to vector<8x256xf32>
    %28 = arith.truncf %27 : vector<8x256xf32> to vector<8x256xbf16>
    %c56 = arith.constant 56 : index
    %c0_13 = arith.constant 0 : index
    %29 = vector.load %arg9[%c56, %c0_13] : memref<128x256xbf16, #tpu.memory_space<vmem>>, vector<8x256xbf16>
    tpu.vector_store %arg9[%c56, %c0_13], %28 {strides = array<i32>} : memref<128x256xbf16, #tpu.memory_space<vmem>>, vector<8x256xbf16>,
    %30 = vector.extract_strided_slice %5 {offsets = [0, 2048], sizes = [8, 256], strides = [1, 1]} : vector<8x4096xf32> to vector<8x256xf32>
    %31 = arith.truncf %30 : vector<8x256xf32> to vector<8x256xbf16>
    %c64 = arith.constant 64 : index
    %c0_14 = arith.constant 0 : index
    %32 = vector.load %arg9[%c64, %c0_14] : memref<128x256xbf16, #tpu.memory_space<vmem>>, vector<8x256xbf16>
    tpu.vector_store %arg9[%c64, %c0_14], %31 {strides = array<i32>} : memref<128x256xbf16, #tpu.memory_space<vmem>>, vector<8x256xbf16>,
    %33 = vector.extract_strided_slice %5 {offsets = [0, 2304], sizes = [8, 256], strides = [1, 1]} : vector<8x4096xf32> to vector<8x256xf32>
    %34 = arith.truncf %33 : vector<8x256xf32> to vector<8x256xbf16>
    %c72 = arith.constant 72 : index
    %c0_15 = arith.constant 0 : index
    %35 = vector.load %arg9[%c72, %c0_15] : memref<128x256xbf16, #tpu.memory_space<vmem>>, vector<8x256xbf16>
    tpu.vector_store %arg9[%c72, %c0_15], %34 {strides = array<i32>} : memref<128x256xbf16, #tpu.memory_space<vmem>>, vector<8x256xbf16>,
    %36 = vector.extract_strided_slice %5 {offsets = [0, 2560], sizes = [8, 256], strides = [1, 1]} : vector<8x4096xf32> to vector<8x256xf32>
    %37 = arith.truncf %36 : vector<8x256xf32> to vector<8x256xbf16>
    %c80 = arith.constant 80 : index
    %c0_16 = arith.constant 0 : index
    %38 = vector.load %arg9[%c80, %c0_16] : memref<128x256xbf16, #tpu.memory_space<vmem>>, vector<8x256xbf16>
    tpu.vector_store %arg9[%c80, %c0_16], %37 {strides = array<i32>} : memref<128x256xbf16, #tpu.memory_space<vmem>>, vector<8x256xbf16>,
    %39 = vector.extract_strided_slice %5 {offsets = [0, 2816], sizes = [8, 256], strides = [1, 1]} : vector<8x4096xf32> to vector<8x256xf32>
    %40 = arith.truncf %39 : vector<8x256xf32> to vector<8x256xbf16>
    %c88 = arith.constant 88 : index
    %c0_17 = arith.constant 0 : index
    %41 = vector.load %arg9[%c88, %c0_17] : memref<128x256xbf16, #tpu.memory_space<vmem>>, vector<8x256xbf16>
    tpu.vector_store %arg9[%c88, %c0_17], %40 {strides = array<i32>} : memref<128x256xbf16, #tpu.memory_space<vmem>>, vector<8x256xbf16>,
    %42 = vector.extract_strided_slice %5 {offsets = [0, 3072], sizes = [8, 256], strides = [1, 1]} : vector<8x4096xf32> to vector<8x256xf32>
    %43 = arith.truncf %42 : vector<8x256xf32> to vector<8x256xbf16>
    %c96 = arith.constant 96 : index
    %c0_18 = arith.constant 0 : index
    %44 = vector.load %arg9[%c96, %c0_18] : memref<128x256xbf16, #tpu.memory_space<vmem>>, vector<8x256xbf16>
    tpu.vector_store %arg9[%c96, %c0_18], %43 {strides = array<i32>} : memref<128x256xbf16, #tpu.memory_space<vmem>>, vector<8x256xbf16>,
    %45 = vector.extract_strided_slice %5 {offsets = [0, 3328], sizes = [8, 256], strides = [1, 1]} : vector<8x4096xf32> to vector<8x256xf32>
    %46 = arith.truncf %45 : vector<8x256xf32> to vector<8x256xbf16>
    %c104 = arith.constant 104 : index
    %c0_19 = arith.constant 0 : index
    %47 = vector.load %arg9[%c104, %c0_19] : memref<128x256xbf16, #tpu.memory_space<vmem>>, vector<8x256xbf16>
    tpu.vector_store %arg9[%c104, %c0_19], %46 {strides = array<i32>} : memref<128x256xbf16, #tpu.memory_space<vmem>>, vector<8x256xbf16>,
    %48 = vector.extract_strided_slice %5 {offsets = [0, 3584], sizes = [8, 256], strides = [1, 1]} : vector<8x4096xf32> to vector<8x256xf32>
    %49 = arith.truncf %48 : vector<8x256xf32> to vector<8x256xbf16>
    %c112 = arith.constant 112 : index
    %c0_20 = arith.constant 0 : index
    %50 = vector.load %arg9[%c112, %c0_20] : memref<128x256xbf16, #tpu.memory_space<vmem>>, vector<8x256xbf16>
    tpu.vector_store %arg9[%c112, %c0_20], %49 {strides = array<i32>} : memref<128x256xbf16, #tpu.memory_space<vmem>>, vector<8x256xbf16>,
    %51 = vector.extract_strided_slice %5 {offsets = [0, 3840], sizes = [8, 256], strides = [1, 1]} : vector<8x4096xf32> to vector<8x256xf32>
    %52 = arith.truncf %51 : vector<8x256xf32> to vector<8x256xbf16>
    %c120 = arith.constant 120 : index
    %c0_21 = arith.constant 0 : index
    %53 = vector.load %arg9[%c120, %c0_21] : memref<128x256xbf16, #tpu.memory_space<vmem>>, vector<8x256xbf16>
    tpu.vector_store %arg9[%c120, %c0_21], %52 {strides = array<i32>} : memref<128x256xbf16, #tpu.memory_space<vmem>>, vector<8x256xbf16>,
    %c0_22 = arith.constant 0 : index
    %c0_23 = arith.constant 0 : index
    %54 = vector.load %arg9[%c0_22, %c0_23] : memref<128x256xbf16, #tpu.memory_space<vmem>>, vector<128x256xbf16>
    %c0_24 = arith.constant 0 : index
    %c0_25 = arith.constant 0 : index
    %55 = vector.load %arg4[%c0_24, %c0_25] : memref<256x64xbf16, #tpu.memory_space<vmem>>, vector<256x64xbf16>
    %cst_26 = arith.constant dense<0.000000e+00> : vector<128x64xf32>
    %56 = tpu.matmul %54, %55, %cst_26 {dimension_numbers = #tpu.dot_dimension_numbers<[1], [0], [0], [1], [0, 0, 1, 1], [], []>} : vector<128x256xbf16>, vector<256x64xbf16>, vector<128x64xf32> -> vector<128x64xf32>
    %57 = vector.extract_strided_slice %56 {offsets = [0, 0], sizes = [8, 64], strides = [1, 1]} : vector<128x64xf32> to vector<8x64xf32>
    %58 = vector.extract_strided_slice %56 {offsets = [8, 0], sizes = [8, 64], strides = [1, 1]} : vector<128x64xf32> to vector<8x64xf32>
    %59 = vector.extract_strided_slice %56 {offsets = [16, 0], sizes = [8, 64], strides = [1, 1]} : vector<128x64xf32> to vector<8x64xf32>
    %60 = vector.extract_strided_slice %56 {offsets = [24, 0], sizes = [8, 64], strides = [1, 1]} : vector<128x64xf32> to vector<8x64xf32>
    %61 = vector.extract_strided_slice %56 {offsets = [32, 0], sizes = [8, 64], strides = [1, 1]} : vector<128x64xf32> to vector<8x64xf32>
    %62 = vector.extract_strided_slice %56 {offsets = [40, 0], sizes = [8, 64], strides = [1, 1]} : vector<128x64xf32> to vector<8x64xf32>
    %63 = vector.extract_strided_slice %56 {offsets = [48, 0], sizes = [8, 64], strides = [1, 1]} : vector<128x64xf32> to vector<8x64xf32>
    %64 = vector.extract_strided_slice %56 {offsets = [56, 0], sizes = [8, 64], strides = [1, 1]} : vector<128x64xf32> to vector<8x64xf32>
    %65 = vector.extract_strided_slice %56 {offsets = [64, 0], sizes = [8, 64], strides = [1, 1]} : vector<128x64xf32> to vector<8x64xf32>
    %66 = vector.extract_strided_slice %56 {offsets = [72, 0], sizes = [8, 64], strides = [1, 1]} : vector<128x64xf32> to vector<8x64xf32>
    %67 = vector.extract_strided_slice %56 {offsets = [80, 0], sizes = [8, 64], strides = [1, 1]} : vector<128x64xf32> to vector<8x64xf32>
    %68 = vector.extract_strided_slice %56 {offsets = [88, 0], sizes = [8, 64], strides = [1, 1]} : vector<128x64xf32> to vector<8x64xf32>
    %69 = vector.extract_strided_slice %56 {offsets = [96, 0], sizes = [8, 64], strides = [1, 1]} : vector<128x64xf32> to vector<8x64xf32>
    %70 = vector.extract_strided_slice %56 {offsets = [104, 0], sizes = [8, 64], strides = [1, 1]} : vector<128x64xf32> to vector<8x64xf32>
    %71 = vector.extract_strided_slice %56 {offsets = [112, 0], sizes = [8, 64], strides = [1, 1]} : vector<128x64xf32> to vector<8x64xf32>
    %72 = vector.extract_strided_slice %56 {offsets = [120, 0], sizes = [8, 64], strides = [1, 1]} : vector<128x64xf32> to vector<8x64xf32>
    %73 = arith.maximumf %57, %58 : vector<8x64xf32>
    %74 = arith.maximumf %73, %59 : vector<8x64xf32>
    %75 = arith.maximumf %74, %60 : vector<8x64xf32>
    %76 = arith.maximumf %75, %61 : vector<8x64xf32>
    %77 = arith.maximumf %76, %62 : vector<8x64xf32>
    %78 = arith.maximumf %77, %63 : vector<8x64xf32>
    %79 = arith.maximumf %78, %64 : vector<8x64xf32>
    %80 = arith.maximumf %79, %65 : vector<8x64xf32>
    %81 = arith.maximumf %80, %66 : vector<8x64xf32>
    %82 = arith.maximumf %81, %67 : vector<8x64xf32>
    %83 = arith.maximumf %82, %68 : vector<8x64xf32>
    %84 = arith.maximumf %83, %69 : vector<8x64xf32>
    %85 = arith.maximumf %84, %70 : vector<8x64xf32>
    %86 = arith.maximumf %85, %71 : vector<8x64xf32>
    %87 = arith.maximumf %86, %72 : vector<8x64xf32>
    %88 = arith.subf %57, %87 : vector<8x64xf32>
    %89 = math.exp %88 : vector<8x64xf32>
    %90 = arith.subf %58, %87 : vector<8x64xf32>
    %91 = math.exp %90 : vector<8x64xf32>
    %92 = arith.subf %59, %87 : vector<8x64xf32>
    %93 = math.exp %92 : vector<8x64xf32>
    %94 = arith.subf %60, %87 : vector<8x64xf32>
    %95 = math.exp %94 : vector<8x64xf32>
    %96 = arith.subf %61, %87 : vector<8x64xf32>
    %97 = math.exp %96 : vector<8x64xf32>
    %98 = arith.subf %62, %87 : vector<8x64xf32>
    %99 = math.exp %98 : vector<8x64xf32>
    %100 = arith.subf %63, %87 : vector<8x64xf32>
    %101 = math.exp %100 : vector<8x64xf32>
    %102 = arith.subf %64, %87 : vector<8x64xf32>
    %103 = math.exp %102 : vector<8x64xf32>
    %104 = arith.subf %65, %87 : vector<8x64xf32>
    %105 = math.exp %104 : vector<8x64xf32>
    %106 = arith.subf %66, %87 : vector<8x64xf32>
    %107 = math.exp %106 : vector<8x64xf32>
    %108 = arith.subf %67, %87 : vector<8x64xf32>
    %109 = math.exp %108 : vector<8x64xf32>
    %110 = arith.subf %68, %87 : vector<8x64xf32>
    %111 = math.exp %110 : vector<8x64xf32>
    %112 = arith.subf %69, %87 : vector<8x64xf32>
    %113 = math.exp %112 : vector<8x64xf32>
    %114 = arith.subf %70, %87 : vector<8x64xf32>
    %115 = math.exp %114 : vector<8x64xf32>
    %116 = arith.subf %71, %87 : vector<8x64xf32>
    %117 = math.exp %116 : vector<8x64xf32>
    %118 = arith.subf %72, %87 : vector<8x64xf32>
    %119 = math.exp %118 : vector<8x64xf32>
    %120 = arith.addf %89, %91 : vector<8x64xf32>
    %121 = arith.addf %120, %93 : vector<8x64xf32>
    %122 = arith.addf %121, %95 : vector<8x64xf32>
    %123 = arith.addf %122, %97 : vector<8x64xf32>
    %124 = arith.addf %123, %99 : vector<8x64xf32>
    %125 = arith.addf %124, %101 : vector<8x64xf32>
    %126 = arith.addf %125, %103 : vector<8x64xf32>
    %127 = arith.addf %126, %105 : vector<8x64xf32>
    %128 = arith.addf %127, %107 : vector<8x64xf32>
    %129 = arith.addf %128, %109 : vector<8x64xf32>
    %130 = arith.addf %129, %111 : vector<8x64xf32>
    %131 = arith.addf %130, %113 : vector<8x64xf32>
    %132 = arith.addf %131, %115 : vector<8x64xf32>
    %133 = arith.addf %132, %117 : vector<8x64xf32>
    %134 = arith.addf %133, %119 : vector<8x64xf32>
    %cst_27 = arith.constant 1.000000e+00 : f32
    %135 = vector.broadcast %cst_27 : f32 to vector<8x64xf32>
    %136 = arith.divf %135, %134 : vector<8x64xf32>
    %137 = arith.mulf %89, %136 : vector<8x64xf32>
    %cst_28 = arith.constant dense<0.000000e+00> : vector<8xf32>
    %138 = vector.multi_reduction <add>, %137, %cst_28 [1] : vector<8x64xf32> to vector<8xf32>
    %139 = vector.shape_cast %138 : vector<8xf32> to vector<8x1xf32>
    %cst_29 = arith.constant 9.99999971E-10 : f32
    %140 = vector.broadcast %cst_29 : f32 to vector<8x1xf32>
    %141 = arith.addf %140, %139 : vector<8x1xf32>
    %142 = vector.broadcast %141 : vector<8x1xf32> to vector<8x64xf32>
    %143 = arith.divf %137, %142 : vector<8x64xf32>
    %144 = arith.truncf %143 : vector<8x64xf32> to vector<8x64xbf16>
    %c0_30 = arith.constant 0 : index
    %c0_31 = arith.constant 0 : index
    %145 = vector.load %arg10[%c0_30, %c0_31] : memref<128x64xbf16, #tpu.memory_space<vmem>>, vector<8x64xbf16>
    tpu.vector_store %arg10[%c0_30, %c0_31], %144 {strides = array<i32>} : memref<128x64xbf16, #tpu.memory_space<vmem>>, vector<8x64xbf16>,
    %146 = arith.mulf %91, %136 : vector<8x64xf32>
    %cst_32 = arith.constant dense<0.000000e+00> : vector<8xf32>
    %147 = vector.multi_reduction <add>, %146, %cst_32 [1] : vector<8x64xf32> to vector<8xf32>
    %148 = vector.shape_cast %147 : vector<8xf32> to vector<8x1xf32>
    %cst_33 = arith.constant 9.99999971E-10 : f32
    %149 = vector.broadcast %cst_33 : f32 to vector<8x1xf32>
    %150 = arith.addf %149, %148 : vector<8x1xf32>
    %151 = vector.broadcast %150 : vector<8x1xf32> to vector<8x64xf32>
    %152 = arith.divf %146, %151 : vector<8x64xf32>
    %153 = arith.truncf %152 : vector<8x64xf32> to vector<8x64xbf16>
    %c8_34 = arith.constant 8 : index
    %c0_35 = arith.constant 0 : index
    %154 = vector.load %arg10[%c8_34, %c0_35] : memref<128x64xbf16, #tpu.memory_space<vmem>>, vector<8x64xbf16>
    tpu.vector_store %arg10[%c8_34, %c0_35], %153 {strides = array<i32>} : memref<128x64xbf16, #tpu.memory_space<vmem>>, vector<8x64xbf16>,
    %155 = arith.mulf %93, %136 : vector<8x64xf32>
    %cst_36 = arith.constant dense<0.000000e+00> : vector<8xf32>
    %156 = vector.multi_reduction <add>, %155, %cst_36 [1] : vector<8x64xf32> to vector<8xf32>
    %157 = vector.shape_cast %156 : vector<8xf32> to vector<8x1xf32>
    %cst_37 = arith.constant 9.99999971E-10 : f32
    %158 = vector.broadcast %cst_37 : f32 to vector<8x1xf32>
    %159 = arith.addf %158, %157 : vector<8x1xf32>
    %160 = vector.broadcast %159 : vector<8x1xf32> to vector<8x64xf32>
    %161 = arith.divf %155, %160 : vector<8x64xf32>
    %162 = arith.truncf %161 : vector<8x64xf32> to vector<8x64xbf16>
    %c16_38 = arith.constant 16 : index
    %c0_39 = arith.constant 0 : index
    %163 = vector.load %arg10[%c16_38, %c0_39] : memref<128x64xbf16, #tpu.memory_space<vmem>>, vector<8x64xbf16>
    tpu.vector_store %arg10[%c16_38, %c0_39], %162 {strides = array<i32>} : memref<128x64xbf16, #tpu.memory_space<vmem>>, vector<8x64xbf16>,
    %164 = arith.mulf %95, %136 : vector<8x64xf32>
    %cst_40 = arith.constant dense<0.000000e+00> : vector<8xf32>
    %165 = vector.multi_reduction <add>, %164, %cst_40 [1] : vector<8x64xf32> to vector<8xf32>
    %166 = vector.shape_cast %165 : vector<8xf32> to vector<8x1xf32>
    %cst_41 = arith.constant 9.99999971E-10 : f32
    %167 = vector.broadcast %cst_41 : f32 to vector<8x1xf32>
    %168 = arith.addf %167, %166 : vector<8x1xf32>
    %169 = vector.broadcast %168 : vector<8x1xf32> to vector<8x64xf32>
    %170 = arith.divf %164, %169 : vector<8x64xf32>
    %171 = arith.truncf %170 : vector<8x64xf32> to vector<8x64xbf16>
    %c24_42 = arith.constant 24 : index
    %c0_43 = arith.constant 0 : index
    %172 = vector.load %arg10[%c24_42, %c0_43] : memref<128x64xbf16, #tpu.memory_space<vmem>>, vector<8x64xbf16>
    tpu.vector_store %arg10[%c24_42, %c0_43], %171 {strides = array<i32>} : memref<128x64xbf16, #tpu.memory_space<vmem>>, vector<8x64xbf16>,
    %173 = arith.mulf %97, %136 : vector<8x64xf32>
    %cst_44 = arith.constant dense<0.000000e+00> : vector<8xf32>
    %174 = vector.multi_reduction <add>, %173, %cst_44 [1] : vector<8x64xf32> to vector<8xf32>
    %175 = vector.shape_cast %174 : vector<8xf32> to vector<8x1xf32>
    %cst_45 = arith.constant 9.99999971E-10 : f32
    %176 = vector.broadcast %cst_45 : f32 to vector<8x1xf32>
    %177 = arith.addf %176, %175 : vector<8x1xf32>
    %178 = vector.broadcast %177 : vector<8x1xf32> to vector<8x64xf32>
    %179 = arith.divf %173, %178 : vector<8x64xf32>
    %180 = arith.truncf %179 : vector<8x64xf32> to vector<8x64xbf16>
    %c32_46 = arith.constant 32 : index
    %c0_47 = arith.constant 0 : index
    %181 = vector.load %arg10[%c32_46, %c0_47] : memref<128x64xbf16, #tpu.memory_space<vmem>>, vector<8x64xbf16>
    tpu.vector_store %arg10[%c32_46, %c0_47], %180 {strides = array<i32>} : memref<128x64xbf16, #tpu.memory_space<vmem>>, vector<8x64xbf16>,
    %182 = arith.mulf %99, %136 : vector<8x64xf32>
    %cst_48 = arith.constant dense<0.000000e+00> : vector<8xf32>
    %183 = vector.multi_reduction <add>, %182, %cst_48 [1] : vector<8x64xf32> to vector<8xf32>
    %184 = vector.shape_cast %183 : vector<8xf32> to vector<8x1xf32>
    %cst_49 = arith.constant 9.99999971E-10 : f32
    %185 = vector.broadcast %cst_49 : f32 to vector<8x1xf32>
    %186 = arith.addf %185, %184 : vector<8x1xf32>
    %187 = vector.broadcast %186 : vector<8x1xf32> to vector<8x64xf32>
    %188 = arith.divf %182, %187 : vector<8x64xf32>
    %189 = arith.truncf %188 : vector<8x64xf32> to vector<8x64xbf16>
    %c40_50 = arith.constant 40 : index
    %c0_51 = arith.constant 0 : index
    %190 = vector.load %arg10[%c40_50, %c0_51] : memref<128x64xbf16, #tpu.memory_space<vmem>>, vector<8x64xbf16>
    tpu.vector_store %arg10[%c40_50, %c0_51], %189 {strides = array<i32>} : memref<128x64xbf16, #tpu.memory_space<vmem>>, vector<8x64xbf16>,
    %191 = arith.mulf %101, %136 : vector<8x64xf32>
    %cst_52 = arith.constant dense<0.000000e+00> : vector<8xf32>
    %192 = vector.multi_reduction <add>, %191, %cst_52 [1] : vector<8x64xf32> to vector<8xf32>
    %193 = vector.shape_cast %192 : vector<8xf32> to vector<8x1xf32>
    %cst_53 = arith.constant 9.99999971E-10 : f32
    %194 = vector.broadcast %cst_53 : f32 to vector<8x1xf32>
    %195 = arith.addf %194, %193 : vector<8x1xf32>
    %196 = vector.broadcast %195 : vector<8x1xf32> to vector<8x64xf32>
    %197 = arith.divf %191, %196 : vector<8x64xf32>
    %198 = arith.truncf %197 : vector<8x64xf32> to vector<8x64xbf16>
    %c48_54 = arith.constant 48 : index
    %c0_55 = arith.constant 0 : index
    %199 = vector.load %arg10[%c48_54, %c0_55] : memref<128x64xbf16, #tpu.memory_space<vmem>>, vector<8x64xbf16>
    tpu.vector_store %arg10[%c48_54, %c0_55], %198 {strides = array<i32>} : memref<128x64xbf16, #tpu.memory_space<vmem>>, vector<8x64xbf16>,
    %200 = arith.mulf %103, %136 : vector<8x64xf32>
    %cst_56 = arith.constant dense<0.000000e+00> : vector<8xf32>
    %201 = vector.multi_reduction <add>, %200, %cst_56 [1] : vector<8x64xf32> to vector<8xf32>
    %202 = vector.shape_cast %201 : vector<8xf32> to vector<8x1xf32>
    %cst_57 = arith.constant 9.99999971E-10 : f32
    %203 = vector.broadcast %cst_57 : f32 to vector<8x1xf32>
    %204 = arith.addf %203, %202 : vector<8x1xf32>
    %205 = vector.broadcast %204 : vector<8x1xf32> to vector<8x64xf32>
    %206 = arith.divf %200, %205 : vector<8x64xf32>
    %207 = arith.truncf %206 : vector<8x64xf32> to vector<8x64xbf16>
    %c56_58 = arith.constant 56 : index
    %c0_59 = arith.constant 0 : index
    %208 = vector.load %arg10[%c56_58, %c0_59] : memref<128x64xbf16, #tpu.memory_space<vmem>>, vector<8x64xbf16>
    tpu.vector_store %arg10[%c56_58, %c0_59], %207 {strides = array<i32>} : memref<128x64xbf16, #tpu.memory_space<vmem>>, vector<8x64xbf16>,
    %209 = arith.mulf %105, %136 : vector<8x64xf32>
    %cst_60 = arith.constant dense<0.000000e+00> : vector<8xf32>
    %210 = vector.multi_reduction <add>, %209, %cst_60 [1] : vector<8x64xf32> to vector<8xf32>
    %211 = vector.shape_cast %210 : vector<8xf32> to vector<8x1xf32>
    %cst_61 = arith.constant 9.99999971E-10 : f32
    %212 = vector.broadcast %cst_61 : f32 to vector<8x1xf32>
    %213 = arith.addf %212, %211 : vector<8x1xf32>
    %214 = vector.broadcast %213 : vector<8x1xf32> to vector<8x64xf32>
    %215 = arith.divf %209, %214 : vector<8x64xf32>
    %216 = arith.truncf %215 : vector<8x64xf32> to vector<8x64xbf16>
    %c64_62 = arith.constant 64 : index
    %c0_63 = arith.constant 0 : index
    %217 = vector.load %arg10[%c64_62, %c0_63] : memref<128x64xbf16, #tpu.memory_space<vmem>>, vector<8x64xbf16>
    tpu.vector_store %arg10[%c64_62, %c0_63], %216 {strides = array<i32>} : memref<128x64xbf16, #tpu.memory_space<vmem>>, vector<8x64xbf16>,
    %218 = arith.mulf %107, %136 : vector<8x64xf32>
    %cst_64 = arith.constant dense<0.000000e+00> : vector<8xf32>
    %219 = vector.multi_reduction <add>, %218, %cst_64 [1] : vector<8x64xf32> to vector<8xf32>
    %220 = vector.shape_cast %219 : vector<8xf32> to vector<8x1xf32>
    %cst_65 = arith.constant 9.99999971E-10 : f32
    %221 = vector.broadcast %cst_65 : f32 to vector<8x1xf32>
    %222 = arith.addf %221, %220 : vector<8x1xf32>
    %223 = vector.broadcast %222 : vector<8x1xf32> to vector<8x64xf32>
    %224 = arith.divf %218, %223 : vector<8x64xf32>
    %225 = arith.truncf %224 : vector<8x64xf32> to vector<8x64xbf16>
    %c72_66 = arith.constant 72 : index
    %c0_67 = arith.constant 0 : index
    %226 = vector.load %arg10[%c72_66, %c0_67] : memref<128x64xbf16, #tpu.memory_space<vmem>>, vector<8x64xbf16>
    tpu.vector_store %arg10[%c72_66, %c0_67], %225 {strides = array<i32>} : memref<128x64xbf16, #tpu.memory_space<vmem>>, vector<8x64xbf16>,
    %227 = arith.mulf %109, %136 : vector<8x64xf32>
    %cst_68 = arith.constant dense<0.000000e+00> : vector<8xf32>
    %228 = vector.multi_reduction <add>, %227, %cst_68 [1] : vector<8x64xf32> to vector<8xf32>
    %229 = vector.shape_cast %228 : vector<8xf32> to vector<8x1xf32>
    %cst_69 = arith.constant 9.99999971E-10 : f32
    %230 = vector.broadcast %cst_69 : f32 to vector<8x1xf32>
    %231 = arith.addf %230, %229 : vector<8x1xf32>
    %232 = vector.broadcast %231 : vector<8x1xf32> to vector<8x64xf32>
    %233 = arith.divf %227, %232 : vector<8x64xf32>
    %234 = arith.truncf %233 : vector<8x64xf32> to vector<8x64xbf16>
    %c80_70 = arith.constant 80 : index
    %c0_71 = arith.constant 0 : index
    %235 = vector.load %arg10[%c80_70, %c0_71] : memref<128x64xbf16, #tpu.memory_space<vmem>>, vector<8x64xbf16>
    tpu.vector_store %arg10[%c80_70, %c0_71], %234 {strides = array<i32>} : memref<128x64xbf16, #tpu.memory_space<vmem>>, vector<8x64xbf16>,
    %236 = arith.mulf %111, %136 : vector<8x64xf32>
    %cst_72 = arith.constant dense<0.000000e+00> : vector<8xf32>
    %237 = vector.multi_reduction <add>, %236, %cst_72 [1] : vector<8x64xf32> to vector<8xf32>
    %238 = vector.shape_cast %237 : vector<8xf32> to vector<8x1xf32>
    %cst_73 = arith.constant 9.99999971E-10 : f32
    %239 = vector.broadcast %cst_73 : f32 to vector<8x1xf32>
    %240 = arith.addf %239, %238 : vector<8x1xf32>
    %241 = vector.broadcast %240 : vector<8x1xf32> to vector<8x64xf32>
    %242 = arith.divf %236, %241 : vector<8x64xf32>
    %243 = arith.truncf %242 : vector<8x64xf32> to vector<8x64xbf16>
    %c88_74 = arith.constant 88 : index
    %c0_75 = arith.constant 0 : index
    %244 = vector.load %arg10[%c88_74, %c0_75] : memref<128x64xbf16, #tpu.memory_space<vmem>>, vector<8x64xbf16>
    tpu.vector_store %arg10[%c88_74, %c0_75], %243 {strides = array<i32>} : memref<128x64xbf16, #tpu.memory_space<vmem>>, vector<8x64xbf16>,
    %245 = arith.mulf %113, %136 : vector<8x64xf32>
    %cst_76 = arith.constant dense<0.000000e+00> : vector<8xf32>
    %246 = vector.multi_reduction <add>, %245, %cst_76 [1] : vector<8x64xf32> to vector<8xf32>
    %247 = vector.shape_cast %246 : vector<8xf32> to vector<8x1xf32>
    %cst_77 = arith.constant 9.99999971E-10 : f32
    %248 = vector.broadcast %cst_77 : f32 to vector<8x1xf32>
    %249 = arith.addf %248, %247 : vector<8x1xf32>
    %250 = vector.broadcast %249 : vector<8x1xf32> to vector<8x64xf32>
    %251 = arith.divf %245, %250 : vector<8x64xf32>
    %252 = arith.truncf %251 : vector<8x64xf32> to vector<8x64xbf16>
    %c96_78 = arith.constant 96 : index
    %c0_79 = arith.constant 0 : index
    %253 = vector.load %arg10[%c96_78, %c0_79] : memref<128x64xbf16, #tpu.memory_space<vmem>>, vector<8x64xbf16>
    tpu.vector_store %arg10[%c96_78, %c0_79], %252 {strides = array<i32>} : memref<128x64xbf16, #tpu.memory_space<vmem>>, vector<8x64xbf16>,
    %254 = arith.mulf %115, %136 : vector<8x64xf32>
    %cst_80 = arith.constant dense<0.000000e+00> : vector<8xf32>
    %255 = vector.multi_reduction <add>, %254, %cst_80 [1] : vector<8x64xf32> to vector<8xf32>
    %256 = vector.shape_cast %255 : vector<8xf32> to vector<8x1xf32>
    %cst_81 = arith.constant 9.99999971E-10 : f32
    %257 = vector.broadcast %cst_81 : f32 to vector<8x1xf32>
    %258 = arith.addf %257, %256 : vector<8x1xf32>
    %259 = vector.broadcast %258 : vector<8x1xf32> to vector<8x64xf32>
    %260 = arith.divf %254, %259 : vector<8x64xf32>
    %261 = arith.truncf %260 : vector<8x64xf32> to vector<8x64xbf16>
    %c104_82 = arith.constant 104 : index
    %c0_83 = arith.constant 0 : index
    %262 = vector.load %arg10[%c104_82, %c0_83] : memref<128x64xbf16, #tpu.memory_space<vmem>>, vector<8x64xbf16>
    tpu.vector_store %arg10[%c104_82, %c0_83], %261 {strides = array<i32>} : memref<128x64xbf16, #tpu.memory_space<vmem>>, vector<8x64xbf16>,
    %263 = arith.mulf %117, %136 : vector<8x64xf32>
    %cst_84 = arith.constant dense<0.000000e+00> : vector<8xf32>
    %264 = vector.multi_reduction <add>, %263, %cst_84 [1] : vector<8x64xf32> to vector<8xf32>
    %265 = vector.shape_cast %264 : vector<8xf32> to vector<8x1xf32>
    %cst_85 = arith.constant 9.99999971E-10 : f32
    %266 = vector.broadcast %cst_85 : f32 to vector<8x1xf32>
    %267 = arith.addf %266, %265 : vector<8x1xf32>
    %268 = vector.broadcast %267 : vector<8x1xf32> to vector<8x64xf32>
    %269 = arith.divf %263, %268 : vector<8x64xf32>
    %270 = arith.truncf %269 : vector<8x64xf32> to vector<8x64xbf16>
    %c112_86 = arith.constant 112 : index
    %c0_87 = arith.constant 0 : index
    %271 = vector.load %arg10[%c112_86, %c0_87] : memref<128x64xbf16, #tpu.memory_space<vmem>>, vector<8x64xbf16>
    tpu.vector_store %arg10[%c112_86, %c0_87], %270 {strides = array<i32>} : memref<128x64xbf16, #tpu.memory_space<vmem>>, vector<8x64xbf16>,
    %272 = arith.mulf %119, %136 : vector<8x64xf32>
    %cst_88 = arith.constant dense<0.000000e+00> : vector<8xf32>
    %273 = vector.multi_reduction <add>, %272, %cst_88 [1] : vector<8x64xf32> to vector<8xf32>
    %274 = vector.shape_cast %273 : vector<8xf32> to vector<8x1xf32>
    %cst_89 = arith.constant 9.99999971E-10 : f32
    %275 = vector.broadcast %cst_89 : f32 to vector<8x1xf32>
    %276 = arith.addf %275, %274 : vector<8x1xf32>
    %277 = vector.broadcast %276 : vector<8x1xf32> to vector<8x64xf32>
    %278 = arith.divf %272, %277 : vector<8x64xf32>
    %279 = arith.truncf %278 : vector<8x64xf32> to vector<8x64xbf16>
    %c120_90 = arith.constant 120 : index
    %c0_91 = arith.constant 0 : index
    %280 = vector.load %arg10[%c120_90, %c0_91] : memref<128x64xbf16, #tpu.memory_space<vmem>>, vector<8x64xbf16>
    tpu.vector_store %arg10[%c120_90, %c0_91], %279 {strides = array<i32>} : memref<128x64xbf16, #tpu.memory_space<vmem>>, vector<8x64xbf16>,
    %c0_92 = arith.constant 0 : index
    %c0_93 = arith.constant 0 : index
    %281 = vector.load %arg10[%c0_92, %c0_93] : memref<128x64xbf16, #tpu.memory_space<vmem>>, vector<128x64xbf16>
    %c0_94 = arith.constant 0 : index
    %c0_95 = arith.constant 0 : index
    %282 = vector.load %arg5[%c0_94, %c0_95] : memref<64x256xbf16, #tpu.memory_space<vmem>>, vector<64x256xbf16>
    %cst_96 = arith.constant dense<0.000000e+00> : vector<128x256xf32>
    %283 = tpu.matmul %281, %282, %cst_96 {dimension_numbers = #tpu.dot_dimension_numbers<[1], [0], [0], [1], [0, 0, 1, 1], [], []>} : vector<128x64xbf16>, vector<64x256xbf16>, vector<128x256xf32> -> vector<128x256xf32>
    %284 = vector.extract_strided_slice %283 {offsets = [0, 0], sizes = [8, 256], strides = [1, 1]} : vector<128x256xf32> to vector<8x256xf32>
    %285 = arith.truncf %284 : vector<8x256xf32> to vector<8x256xbf16>
    %c0_97 = arith.constant 0 : index
    %c0_98 = arith.constant 0 : index
    %286 = vector.load %arg11[%c0_97, %c0_98] : memref<8x4096xbf16, #tpu.memory_space<vmem>>, vector<8x256xbf16>
    tpu.vector_store %arg11[%c0_97, %c0_98], %285 {strides = array<i32>} : memref<8x4096xbf16, #tpu.memory_space<vmem>>, vector<8x256xbf16>,
    %287 = vector.extract_strided_slice %283 {offsets = [8, 0], sizes = [8, 256], strides = [1, 1]} : vector<128x256xf32> to vector<8x256xf32>
    %288 = arith.truncf %287 : vector<8x256xf32> to vector<8x256xbf16>
    %c0_99 = arith.constant 0 : index
    %c256 = arith.constant 256 : index
    %289 = vector.load %arg11[%c0_99, %c256] : memref<8x4096xbf16, #tpu.memory_space<vmem>>, vector<8x256xbf16>
    tpu.vector_store %arg11[%c0_99, %c256], %288 {strides = array<i32>} : memref<8x4096xbf16, #tpu.memory_space<vmem>>, vector<8x256xbf16>,
    %290 = vector.extract_strided_slice %283 {offsets = [16, 0], sizes = [8, 256], strides = [1, 1]} : vector<128x256xf32> to vector<8x256xf32>
    %291 = arith.truncf %290 : vector<8x256xf32> to vector<8x256xbf16>
    %c0_100 = arith.constant 0 : index
    %c512 = arith.constant 512 : index
    %292 = vector.load %arg11[%c0_100, %c512] : memref<8x4096xbf16, #tpu.memory_space<vmem>>, vector<8x256xbf16>
    tpu.vector_store %arg11[%c0_100, %c512], %291 {strides = array<i32>} : memref<8x4096xbf16, #tpu.memory_space<vmem>>, vector<8x256xbf16>,
    %293 = vector.extract_strided_slice %283 {offsets = [24, 0], sizes = [8, 256], strides = [1, 1]} : vector<128x256xf32> to vector<8x256xf32>
    %294 = arith.truncf %293 : vector<8x256xf32> to vector<8x256xbf16>
    %c0_101 = arith.constant 0 : index
    %c768 = arith.constant 768 : index
    %295 = vector.load %arg11[%c0_101, %c768] : memref<8x4096xbf16, #tpu.memory_space<vmem>>, vector<8x256xbf16>
    tpu.vector_store %arg11[%c0_101, %c768], %294 {strides = array<i32>} : memref<8x4096xbf16, #tpu.memory_space<vmem>>, vector<8x256xbf16>,
    %296 = vector.extract_strided_slice %283 {offsets = [32, 0], sizes = [8, 256], strides = [1, 1]} : vector<128x256xf32> to vector<8x256xf32>
    %297 = arith.truncf %296 : vector<8x256xf32> to vector<8x256xbf16>
    %c0_102 = arith.constant 0 : index
    %c1024 = arith.constant 1024 : index
    %298 = vector.load %arg11[%c0_102, %c1024] : memref<8x4096xbf16, #tpu.memory_space<vmem>>, vector<8x256xbf16>
    tpu.vector_store %arg11[%c0_102, %c1024], %297 {strides = array<i32>} : memref<8x4096xbf16, #tpu.memory_space<vmem>>, vector<8x256xbf16>,
    %299 = vector.extract_strided_slice %283 {offsets = [40, 0], sizes = [8, 256], strides = [1, 1]} : vector<128x256xf32> to vector<8x256xf32>
    %300 = arith.truncf %299 : vector<8x256xf32> to vector<8x256xbf16>
    %c0_103 = arith.constant 0 : index
    %c1280 = arith.constant 1280 : index
    %301 = vector.load %arg11[%c0_103, %c1280] : memref<8x4096xbf16, #tpu.memory_space<vmem>>, vector<8x256xbf16>
    tpu.vector_store %arg11[%c0_103, %c1280], %300 {strides = array<i32>} : memref<8x4096xbf16, #tpu.memory_space<vmem>>, vector<8x256xbf16>,
    %302 = vector.extract_strided_slice %283 {offsets = [48, 0], sizes = [8, 256], strides = [1, 1]} : vector<128x256xf32> to vector<8x256xf32>
    %303 = arith.truncf %302 : vector<8x256xf32> to vector<8x256xbf16>
    %c0_104 = arith.constant 0 : index
    %c1536 = arith.constant 1536 : index
    %304 = vector.load %arg11[%c0_104, %c1536] : memref<8x4096xbf16, #tpu.memory_space<vmem>>, vector<8x256xbf16>
    tpu.vector_store %arg11[%c0_104, %c1536], %303 {strides = array<i32>} : memref<8x4096xbf16, #tpu.memory_space<vmem>>, vector<8x256xbf16>,
    %305 = vector.extract_strided_slice %283 {offsets = [56, 0], sizes = [8, 256], strides = [1, 1]} : vector<128x256xf32> to vector<8x256xf32>
    %306 = arith.truncf %305 : vector<8x256xf32> to vector<8x256xbf16>
    %c0_105 = arith.constant 0 : index
    %c1792 = arith.constant 1792 : index
    %307 = vector.load %arg11[%c0_105, %c1792] : memref<8x4096xbf16, #tpu.memory_space<vmem>>, vector<8x256xbf16>
    tpu.vector_store %arg11[%c0_105, %c1792], %306 {strides = array<i32>} : memref<8x4096xbf16, #tpu.memory_space<vmem>>, vector<8x256xbf16>,
    %308 = vector.extract_strided_slice %283 {offsets = [64, 0], sizes = [8, 256], strides = [1, 1]} : vector<128x256xf32> to vector<8x256xf32>
    %309 = arith.truncf %308 : vector<8x256xf32> to vector<8x256xbf16>
    %c0_106 = arith.constant 0 : index
    %c2048 = arith.constant 2048 : index
    %310 = vector.load %arg11[%c0_106, %c2048] : memref<8x4096xbf16, #tpu.memory_space<vmem>>, vector<8x256xbf16>
    tpu.vector_store %arg11[%c0_106, %c2048], %309 {strides = array<i32>} : memref<8x4096xbf16, #tpu.memory_space<vmem>>, vector<8x256xbf16>,
    %311 = vector.extract_strided_slice %283 {offsets = [72, 0], sizes = [8, 256], strides = [1, 1]} : vector<128x256xf32> to vector<8x256xf32>
    %312 = arith.truncf %311 : vector<8x256xf32> to vector<8x256xbf16>
    %c0_107 = arith.constant 0 : index
    %c2304 = arith.constant 2304 : index
    %313 = vector.load %arg11[%c0_107, %c2304] : memref<8x4096xbf16, #tpu.memory_space<vmem>>, vector<8x256xbf16>
    tpu.vector_store %arg11[%c0_107, %c2304], %312 {strides = array<i32>} : memref<8x4096xbf16, #tpu.memory_space<vmem>>, vector<8x256xbf16>,
    %314 = vector.extract_strided_slice %283 {offsets = [80, 0], sizes = [8, 256], strides = [1, 1]} : vector<128x256xf32> to vector<8x256xf32>
    %315 = arith.truncf %314 : vector<8x256xf32> to vector<8x256xbf16>
    %c0_108 = arith.constant 0 : index
    %c2560 = arith.constant 2560 : index
    %316 = vector.load %arg11[%c0_108, %c2560] : memref<8x4096xbf16, #tpu.memory_space<vmem>>, vector<8x256xbf16>
    tpu.vector_store %arg11[%c0_108, %c2560], %315 {strides = array<i32>} : memref<8x4096xbf16, #tpu.memory_space<vmem>>, vector<8x256xbf16>,
    %317 = vector.extract_strided_slice %283 {offsets = [88, 0], sizes = [8, 256], strides = [1, 1]} : vector<128x256xf32> to vector<8x256xf32>
    %318 = arith.truncf %317 : vector<8x256xf32> to vector<8x256xbf16>
    %c0_109 = arith.constant 0 : index
    %c2816 = arith.constant 2816 : index
    %319 = vector.load %arg11[%c0_109, %c2816] : memref<8x4096xbf16, #tpu.memory_space<vmem>>, vector<8x256xbf16>
    tpu.vector_store %arg11[%c0_109, %c2816], %318 {strides = array<i32>} : memref<8x4096xbf16, #tpu.memory_space<vmem>>, vector<8x256xbf16>,
    %320 = vector.extract_strided_slice %283 {offsets = [96, 0], sizes = [8, 256], strides = [1, 1]} : vector<128x256xf32> to vector<8x256xf32>
    %321 = arith.truncf %320 : vector<8x256xf32> to vector<8x256xbf16>
    %c0_110 = arith.constant 0 : index
    %c3072 = arith.constant 3072 : index
    %322 = vector.load %arg11[%c0_110, %c3072] : memref<8x4096xbf16, #tpu.memory_space<vmem>>, vector<8x256xbf16>
    tpu.vector_store %arg11[%c0_110, %c3072], %321 {strides = array<i32>} : memref<8x4096xbf16, #tpu.memory_space<vmem>>, vector<8x256xbf16>,
    %323 = vector.extract_strided_slice %283 {offsets = [104, 0], sizes = [8, 256], strides = [1, 1]} : vector<128x256xf32> to vector<8x256xf32>
    %324 = arith.truncf %323 : vector<8x256xf32> to vector<8x256xbf16>
    %c0_111 = arith.constant 0 : index
    %c3328 = arith.constant 3328 : index
    %325 = vector.load %arg11[%c0_111, %c3328] : memref<8x4096xbf16, #tpu.memory_space<vmem>>, vector<8x256xbf16>
    tpu.vector_store %arg11[%c0_111, %c3328], %324 {strides = array<i32>} : memref<8x4096xbf16, #tpu.memory_space<vmem>>, vector<8x256xbf16>,
    %326 = vector.extract_strided_slice %283 {offsets = [112, 0], sizes = [8, 256], strides = [1, 1]} : vector<128x256xf32> to vector<8x256xf32>
    %327 = arith.truncf %326 : vector<8x256xf32> to vector<8x256xbf16>
    %c0_112 = arith.constant 0 : index
    %c3584 = arith.constant 3584 : index
    %328 = vector.load %arg11[%c0_112, %c3584] : memref<8x4096xbf16, #tpu.memory_space<vmem>>, vector<8x256xbf16>
    tpu.vector_store %arg11[%c0_112, %c3584], %327 {strides = array<i32>} : memref<8x4096xbf16, #tpu.memory_space<vmem>>, vector<8x256xbf16>,
    %329 = vector.extract_strided_slice %283 {offsets = [120, 0], sizes = [8, 256], strides = [1, 1]} : vector<128x256xf32> to vector<8x256xf32>
    %330 = arith.truncf %329 : vector<8x256xf32> to vector<8x256xbf16>
    %c0_113 = arith.constant 0 : index
    %c3840 = arith.constant 3840 : index
    %331 = vector.load %arg11[%c0_113, %c3840] : memref<8x4096xbf16, #tpu.memory_space<vmem>>, vector<8x256xbf16>
    tpu.vector_store %arg11[%c0_113, %c3840], %330 {strides = array<i32>} : memref<8x4096xbf16, #tpu.memory_space<vmem>>, vector<8x256xbf16>,
    %c0_114 = arith.constant 0 : index
    %c0_115 = arith.constant 0 : index
    %332 = vector.load %arg11[%c0_114, %c0_115] : memref<8x4096xbf16, #tpu.memory_space<vmem>>, vector<8x4096xbf16>
    %c0_116 = arith.constant 0 : index
    %c0_117 = arith.constant 0 : index
    %333 = vector.load %arg6[%c0_116, %c0_117] : memref<4096x128xbf16, #tpu.memory_space<vmem>>, vector<4096x128xbf16>
    %cst_118 = arith.constant dense<0.000000e+00> : vector<8x128xf32>
    %334 = tpu.matmul %332, %333, %cst_118 {dimension_numbers = #tpu.dot_dimension_numbers<[1], [0], [0], [1], [0, 0, 1, 1], [], []>} : vector<8x4096xbf16>, vector<4096x128xbf16>, vector<8x128xf32> -> vector<8x128xf32>
    %c0_119 = arith.constant 0 : index
    %c0_120 = arith.constant 0 : index
    %335 = vector.load %arg7[%c0_119, %c0_120] : memref<1x128xf32, #tpu.memory_space<vmem>>, vector<1x128xf32>
    %336 = vector.broadcast %335 : vector<1x128xf32> to vector<8x128xf32>
    %337 = arith.addf %334, %336 : vector<8x128xf32>
    %c0_121 = arith.constant 0 : index
    %c0_122 = arith.constant 0 : index
    %338 = vector.load %arg8[%c0_121, %c0_122] : memref<8x128xf32, #tpu.memory_space<vmem>>, vector<8x128xf32>
    tpu.vector_store %arg8[%c0_121, %c0_122], %337 {strides = array<i32>} : memref<8x128xf32, #tpu.memory_space<vmem>>, vector<8x128xf32>,
    return
  }
  func.func @transform_0(%arg0: i32) -> (i32, i32) {
    %c0_i32 = arith.constant 0 : i32
    %c0_i32_0 = arith.constant 0 : i32
    return %arg0, %c0_i32 : i32, i32
  }
  func.func @transform_1(%arg0: i32) -> (i32, i32) {
    %c0_i32 = arith.constant 0 : i32
    %c0_i32_0 = arith.constant 0 : i32
    %c0_i32_1 = arith.constant 0 : i32
    return %c0_i32, %c0_i32_0 : i32, i32
  }
  func.func @transform_2(%arg0: i32) -> (i32, i32) {
    %c0_i32 = arith.constant 0 : i32
    %c0_i32_0 = arith.constant 0 : i32
    %c0_i32_1 = arith.constant 0 : i32
    return %c0_i32, %c0_i32_0 : i32, i32
  }
  func.func @transform_3(%arg0: i32) -> (i32, i32) {
    %c0_i32 = arith.constant 0 : i32
    %c0_i32_0 = arith.constant 0 : i32
    %c0_i32_1 = arith.constant 0 : i32
    return %c0_i32, %c0_i32_0 : i32, i32
  }
  func.func @transform_4(%arg0: i32) -> (i32, i32) {
    %c0_i32 = arith.constant 0 : i32
    %c0_i32_0 = arith.constant 0 : i32
    %c0_i32_1 = arith.constant 0 : i32
    return %c0_i32, %c0_i32_0 : i32, i32
  }
  func.func @transform_5(%arg0: i32) -> (i32, i32) {
    %c0_i32 = arith.constant 0 : i32
    %c0_i32_0 = arith.constant 0 : i32
    %c0_i32_1 = arith.constant 0 : i32
    return %c0_i32, %c0_i32_0 : i32, i32
  }
  func.func @transform_6(%arg0: i32) -> (i32, i32) {
    %c0_i32 = arith.constant 0 : i32
    %c0_i32_0 = arith.constant 0 : i32
    %c0_i32_1 = arith.constant 0 : i32
    return %c0_i32, %c0_i32_0 : i32, i32
  }
  func.func @transform_7(%arg0: i32) -> (i32, i32) {
    %c0_i32 = arith.constant 0 : i32
    %c0_i32_0 = arith.constant 0 : i32
    return %arg0, %c0_i32 : i32, i32
  }
}

</mosaic_0001>

<bundles_post_ra>
// kernel: tpu_custom_call.1
= control target key start
LH: loop header
LB: loop body
LE: loop exit
PB: predicated region body
PF: predicated region fallthrough
CT: control target
= control target key end

     0   :  { %12 = vsyncpa [#allocation6], 0  ;;  %s8237_s0 = inlined_call_operand.vmem [shape: bf16[8,128], index: 0, kind: input, shape index: {}]   ;;  %s8238_s1 = inlined_call_operand.hbm [shape: bf16[128,4096], index: 1, kind: input, shape index: {}]   ;;  %s8239_s2 = inlined_call_operand.vmem [shape: f32[1,4096], index: 2, kind: input, shape index: {}]   ;;  %s8240_s3 = inlined_call_operand.vmem [shape: bf16[256,64], index: 3, kind: input, shape index: {}]   ;;  %s8241_s4 = inlined_call_operand.vmem [shape: bf16[64,256], index: 4, kind: input, shape index: {}]   ;;  %s8242_s5 = inlined_call_operand.hbm [shape: bf16[4096,128], index: 5, kind: input, shape index: {}]   ;;  %s8243_s6 = inlined_call_operand.vmem [shape: f32[1,128], index: 6, kind: input, shape index: {}]   ;;  %s8244_s7 = inlined_call_operand.hbm [shape: f32[8,128], index: 7, kind: output, shape index: {}]  }
   0x1   :  { %13 = vsyncpa [#allocation9], 0 }
   0x2   :  { %14 = vsyncpa [#allocation7], 0  ;;  %s7687_s24 = smov [#allocation5]   ;;  %s7615_s28 = scalar_lea.hbm %s8238_s1, 32768 }
   0x3   :  { %s22_s25 = sshll.u32 %s7687_s24, 4  ;;  %p7616_p0 = scmp.ne.s32.totalorder %s8238_s1, %s7615_s28  ;;  %s23_s25 = int_to_ptr.vmem [resolvable:$true] %s22_s25 }
   0x4   :  { %p7619_p1 = scmp.lt.u32.totalorder %s7615_s28, %s8238_s1 }
   0x6   :  { %p7621_p2 = pnand %p7619_p1, %p7616_p0 }
   0x8   :  { %7624 = shalt.err (!%p7621_p2)
}
   0x9   :  { %s7625_s10 = scalar_lea.vmem %s23_s25, 32768  ;;  %p7630_p4 = scmp.lt.s32.totalorder %s23_s25, %s23_s25 }
   0xa   :  { %p7626_p3 = scmp.ne.s32.totalorder %s23_s25, %s7625_s10  ;;  %p7631_p5 = scmp.lt.s32.totalorder %s7625_s10, %s7625_s10 }
   0xc   :  { %p7632_p6 = por %p7631_p5, %p7630_p4 }
   0xe   :  { %p7633_p7 = pnand %p7632_p6, %p7626_p3 }
  0x10   :  { %7636 = shalt.err (!%p7633_p7)
}
  0x11   :  { %s7688_s11 = smov 2048   ;;  %s7689_s12 = smov 128  }
  0x12   :  { %28 = dma.hbm_to_vmem [thread:$0]  %s8238_s1, 32768, %s23_s25, [#allocation6], %s7688_s11, %s7688_s11, %s7689_s12  }
  0x13   :  { %s7690_s15 = smov [#allocation8]   ;;  %s7637_s19 = scalar_lea.hbm %s8242_s5, 32768 }
  0x14   :  { %s40_s16 = sshll.u32 %s7690_s15, 4  ;;  %p7638_p8 = scmp.ne.s32.totalorder %s8242_s5, %s7637_s19  ;;  %s41_s16 = int_to_ptr.vmem [resolvable:$true] %s40_s16 }
  0x15   :  { %p7641_p9 = scmp.lt.u32.totalorder %s7637_s19, %s8242_s5 }
  0x17   :  { %p7643_p10 = pnand %p7641_p9, %p7638_p8 }
  0x19   :  { %7646 = shalt.err (!%p7643_p10)
}
  0x1a   :  { %s7647_s24 = scalar_lea.vmem %s41_s16, 32768  ;;  %p7652_p12 = scmp.lt.s32.totalorder %s41_s16, %s41_s16 }
  0x1b   :  { %p7648_p11 = scmp.ne.s32.totalorder %s41_s16, %s7647_s24  ;;  %p7653_p13 = scmp.lt.s32.totalorder %s7647_s24, %s7647_s24 }
  0x1d   :  { %p7654_p0 = por %p7653_p13, %p7652_p12 }
  0x1f   :  { %p7655_p1 = pnand %p7654_p0, %p7648_p11 }
  0x21   :  { %7658 = shalt.err (!%p7655_p1)
}
  0x22   :  { %s7691_s1 = smov 64   ;;  %s7692_s25 = smov 4  }
  0x23   :  { %46 = dma.hbm_to_vmem [thread:$0]  %s8242_s5, 32768, %s41_s16, [#allocation9], %s7691_s1, %s7691_s1, %s7692_s25  }
  0x24   :  { %7681 = dma.done.wait [#allocation6], 32768  }
  0x25   :  { %7682 = vsyncadd [#allocation6], 4294934528 }
  0x26   :  { %7683 = dma.done.wait [#allocation9], 32768  }
  0x27   :  { %7684 = vsyncadd [#allocation9], 4294934528  ;;  %v7693_v0 = vmov 0   ;;  %v57_v1 = vld [vmem:[#allocation5] sm:$0xff]  ;;  %v58_v3 = vld [vmem:[#allocation5 + $0x8] sm:$0xff]  ;;  %vm2851_vm0 = vcmask 523264  }
  0x28   :  { %1793 = vmatprep.mubr.bf16.mxu0 %v7693_v0  ;;  %1834 = vmatprep.mubr.bf16.mxu1 %v7693_v0  ;;  %v73_v2 = vld [vmem:[#allocation5 + $0x80] sm:$0xff]  ;;  %v74_v5 = vld [vmem:[#allocation5 + $0x88] sm:$0xff]  ;;  %v59_v63 = vld [vmem:[#allocation5 + $0x10] sm:$0xff]  ;;  %vm2872_vm1 = vcmask 523268   ;;  %vm2859_vm2 = vcmask 519168  }
  0x29   :  { %v6199_v4 = vcombine.high %v57_v1, %v73_v2  ;;  %v6198_v6 = vcombine.low %v57_v1, %v73_v2  ;;  %v89_v7 = vld [vmem:[#allocation5 + $0x100] sm:$0xff]  ;;  %v6201_v9 = vcombine.high %v58_v3, %v74_v5  ;;  %v6200_v10 = vcombine.low %v58_v3, %v74_v5  ;;  %v90_v12 = vld [vmem:[#allocation5 + $0x108] sm:$0xff]  ;;  %v75_v1 = vld [vmem:[#allocation5 + $0x90] sm:$0xff] }
  0x2a   :  { %v105_v8 = vld [vmem:[#allocation5 + $0x180] sm:$0xff]  ;;  %v106_v13 = vld [vmem:[#allocation5 + $0x188] sm:$0xff]  ;;  %v60_v2 = vld [vmem:[#allocation5 + $0x18] sm:$0xff] }
  0x2b   :  { %v6231_v11 = vcombine.high %v89_v7, %v105_v8  ;;  %v121_v14 = vld [vmem:[#allocation5 + $0x200] sm:$0xff]  ;;  %1761 = vmatprep.subr.bf16.mxu0 %v6199_v4  ;;  %v6233_v15 = vcombine.high %v90_v12, %v106_v13  ;;  %v122_v17 = vld [vmem:[#allocation5 + $0x208] sm:$0xff]  ;;  %1802 = vmatprep.subr.bf16.mxu1 %v6201_v9  ;;  %v6230_v19 = vcombine.low %v89_v7, %v105_v8  ;;  %v76_v3 = vld [vmem:[#allocation5 + $0x98] sm:$0xff] }
  0x2c   :  { %v137_v16 = vld [vmem:[#allocation5 + $0x280] sm:$0xff]  ;;  %v138_v18 = vld [vmem:[#allocation5 + $0x288] sm:$0xff]  ;;  %1762 = vmatpush1.bf16.msra.mxu0 %v6198_v6  ;;  %1803 = vmatpush1.bf16.msra.mxu1 %v6200_v10  ;;  %v6232_v20 = vcombine.low %v90_v12, %v106_v13  ;;  %v6203_v6 = vcombine.high %v59_v63, %v75_v1  ;;  %v6205_v7 = vcombine.high %v60_v2, %v76_v3  ;;  %v91_v8 = vld [vmem:[#allocation5 + $0x110] sm:$0xff] }
  0x2d   :  { %1763 = vmatprep.subr.bf16.mxu0 %v6231_v11  ;;  %v6263_v21 = vcombine.high %v121_v14, %v137_v16  ;;  %1804 = vmatprep.subr.bf16.mxu1 %v6233_v15  ;;  %v6265_v22 = vcombine.high %v122_v17, %v138_v18  ;;  %v153_v23 = vld [vmem:[#allocation5 + $0x300] sm:$0xff]  ;;  %v154_v25 = vld [vmem:[#allocation5 + $0x308] sm:$0xff]  ;;  %v6262_v27 = vcombine.low %v121_v14, %v137_v16  ;;  %v107_v9 = vld [vmem:[#allocation5 + $0x190] sm:$0xff] }
  0x2e   :  { %v169_v24 = vld [vmem:[#allocation5 + $0x380] sm:$0xff]  ;;  %v170_v26 = vld [vmem:[#allocation5 + $0x388] sm:$0xff]  ;;  %v6264_v28 = vcombine.low %v122_v17, %v138_v18  ;;  %v92_v10 = vld [vmem:[#allocation5 + $0x118] sm:$0xff]  ;;  %v6202_v13 = vcombine.low %v59_v63, %v75_v1  ;;  %v6204_v14 = vcombine.low %v60_v2, %v76_v3  ;;  %v6235_v15 = vcombine.high %v91_v8, %v107_v9 }
  0x2f   :  { %v6295_v29 = vcombine.high %v153_v23, %v169_v24  ;;  %v6297_v30 = vcombine.high %v154_v25, %v170_v26  ;;  %v185_v31 = vld [vmem:[#allocation5 + $0x400] sm:$0xff]  ;;  %v186_v33 = vld [vmem:[#allocation5 + $0x408] sm:$0xff]  ;;  %v6294_v35 = vcombine.low %v153_v23, %v169_v24  ;;  %v6296_v36 = vcombine.low %v154_v25, %v170_v26  ;;  %v108_v11 = vld [vmem:[#allocation5 + $0x198] sm:$0xff] }
  0x30   :  { %1764 = vmatpush1.bf16.msra.mxu0 %v6230_v19  ;;  %1805 = vmatpush1.bf16.msra.mxu1 %v6232_v20  ;;  %v201_v32 = vld [vmem:[#allocation5 + $0x480] sm:$0xff]  ;;  %v202_v34 = vld [vmem:[#allocation5 + $0x488] sm:$0xff]  ;;  %v6237_v16 = vcombine.high %v92_v10, %v108_v11  ;;  %v123_v17 = vld [vmem:[#allocation5 + $0x210] sm:$0xff] }
  0x31   :  { %1765 = vmatprep.subr.bf16.mxu0 %v6263_v21  ;;  %1806 = vmatprep.subr.bf16.mxu1 %v6265_v22  ;;  %v6327_v37 = vcombine.high %v185_v31, %v201_v32  ;;  %v6329_v38 = vcombine.high %v186_v33, %v202_v34  ;;  %v217_v39 = vld [vmem:[#allocation5 + $0x500] sm:$0xff]  ;;  %v218_v41 = vld [vmem:[#allocation5 + $0x508] sm:$0xff]  ;;  %v6326_v43 = vcombine.low %v185_v31, %v201_v32  ;;  %v139_v18 = vld [vmem:[#allocation5 + $0x290] sm:$0xff] }
  0x32   :  { %v233_v40 = vld [vmem:[#allocation5 + $0x580] sm:$0xff]  ;;  %v234_v42 = vld [vmem:[#allocation5 + $0x588] sm:$0xff]  ;;  %v6328_v44 = vcombine.low %v186_v33, %v202_v34  ;;  %v124_v19 = vld [vmem:[#allocation5 + $0x218] sm:$0xff]  ;;  %v6234_v21 = vcombine.low %v91_v8, %v107_v9  ;;  %v6236_v22 = vcombine.low %v92_v10, %v108_v11  ;;  %v6267_v23 = vcombine.high %v123_v17, %v139_v18 }
  0x33   :  { %v6359_v45 = vcombine.high %v217_v39, %v233_v40  ;;  %v6361_v46 = vcombine.high %v218_v41, %v234_v42  ;;  %v249_v47 = vld [vmem:[#allocation5 + $0x600] sm:$0xff]  ;;  %v250_v49 = vld [vmem:[#allocation5 + $0x608] sm:$0xff]  ;;  %v6358_v51 = vcombine.low %v217_v39, %v233_v40  ;;  %v6360_v52 = vcombine.low %v218_v41, %v234_v42  ;;  %v140_v20 = vld [vmem:[#allocation5 + $0x298] sm:$0xff] }
  0x34   :  { %1766 = vmatpush1.bf16.msra.mxu0 %v6262_v27  ;;  %1807 = vmatpush1.bf16.msra.mxu1 %v6264_v28  ;;  %v265_v48 = vld [vmem:[#allocation5 + $0x680] sm:$0xff]  ;;  %v266_v50 = vld [vmem:[#allocation5 + $0x688] sm:$0xff]  ;;  %v6269_v24 = vcombine.high %v124_v19, %v140_v20  ;;  %v155_v25 = vld [vmem:[#allocation5 + $0x310] sm:$0xff] }
  0x35   :  { %1767 = vmatprep.subr.bf16.mxu0 %v6295_v29  ;;  %1808 = vmatprep.subr.bf16.mxu1 %v6297_v30  ;;  %v6391_v53 = vcombine.high %v249_v47, %v265_v48  ;;  %v6393_v54 = vcombine.high %v250_v49, %v266_v50  ;;  %v281_v55 = vld [vmem:[#allocation5 + $0x700] sm:$0xff]  ;;  %v282_v57 = vld [vmem:[#allocation5 + $0x708] sm:$0xff]  ;;  %v6390_v59 = vcombine.low %v249_v47, %v265_v48  ;;  %v171_v26 = vld [vmem:[#allocation5 + $0x390] sm:$0xff] }
  0x36   :  { %v297_v56 = vld [vmem:[#allocation5 + $0x780] sm:$0xff]  ;;  %v298_v58 = vld [vmem:[#allocation5 + $0x788] sm:$0xff]  ;;  %v6392_v60 = vcombine.low %v250_v49, %v266_v50  ;;  %v156_v27 = vld [vmem:[#allocation5 + $0x318] sm:$0xff]  ;;  %v6266_v29 = vcombine.low %v123_v17, %v139_v18  ;;  %v6268_v30 = vcombine.low %v124_v19, %v140_v20  ;;  %v6299_v31 = vcombine.high %v155_v25, %v171_v26 }
  0x37   :  { %v6423_v61 = vcombine.high %v281_v55, %v297_v56  ;;  %v6425_v62 = vcombine.high %v282_v57, %v298_v58  ;;  %v6422_v4 = vcombine.low %v281_v55, %v297_v56  ;;  %v6424_v5 = vcombine.low %v282_v57, %v298_v58  ;;  %v7764_v12 = vld [vmem:[%s8237_s0] sm:$0xf]  ;;  %v172_v28 = vld [vmem:[#allocation5 + $0x398] sm:$0xff]  ;;  %v187_v33 = vld [vmem:[#allocation5 + $0x410] sm:$0xff] }
  0x38   :  { %1768 = vmatpush1.bf16.msra.mxu0 %v6294_v35  ;;  %1809 = vmatpush1.bf16.msra.mxu1 %v6296_v36  ;;  %v6301_v32 = vcombine.high %v156_v27, %v172_v28  ;;  %v203_v34 = vld [vmem:[#allocation5 + $0x490] sm:$0xff]  ;;  %v188_v35 = vld [vmem:[#allocation5 + $0x418] sm:$0xff]  ;;  %v61_v2 = vld [vmem:[#allocation5 + $0x20] sm:$0xff] }
  0x39   :  { %1769 = vmatprep.subr.bf16.mxu0 %v6327_v37  ;;  %1810 = vmatprep.subr.bf16.mxu1 %v6329_v38  ;;  %v204_v36 = vld [vmem:[#allocation5 + $0x498] sm:$0xff]  ;;  %v6298_v37 = vcombine.low %v155_v25, %v171_v26  ;;  %v6300_v38 = vcombine.low %v156_v27, %v172_v28  ;;  %v6331_v39 = vcombine.high %v187_v33, %v203_v34  ;;  %v219_v41 = vld [vmem:[#allocation5 + $0x510] sm:$0xff]  ;;  %v77_v3 = vld [vmem:[#allocation5 + $0xa0] sm:$0xff] }
  0x3a   :  { %v6333_v40 = vcombine.high %v188_v35, %v204_v36  ;;  %v235_v42 = vld [vmem:[#allocation5 + $0x590] sm:$0xff]  ;;  %v6207_v8 = vcombine.high %v61_v2, %v77_v3  ;;  %v93_v10 = vld [vmem:[#allocation5 + $0x120] sm:$0xff]  ;;  %v126_v20 = vld [vmem:[#allocation5 + $0x228] sm:$0xff] }
  0x3b   :  { %v6363_v47 = vcombine.high %v219_v41, %v235_v42  ;;  %v251_v49 = vld [vmem:[#allocation5 + $0x610] sm:$0xff]  ;;  %v109_v11 = vld [vmem:[#allocation5 + $0x1a0] sm:$0xff]  ;;  %v158_v28 = vld [vmem:[#allocation5 + $0x328] sm:$0xff] }
  0x3c   :  { %1770 = vmatpush1.bf16.msra.mxu0 %v6326_v43  ;;  %1811 = vmatpush1.bf16.msra.mxu1 %v6328_v44  ;;  %v220_v43 = vld [vmem:[#allocation5 + $0x518] sm:$0xff]  ;;  %v267_v50 = vld [vmem:[#allocation5 + $0x690] sm:$0xff]  ;;  %v6239_v17 = vcombine.high %v93_v10, %v109_v11  ;;  %v125_v18 = vld [vmem:[#allocation5 + $0x220] sm:$0xff] }
  0x3d   :  { %1771 = vmatprep.subr.bf16.mxu0 %v6359_v45  ;;  %1812 = vmatprep.subr.bf16.mxu1 %v6361_v46  ;;  %v236_v44 = vld [vmem:[#allocation5 + $0x598] sm:$0xff]  ;;  %v6330_v45 = vcombine.low %v187_v33, %v203_v34  ;;  %v6332_v46 = vcombine.low %v188_v35, %v204_v36  ;;  %v6395_v55 = vcombine.high %v251_v49, %v267_v50  ;;  %v283_v57 = vld [vmem:[#allocation5 + $0x710] sm:$0xff]  ;;  %v141_v19 = vld [vmem:[#allocation5 + $0x2a0] sm:$0xff] }
  0x3e   :  { %v6365_v48 = vcombine.high %v220_v43, %v236_v44  ;;  %v299_v58 = vld [vmem:[#allocation5 + $0x790] sm:$0xff]  ;;  %v6271_v25 = vcombine.high %v125_v18, %v141_v19  ;;  %v157_v26 = vld [vmem:[#allocation5 + $0x320] sm:$0xff]  ;;  %v190_v36 = vld [vmem:[#allocation5 + $0x428] sm:$0xff] }
  0x3f   :  { %v6427_v63 = vcombine.high %v283_v57, %v299_v58  ;;  %v173_v27 = vld [vmem:[#allocation5 + $0x3a0] sm:$0xff] }
  0x40   :  { %1772 = vmatpush1.bf16.msra.mxu0 %v6358_v51  ;;  %1813 = vmatpush1.bf16.msra.mxu1 %v6360_v52  ;;  %v252_v51 = vld [vmem:[#allocation5 + $0x618] sm:$0xff]  ;;  %v6303_v33 = vcombine.high %v157_v26, %v173_v27  ;;  %v189_v34 = vld [vmem:[#allocation5 + $0x420] sm:$0xff] }
  0x41   :  { %1773 = vmatprep.subr.bf16.mxu0 %v6391_v53  ;;  %1814 = vmatprep.subr.bf16.mxu1 %v6393_v54  ;;  %v268_v52 = vld [vmem:[#allocation5 + $0x698] sm:$0xff]  ;;  %v6362_v53 = vcombine.low %v219_v41, %v235_v42  ;;  %v6364_v54 = vcombine.low %v220_v43, %v236_v44  ;;  %v205_v35 = vld [vmem:[#allocation5 + $0x4a0] sm:$0xff]  ;;  %v222_v44 = vld [vmem:[#allocation5 + $0x528] sm:$0xff] }
  0x42   :  { %v6397_v56 = vcombine.high %v252_v51, %v268_v52  ;;  %v6335_v41 = vcombine.high %v189_v34, %v205_v35  ;;  %v221_v42 = vld [vmem:[#allocation5 + $0x520] sm:$0xff] }
  0x43   :  { %v237_v43 = vld [vmem:[#allocation5 + $0x5a0] sm:$0xff] }
  0x44   :  { %1774 = vmatpush1.bf16.msra.mxu0 %v6390_v59  ;;  %1815 = vmatpush1.bf16.msra.mxu1 %v6392_v60  ;;  %v284_v59 = vld [vmem:[#allocation5 + $0x718] sm:$0xff] }
  0x45   :  { %1775 = vmatprep.subr.bf16.mxu0 %v6423_v61  ;;  %1816 = vmatprep.subr.bf16.mxu1 %v6425_v62  ;;  %v300_v60 = vld [vmem:[#allocation5 + $0x798] sm:$0xff]  ;;  %v6394_v61 = vcombine.low %v251_v49, %v267_v50  ;;  %v6396_v62 = vcombine.low %v252_v51, %v268_v52  ;;  %v6367_v49 = vcombine.high %v221_v42, %v237_v43  ;;  %v253_v50 = vld [vmem:[#allocation5 + $0x620] sm:$0xff]  ;;  %v254_v52 = vld [vmem:[#allocation5 + $0x628] sm:$0xff] }
  0x46   :  { %v6429_v1 = vcombine.high %v284_v59, %v300_v60  ;;  %v269_v51 = vld [vmem:[#allocation5 + $0x6a0] sm:$0xff] }
  0x48   :  { %1776 = vmatpush1.bf16.msra.mxu0 %v6422_v4  ;;  %1817 = vmatpush1.bf16.msra.mxu1 %v6424_v5  ;;  %v62_v4 = vld [vmem:[#allocation5 + $0x28] sm:$0xff] }
  0x49   :  { %1843 = vmatprep.subr.bf16.mxu0 %v6203_v6  ;;  %1884 = vmatprep.subr.bf16.mxu1 %v6205_v7  ;;  %v78_v5 = vld [vmem:[#allocation5 + $0xa8] sm:$0xff]  ;;  %v6426_v6 = vcombine.low %v283_v57, %v299_v58  ;;  %v6428_v7 = vcombine.low %v284_v59, %v300_v60  ;;  %v6399_v57 = vcombine.high %v253_v50, %v269_v51  ;;  %v285_v58 = vld [vmem:[#allocation5 + $0x720] sm:$0xff] }
  0x4a   :  { %v6209_v9 = vcombine.high %v62_v4, %v78_v5  ;;  %v301_v59 = vld [vmem:[#allocation5 + $0x7a0] sm:$0xff]  ;;  %v286_v60 = vld [vmem:[#allocation5 + $0x728] sm:$0xff] }
  0x4b   :  { %1794 = vmatmul.mubr.bf16.vlgmr.msra.gmra.mrb[0].mxu0 %v7764_v12  ;;  %1835 = vmatmul.mubr.bf16.vlgmr.msra.gmra.mrb[0].mxu1 %v7764_v12 }
  0x4c   :  { %1844 = vmatpush1.bf16.msra.mxu0 %v6202_v13  ;;  %1885 = vmatpush1.bf16.msra.mxu1 %v6204_v14  ;;  %v94_v13 = vld [vmem:[#allocation5 + $0x128] sm:$0xff] }
  0x4d   :  { %1845 = vmatprep.subr.bf16.mxu0 %v6235_v15  ;;  %1886 = vmatprep.subr.bf16.mxu1 %v6237_v16  ;;  %v110_v14 = vld [vmem:[#allocation5 + $0x1a8] sm:$0xff]  ;;  %v6206_v15 = vcombine.low %v61_v2, %v77_v3  ;;  %v6208_v16 = vcombine.low %v62_v4, %v78_v5  ;;  %v6431_v2 = vcombine.high %v285_v58, %v301_v59  ;;  %v63_v3 = vld [vmem:[#allocation5 + $0x30] sm:$0xff]  ;;  %v64_v5 = vld [vmem:[#allocation5 + $0x38] sm:$0xff] }
  0x4e   :  { %1875 = vmatprep.mubr.bf16.mxu0 %v7693_v0  ;;  %1916 = vmatprep.mubr.bf16.mxu1 %v7693_v0  ;;  %v79_v4 = vld [vmem:[#allocation5 + $0xb0] sm:$0xff] }
  0x50   :  { %1846 = vmatpush1.bf16.msra.mxu0 %v6234_v21  ;;  %1887 = vmatpush1.bf16.msra.mxu1 %v6236_v22  ;;  %v6241_v21 = vcombine.high %v94_v13, %v110_v14  ;;  %v142_v22 = vld [vmem:[#allocation5 + $0x2a8] sm:$0xff] }
  0x51   :  { %1847 = vmatprep.subr.bf16.mxu0 %v6267_v23  ;;  %1888 = vmatprep.subr.bf16.mxu1 %v6269_v24  ;;  %v6238_v23 = vcombine.low %v93_v10, %v109_v11  ;;  %v6240_v24 = vcombine.low %v94_v13, %v110_v14  ;;  %v6211_v10 = vcombine.high %v63_v3, %v79_v4  ;;  %v95_v11 = vld [vmem:[#allocation5 + $0x130] sm:$0xff]  ;;  %v96_v14 = vld [vmem:[#allocation5 + $0x138] sm:$0xff] }
  0x52   :  { %v111_v13 = vld [vmem:[#allocation5 + $0x1b0] sm:$0xff] }
  0x54   :  { %1848 = vmatpush1.bf16.msra.mxu0 %v6266_v29  ;;  %1889 = vmatpush1.bf16.msra.mxu1 %v6268_v30  ;;  %v6273_v29 = vcombine.high %v126_v20, %v142_v22  ;;  %v174_v30 = vld [vmem:[#allocation5 + $0x3a8] sm:$0xff] }
  0x55   :  { %1849 = vmatprep.subr.bf16.mxu0 %v6299_v31  ;;  %1890 = vmatprep.subr.bf16.mxu1 %v6301_v32  ;;  %v6270_v31 = vcombine.low %v125_v18, %v141_v19  ;;  %v6272_v32 = vcombine.low %v126_v20, %v142_v22  ;;  %v6243_v19 = vcombine.high %v95_v11, %v111_v13  ;;  %v127_v20 = vld [vmem:[#allocation5 + $0x230] sm:$0xff]  ;;  %v128_v22 = vld [vmem:[#allocation5 + $0x238] sm:$0xff] }
  0x58   :  { %1850 = vmatpush1.bf16.msra.mxu0 %v6298_v37  ;;  %1891 = vmatpush1.bf16.msra.mxu1 %v6300_v38  ;;  %v6305_v37 = vcombine.high %v158_v28, %v174_v30  ;;  %v206_v38 = vld [vmem:[#allocation5 + $0x4a8] sm:$0xff] }
  0x59   :  { %1851 = vmatprep.subr.bf16.mxu0 %v6331_v39  ;;  %1892 = vmatprep.subr.bf16.mxu1 %v6333_v40  ;;  %v6302_v39 = vcombine.low %v157_v26, %v173_v27  ;;  %v6304_v40 = vcombine.low %v158_v28, %v174_v30  ;;  %v159_v28 = vld [vmem:[#allocation5 + $0x330] sm:$0xff]  ;;  %v160_v30 = vld [vmem:[#allocation5 + $0x338] sm:$0xff] }
  0x5c   :  { %1852 = vmatpush1.bf16.msra.mxu0 %v6330_v45  ;;  %1893 = vmatpush1.bf16.msra.mxu1 %v6332_v46  ;;  %v6337_v45 = vcombine.high %v190_v36, %v206_v38  ;;  %v238_v46 = vld [vmem:[#allocation5 + $0x5a8] sm:$0xff] }
  0x5d   :  { %1853 = vmatprep.subr.bf16.mxu0 %v6363_v47  ;;  %1894 = vmatprep.subr.bf16.mxu1 %v6365_v48  ;;  %v6334_v47 = vcombine.low %v189_v34, %v205_v35  ;;  %v6336_v48 = vcombine.low %v190_v36, %v206_v38  ;;  %v191_v36 = vld [vmem:[#allocation5 + $0x430] sm:$0xff]  ;;  %v192_v38 = vld [vmem:[#allocation5 + $0x438] sm:$0xff] }
  0x60   :  { %1854 = vmatpush1.bf16.msra.mxu0 %v6362_v53  ;;  %1895 = vmatpush1.bf16.msra.mxu1 %v6364_v54  ;;  %v6369_v53 = vcombine.high %v222_v44, %v238_v46  ;;  %v270_v54 = vld [vmem:[#allocation5 + $0x6a8] sm:$0xff] }
  0x61   :  { %1855 = vmatprep.subr.bf16.mxu0 %v6395_v55  ;;  %1896 = vmatprep.subr.bf16.mxu1 %v6397_v56  ;;  %v6366_v55 = vcombine.low %v221_v42, %v237_v43  ;;  %v6368_v56 = vcombine.low %v222_v44, %v238_v46  ;;  %v223_v44 = vld [vmem:[#allocation5 + $0x530] sm:$0xff]  ;;  %v224_v46 = vld [vmem:[#allocation5 + $0x538] sm:$0xff] }
  0x64   :  { %1856 = vmatpush1.bf16.msra.mxu0 %v6394_v61  ;;  %1897 = vmatpush1.bf16.msra.mxu1 %v6396_v62  ;;  %v6401_v61 = vcombine.high %v254_v52, %v270_v54  ;;  %v302_v62 = vld [vmem:[#allocation5 + $0x7a8] sm:$0xff] }
  0x65   :  { %1857 = vmatprep.subr.bf16.mxu0 %v6427_v63  ;;  %1898 = vmatprep.subr.bf16.mxu1 %v6429_v1  ;;  %v6398_v63 = vcombine.low %v253_v50, %v269_v51  ;;  %v6400_v1 = vcombine.low %v254_v52, %v270_v54  ;;  %v255_v52 = vld [vmem:[#allocation5 + $0x630] sm:$0xff] }
  0x68   :  { %1858 = vmatpush1.bf16.msra.mxu0 %v6426_v6  ;;  %1899 = vmatpush1.bf16.msra.mxu1 %v6428_v7  ;;  %v6433_v6 = vcombine.high %v286_v60, %v302_v62  ;;  %v80_v7 = vld [vmem:[#allocation5 + $0xb8] sm:$0xff] }
  0x69   :  { %1925 = vmatprep.subr.bf16.mxu0 %v6207_v8  ;;  %1966 = vmatprep.subr.bf16.mxu1 %v6209_v9  ;;  %v6430_v8 = vcombine.low %v285_v58, %v301_v59  ;;  %v6432_v9 = vcombine.low %v286_v60, %v302_v62  ;;  %v6212_v18 = vcombine.low %v64_v5, %v80_v7  ;;  %v287_v60 = vld [vmem:[#allocation5 + $0x730] sm:$0xff] }
  0x6a   :  { %v303_v62 = vld [vmem:[#allocation5 + $0x7b0] sm:$0xff] }
  0x6b   :  { %1876 = vmatmul.mubr.bf16.vlgmr.msra.gmra.mrb[4].mxu0 %v7764_v12  ;;  %1917 = vmatmul.mubr.bf16.vlgmr.msra.gmra.mrb[4].mxu1 %v7764_v12 }
  0x6c   :  { %1926 = vmatpush1.bf16.msra.mxu0 %v6206_v15  ;;  %1967 = vmatpush1.bf16.msra.mxu1 %v6208_v16  ;;  %v6213_v15 = vcombine.high %v64_v5, %v80_v7  ;;  %v112_v16 = vld [vmem:[#allocation5 + $0x1b8] sm:$0xff]  ;;  %v65_v5 = vld [vmem:[#allocation5 + $0x40] sm:$0xff]  ;;  %v66_v7 = vld [vmem:[#allocation5 + $0x48] sm:$0xff] }
  0x6d   :  { %1927 = vmatprep.subr.bf16.mxu0 %v6239_v17  ;;  %1968 = vmatprep.subr.bf16.mxu1 %v6241_v21  ;;  %v6210_v17 = vcombine.low %v63_v3, %v79_v4  ;;  %v143_v21 = vld [vmem:[#allocation5 + $0x2b0] sm:$0xff]  ;;  %v6244_v26 = vcombine.low %v96_v14, %v112_v16  ;;  %v6435_v4 = vcombine.high %v287_v60, %v303_v62 }
  0x6e   :  { %1957 = vmatprep.mubr.bf16.mxu0 %v7693_v0  ;;  %1998 = vmatprep.mubr.bf16.mxu1 %v7693_v0  ;;  %v6275_v27 = vcombine.high %v127_v20, %v143_v21 }
  0x70   :  { %1928 = vmatpush1.bf16.msra.mxu0 %v6238_v23  ;;  %1969 = vmatpush1.bf16.msra.mxu1 %v6240_v24  ;;  %v6245_v23 = vcombine.high %v96_v14, %v112_v16  ;;  %v144_v24 = vld [vmem:[#allocation5 + $0x2b8] sm:$0xff]  ;;  %v97_v14 = vld [vmem:[#allocation5 + $0x140] sm:$0xff]  ;;  %v98_v16 = vld [vmem:[#allocation5 + $0x148] sm:$0xff] }
  0x71   :  { %1929 = vmatprep.subr.bf16.mxu0 %v6271_v25  ;;  %1970 = vmatprep.subr.bf16.mxu1 %v6273_v29  ;;  %v6242_v25 = vcombine.low %v95_v11, %v111_v13  ;;  %v175_v29 = vld [vmem:[#allocation5 + $0x3b0] sm:$0xff]  ;;  %v6276_v34 = vcombine.low %v128_v22, %v144_v24 }
  0x72   :  { %v6307_v35 = vcombine.high %v159_v28, %v175_v29 }
  0x74   :  { %1930 = vmatpush1.bf16.msra.mxu0 %v6270_v31  ;;  %1971 = vmatpush1.bf16.msra.mxu1 %v6272_v32  ;;  %v6277_v31 = vcombine.high %v128_v22, %v144_v24  ;;  %v176_v32 = vld [vmem:[#allocation5 + $0x3b8] sm:$0xff] }
  0x75   :  { %1931 = vmatprep.subr.bf16.mxu0 %v6303_v33  ;;  %1972 = vmatprep.subr.bf16.mxu1 %v6305_v37  ;;  %v6274_v33 = vcombine.low %v127_v20, %v143_v21  ;;  %v207_v37 = vld [vmem:[#allocation5 + $0x4b0] sm:$0xff]  ;;  %v6308_v42 = vcombine.low %v160_v30, %v176_v32  ;;  %v129_v20 = vld [vmem:[#allocation5 + $0x240] sm:$0xff] }
  0x76   :  { %v6339_v43 = vcombine.high %v191_v36, %v207_v37  ;;  %v145_v21 = vld [vmem:[#allocation5 + $0x2c0] sm:$0xff] }
  0x78   :  { %1932 = vmatpush1.bf16.msra.mxu0 %v6302_v39  ;;  %1973 = vmatpush1.bf16.msra.mxu1 %v6304_v40  ;;  %v6309_v39 = vcombine.high %v160_v30, %v176_v32  ;;  %v208_v40 = vld [vmem:[#allocation5 + $0x4b8] sm:$0xff] }
  0x79   :  { %1933 = vmatprep.subr.bf16.mxu0 %v6335_v41  ;;  %1974 = vmatprep.subr.bf16.mxu1 %v6337_v45  ;;  %v6306_v41 = vcombine.low %v159_v28, %v175_v29  ;;  %v239_v45 = vld [vmem:[#allocation5 + $0x5b0] sm:$0xff]  ;;  %v6340_v50 = vcombine.low %v192_v38, %v208_v40  ;;  %v161_v28 = vld [vmem:[#allocation5 + $0x340] sm:$0xff] }
  0x7a   :  { %v6371_v51 = vcombine.high %v223_v44, %v239_v45  ;;  %v177_v29 = vld [vmem:[#allocation5 + $0x3c0] sm:$0xff] }
  0x7c   :  { %1934 = vmatpush1.bf16.msra.mxu0 %v6334_v47  ;;  %1975 = vmatpush1.bf16.msra.mxu1 %v6336_v48  ;;  %v6341_v47 = vcombine.high %v192_v38, %v208_v40  ;;  %v240_v48 = vld [vmem:[#allocation5 + $0x5b8] sm:$0xff]  ;;  %v6311_v38 = vcombine.high %v161_v28, %v177_v29  ;;  %v210_v40 = vld [vmem:[#allocation5 + $0x4c8] sm:$0xff] }
  0x7d   :  { %1935 = vmatprep.subr.bf16.mxu0 %v6367_v49  ;;  %1976 = vmatprep.subr.bf16.mxu1 %v6369_v53  ;;  %v6338_v49 = vcombine.low %v191_v36, %v207_v37  ;;  %v271_v53 = vld [vmem:[#allocation5 + $0x6b0] sm:$0xff]  ;;  %v6373_v54 = vcombine.high %v224_v46, %v240_v48  ;;  %v6372_v58 = vcombine.low %v224_v46, %v240_v48  ;;  %v193_v36 = vld [vmem:[#allocation5 + $0x440] sm:$0xff]  ;;  %v242_v48 = vld [vmem:[#allocation5 + $0x5c8] sm:$0xff] }
  0x7e   :  { %v6403_v59 = vcombine.high %v255_v52, %v271_v53 }
  0x80   :  { %1936 = vmatpush1.bf16.msra.mxu0 %v6366_v55  ;;  %1977 = vmatpush1.bf16.msra.mxu1 %v6368_v56  ;;  %v256_v55 = vld [vmem:[#allocation5 + $0x638] sm:$0xff] }
  0x81   :  { %1937 = vmatprep.subr.bf16.mxu0 %v6399_v57  ;;  %1978 = vmatprep.subr.bf16.mxu1 %v6401_v61  ;;  %v272_v56 = vld [vmem:[#allocation5 + $0x6b8] sm:$0xff]  ;;  %v6370_v57 = vcombine.low %v223_v44, %v239_v45  ;;  %v241_v44 = vld [vmem:[#allocation5 + $0x5c0] sm:$0xff] }
  0x82   :  { %v6405_v61 = vcombine.high %v256_v55, %v272_v56  ;;  %v6404_v3 = vcombine.low %v256_v55, %v272_v56  ;;  %v258_v55 = vld [vmem:[#allocation5 + $0x648] sm:$0xff] }
  0x83   :  { %v274_v56 = vld [vmem:[#allocation5 + $0x6c8] sm:$0xff] }
  0x84   :  { %1938 = vmatpush1.bf16.msra.mxu0 %v6398_v63  ;;  %1979 = vmatpush1.bf16.msra.mxu1 %v6400_v1  ;;  %v288_v63 = vld [vmem:[#allocation5 + $0x738] sm:$0xff] }
  0x85   :  { %1939 = vmatprep.subr.bf16.mxu0 %v6431_v2  ;;  %1980 = vmatprep.subr.bf16.mxu1 %v6433_v6  ;;  %v304_v1 = vld [vmem:[#allocation5 + $0x7b8] sm:$0xff]  ;;  %v6402_v2 = vcombine.low %v255_v52, %v271_v53  ;;  %v81_v6 = vld [vmem:[#allocation5 + $0xc0] sm:$0xff] }
  0x86   :  { %v6436_v11 = vcombine.low %v288_v63, %v304_v1  ;;  %v6215_v13 = vcombine.high %v65_v5, %v81_v6  ;;  %v273_v52 = vld [vmem:[#allocation5 + $0x6c0] sm:$0xff] }
  0x88   :  { %1940 = vmatpush1.bf16.msra.mxu0 %v6430_v8  ;;  %1981 = vmatpush1.bf16.msra.mxu1 %v6432_v9  ;;  %v6437_v8 = vcombine.high %v288_v63, %v304_v1  ;;  %v82_v9 = vld [vmem:[#allocation5 + $0xc8] sm:$0xff]  ;;  %v6409_v63 = vcombine.high %v258_v55, %v274_v56 }
  0x89   :  { %2007 = vmatprep.subr.bf16.mxu0 %v6211_v10  ;;  %2048 = vmatprep.subr.bf16.mxu1 %v6213_v15  ;;  %v6434_v10 = vcombine.low %v287_v60, %v303_v62  ;;  %v113_v15 = vld [vmem:[#allocation5 + $0x1c0] sm:$0xff]  ;;  %v6216_v22 = vcombine.low %v66_v7, %v82_v9  ;;  %v290_v1 = vld [vmem:[#allocation5 + $0x748] sm:$0xff] }
  0x8a   :  { %v305_v62 = vld [vmem:[#allocation5 + $0x7c0] sm:$0xff] }
  0x8b   :  { %1958 = vmatmul.mubr.bf16.vlgmr.msra.gmra.mrb[8].mxu0 %v7764_v12  ;;  %1999 = vmatmul.mubr.bf16.vlgmr.msra.gmra.mrb[8].mxu1 %v7764_v12 }
  0x8c   :  { %2008 = vmatpush1.bf16.msra.mxu0 %v6210_v17  ;;  %2049 = vmatpush1.bf16.msra.mxu1 %v6212_v18  ;;  %v6217_v17 = vcombine.high %v66_v7, %v82_v9  ;;  %v114_v18 = vld [vmem:[#allocation5 + $0x1c8] sm:$0xff]  ;;  %v68_v9 = vld [vmem:[#allocation5 + $0x58] sm:$0xff] }
  0x8d   :  { %2009 = vmatprep.subr.bf16.mxu0 %v6243_v19  ;;  %2050 = vmatprep.subr.bf16.mxu1 %v6245_v23  ;;  %v6214_v19 = vcombine.low %v65_v5, %v81_v6  ;;  %v6247_v23 = vcombine.high %v97_v14, %v113_v15  ;;  %v6249_v24 = vcombine.high %v98_v16, %v114_v18  ;;  %v83_v5 = vld [vmem:[#allocation5 + $0xd0] sm:$0xff] }
  0x8e   :  { %2039 = vmatprep.mubr.bf16.mxu0 %v7693_v0  ;;  %2080 = vmatprep.mubr.bf16.mxu1 %v7693_v0  ;;  %v6248_v30 = vcombine.low %v98_v16, %v114_v18  ;;  %v6408_v6 = vcombine.low %v258_v55, %v274_v56 }
  0x90   :  { %2010 = vmatpush1.bf16.msra.mxu0 %v6242_v25  ;;  %2051 = vmatpush1.bf16.msra.mxu1 %v6244_v26  ;;  %v130_v25 = vld [vmem:[#allocation5 + $0x248] sm:$0xff] }
  0x91   :  { %2011 = vmatprep.subr.bf16.mxu0 %v6275_v27  ;;  %2052 = vmatprep.subr.bf16.mxu1 %v6277_v31  ;;  %v146_v26 = vld [vmem:[#allocation5 + $0x2c8] sm:$0xff]  ;;  %v6246_v27 = vcombine.low %v97_v14, %v113_v15  ;;  %v6279_v31 = vcombine.high %v129_v20, %v145_v21  ;;  %v99_v14 = vld [vmem:[#allocation5 + $0x150] sm:$0xff] }
  0x92   :  { %v6281_v32 = vcombine.high %v130_v25, %v146_v26  ;;  %v6280_v37 = vcombine.low %v130_v25, %v146_v26  ;;  %v115_v15 = vld [vmem:[#allocation5 + $0x1d0] sm:$0xff] }
  0x93   :  { %v6251_v26 = vcombine.high %v99_v14, %v115_v15 }
  0x94   :  { %2012 = vmatpush1.bf16.msra.mxu0 %v6274_v33  ;;  %2053 = vmatpush1.bf16.msra.mxu1 %v6276_v34  ;;  %v162_v33 = vld [vmem:[#allocation5 + $0x348] sm:$0xff] }
  0x95   :  { %2013 = vmatprep.subr.bf16.mxu0 %v6307_v35  ;;  %2054 = vmatprep.subr.bf16.mxu1 %v6309_v39  ;;  %v178_v34 = vld [vmem:[#allocation5 + $0x3c8] sm:$0xff]  ;;  %v6278_v35 = vcombine.low %v129_v20, %v145_v21  ;;  %v116_v20 = vld [vmem:[#allocation5 + $0x1d8] sm:$0xff] }
  0x96   :  { %v194_v39 = vld [vmem:[#allocation5 + $0x448] sm:$0xff]  ;;  %v6312_v45 = vcombine.low %v162_v33, %v178_v34 }
  0x97   :  { %v6344_v53 = vcombine.low %v194_v39, %v210_v40 }
  0x98   :  { %2014 = vmatpush1.bf16.msra.mxu0 %v6306_v41  ;;  %2055 = vmatpush1.bf16.msra.mxu1 %v6308_v42  ;;  %v6313_v41 = vcombine.high %v162_v33, %v178_v34  ;;  %v6310_v42 = vcombine.low %v161_v28, %v177_v29  ;;  %v148_v28 = vld [vmem:[#allocation5 + $0x2d8] sm:$0xff]  ;;  %v179_v33 = vld [vmem:[#allocation5 + $0x3d0] sm:$0xff] }
  0x99   :  { %2015 = vmatprep.subr.bf16.mxu0 %v6339_v43  ;;  %2056 = vmatprep.subr.bf16.mxu1 %v6341_v47  ;;  %v225_v43 = vld [vmem:[#allocation5 + $0x540] sm:$0xff]  ;;  %v226_v47 = vld [vmem:[#allocation5 + $0x548] sm:$0xff] }
  0x9a   :  { %v6376_v60 = vcombine.low %v226_v47, %v242_v48 }
  0x9c   :  { %2016 = vmatpush1.bf16.msra.mxu0 %v6338_v49  ;;  %2057 = vmatpush1.bf16.msra.mxu1 %v6340_v50  ;;  %v6345_v49 = vcombine.high %v194_v39, %v210_v40  ;;  %v195_v39 = vld [vmem:[#allocation5 + $0x450] sm:$0xff] }
  0x9d   :  { %2017 = vmatprep.subr.bf16.mxu0 %v6371_v51  ;;  %2058 = vmatprep.subr.bf16.mxu1 %v6373_v54  ;;  %v257_v51 = vld [vmem:[#allocation5 + $0x640] sm:$0xff]  ;;  %v6375_v54 = vcombine.high %v225_v43, %v241_v44  ;;  %v211_v40 = vld [vmem:[#allocation5 + $0x4d0] sm:$0xff] }
  0x9e   :  { %v6346_v56 = vcombine.low %v195_v39, %v211_v40 }
  0xa0   :  { %2018 = vmatpush1.bf16.msra.mxu0 %v6370_v57  ;;  %2059 = vmatpush1.bf16.msra.mxu1 %v6372_v58  ;;  %v6377_v57 = vcombine.high %v226_v47, %v242_v48  ;;  %v6374_v58 = vcombine.low %v225_v43, %v241_v44  ;;  %v196_v43 = vld [vmem:[#allocation5 + $0x458] sm:$0xff] }
  0xa1   :  { %2019 = vmatprep.subr.bf16.mxu0 %v6403_v59  ;;  %2060 = vmatprep.subr.bf16.mxu1 %v6405_v61  ;;  %v289_v59 = vld [vmem:[#allocation5 + $0x740] sm:$0xff]  ;;  %v6407_v61 = vcombine.high %v257_v51, %v273_v52  ;;  %v212_v44 = vld [vmem:[#allocation5 + $0x4d8] sm:$0xff] }
  0xa2   :  { %v6439_v7 = vcombine.high %v289_v59, %v305_v62  ;;  %v6349_v55 = vcombine.high %v196_v43, %v212_v44 }
  0xa4   :  { %2020 = vmatpush1.bf16.msra.mxu0 %v6402_v2  ;;  %2061 = vmatpush1.bf16.msra.mxu1 %v6404_v3  ;;  %v306_v2 = vld [vmem:[#allocation5 + $0x7c8] sm:$0xff]  ;;  %v6406_v3 = vcombine.low %v257_v51, %v273_v52  ;;  %v6347_v52 = vcombine.high %v195_v39, %v211_v40 }
  0xa5   :  { %2021 = vmatprep.subr.bf16.mxu0 %v6435_v4  ;;  %2062 = vmatprep.subr.bf16.mxu1 %v6437_v8  ;;  %v67_v4 = vld [vmem:[#allocation5 + $0x50] sm:$0xff]  ;;  %v6441_v8 = vcombine.high %v290_v1, %v306_v2  ;;  %v6440_v16 = vcombine.low %v290_v1, %v306_v2  ;;  %v166_v40 = vld [vmem:[#allocation5 + $0x368] sm:$0xff] }
  0xa6   :  { %v291_v2 = vld [vmem:[#allocation5 + $0x750] sm:$0xff] }
  0xa8   :  { %2022 = vmatpush1.bf16.msra.mxu0 %v6434_v10  ;;  %2063 = vmatpush1.bf16.msra.mxu1 %v6436_v11  ;;  %v84_v10 = vld [vmem:[#allocation5 + $0xd8] sm:$0xff]  ;;  %v321_v11 = vlaneseq }
  0xa9   :  { %2089 = vmatprep.subr.bf16.mxu0 %v6215_v13  ;;  %2130 = vmatprep.subr.bf16.mxu1 %v6217_v17  ;;  %v6438_v13 = vcombine.low %v289_v59, %v305_v62  ;;  %v6219_v17 = vcombine.high %v67_v4, %v83_v5  ;;  %v6221_v18 = vcombine.high %v68_v9, %v84_v10  ;;  %v276_v62 = vld [vmem:[#allocation5 + $0x6d8] sm:$0xff] }
  0xaa   :  { %v7782_v21 = vshrl.u32 %v321_v11, 7  ;;  %v6220_v25 = vcombine.low %v68_v9, %v84_v10  ;;  %v6348_v59 = vcombine.low %v196_v43, %v212_v44  ;;  %v69_v10 = vld [vmem:[#allocation5 + $0x60] sm:$0xff] }
  0xab   :  { %2040 = vmatmul.mubr.bf16.vlgmr.msra.gmra.mrb[12].mxu0 %v7764_v12  ;;  %2081 = vmatmul.mubr.bf16.vlgmr.msra.gmra.mrb[12].mxu1 %v7764_v12  ;;  %v209_v12 = vld [vmem:[#allocation5 + $0x4c0] sm:$0xff] }
  0xac   :  { %2090 = vmatpush1.bf16.msra.mxu0 %v6214_v19  ;;  %2131 = vmatpush1.bf16.msra.mxu1 %v6216_v22  ;;  %v6343_v46 = vcombine.high %v193_v36, %v209_v12  ;;  %v6342_v50 = vcombine.low %v193_v36, %v209_v12  ;;  %v100_v19 = vld [vmem:[#allocation5 + $0x158] sm:$0xff]  ;;  %v6218_v22 = vcombine.low %v67_v4, %v83_v5  ;;  %v7797_v47 = vsub.s32 2, %v7782_v21  ;;  %v85_v11 = vld [vmem:[#allocation5 + $0xe0] sm:$0xff] }
  0xad   :  { %2091 = vmatprep.subr.bf16.mxu0 %v6247_v23  ;;  %2132 = vmatprep.subr.bf16.mxu1 %v6249_v24  ;;  %v131_v23 = vld [vmem:[#allocation5 + $0x250] sm:$0xff]  ;;  %v6253_v29 = vcombine.high %v100_v19, %v116_v20  ;;  %v6252_v34 = vcombine.low %v100_v19, %v116_v20  ;;  %v164_v36 = vld [vmem:[#allocation5 + $0x358] sm:$0xff]  ;;  %v101_v19 = vld [vmem:[#allocation5 + $0x160] sm:$0xff] }
  0xae   :  { %2121 = vmatprep.mubr.bf16.mxu0 %v7693_v0  ;;  %2162 = vmatprep.mubr.bf16.mxu1 %v7693_v0  ;;  %v147_v24 = vld [vmem:[#allocation5 + $0x2d0] sm:$0xff]  ;;  %v180_v12 = vld [vmem:[#allocation5 + $0x3d8] sm:$0xff]  ;;  %v117_v20 = vld [vmem:[#allocation5 + $0x1e0] sm:$0xff] }
  0xaf   :  { %v6316_v51 = vcombine.low %v164_v36, %v180_v12  ;;  %v197_v44 = vld [vmem:[#allocation5 + $0x460] sm:$0xff] }
  0xb0   :  { %2092 = vmatpush1.bf16.msra.mxu0 %v6246_v27  ;;  %2133 = vmatpush1.bf16.msra.mxu1 %v6248_v30  ;;  %v132_v27 = vld [vmem:[#allocation5 + $0x258] sm:$0xff]  ;;  %v7787_v30 = vld [vmem:[%s8237_s0] sm:$0xf] }
  0xb1   :  { %2093 = vmatprep.subr.bf16.mxu0 %v6279_v31  ;;  %2134 = vmatprep.subr.bf16.mxu1 %v6281_v32  ;;  %v6250_v31 = vcombine.low %v99_v14, %v115_v15  ;;  %v163_v32 = vld [vmem:[#allocation5 + $0x350] sm:$0xff]  ;;  %v70_v15 = vld [vmem:[#allocation5 + $0x68] sm:$0xff] }
  0xb2   :  { %v6314_v48 = vcombine.low %v163_v32, %v179_v33 }
  0xb4   :  { %2094 = vmatpush1.bf16.msra.mxu0 %v6278_v35  ;;  %2135 = vmatpush1.bf16.msra.mxu1 %v6280_v37  ;;  %v6283_v35 = vcombine.high %v131_v23, %v147_v24  ;;  %v6285_v37 = vcombine.high %v132_v27, %v148_v28 }
  0xb5   :  { %2095 = vmatprep.subr.bf16.mxu0 %v6311_v38  ;;  %2136 = vmatprep.subr.bf16.mxu1 %v6313_v41  ;;  %v6282_v38 = vcombine.low %v131_v23, %v147_v24  ;;  %v6284_v41 = vcombine.low %v132_v27, %v148_v28  ;;  %v6223_v23 = vcombine.high %v69_v10, %v85_v11  ;;  %v102_v24 = vld [vmem:[#allocation5 + $0x168] sm:$0xff]  ;;  %v133_v28 = vld [vmem:[#allocation5 + $0x260] sm:$0xff] }
  0xb6   :  { %v6222_v27 = vcombine.low %v69_v10, %v85_v11  ;;  %v294_v11 = vld [vmem:[#allocation5 + $0x768] sm:$0xff] }
  0xb8   :  { %2096 = vmatpush1.bf16.msra.mxu0 %v6310_v42  ;;  %2137 = vmatpush1.bf16.msra.mxu1 %v6312_v45  ;;  %v6315_v42 = vcombine.high %v163_v32, %v179_v33  ;;  %v6317_v45 = vcombine.high %v164_v36, %v180_v12  ;;  %v6255_v32 = vcombine.high %v101_v19, %v117_v20  ;;  %v134_v33 = vld [vmem:[#allocation5 + $0x268] sm:$0xff]  ;;  %v165_v12 = vld [vmem:[#allocation5 + $0x360] sm:$0xff] }
  0xb9   :  { %2097 = vmatprep.subr.bf16.mxu0 %v6343_v46  ;;  %2138 = vmatprep.subr.bf16.mxu1 %v6345_v49  ;;  %v7794_v46 = vsub.s32 0, %v7782_v21  ;;  %v227_v49 = vld [vmem:[#allocation5 + $0x550] sm:$0xff]  ;;  %v6254_v36 = vcombine.low %v101_v19, %v117_v20  ;;  %v72_v20 = vld [vmem:[#allocation5 + $0x78] sm:$0xff] }
  0xbc   :  { %2098 = vmatpush1.bf16.msra.mxu0 %v6342_v50  ;;  %2139 = vmatpush1.bf16.msra.mxu1 %v6344_v53  ;;  %v243_v50 = vld [vmem:[#allocation5 + $0x5d0] sm:$0xff]  ;;  %v228_v53 = vld [vmem:[#allocation5 + $0x558] sm:$0xff] }
  0xbd   :  { %2099 = vmatprep.subr.bf16.mxu0 %v6375_v54  ;;  %2140 = vmatprep.subr.bf16.mxu1 %v6377_v57  ;;  %v244_v54 = vld [vmem:[#allocation5 + $0x5d8] sm:$0xff]  ;;  %v259_v57 = vld [vmem:[#allocation5 + $0x650] sm:$0xff]  ;;  %v6378_v1 = vcombine.low %v227_v49, %v243_v50 }
  0xbe   :  { %v6380_v4 = vcombine.low %v228_v53, %v244_v54 }
  0xc0   :  { %2100 = vmatpush1.bf16.msra.mxu0 %v6374_v58  ;;  %2141 = vmatpush1.bf16.msra.mxu1 %v6376_v60  ;;  %v275_v58 = vld [vmem:[#allocation5 + $0x6d0] sm:$0xff]  ;;  %v6379_v60 = vcombine.high %v227_v49, %v243_v50  ;;  %v198_v50 = vld [vmem:[#allocation5 + $0x468] sm:$0xff] }
  0xc1   :  { %2101 = vmatprep.subr.bf16.mxu0 %v6407_v61  ;;  %2142 = vmatprep.subr.bf16.mxu1 %v6409_v63  ;;  %v260_v61 = vld [vmem:[#allocation5 + $0x658] sm:$0xff]  ;;  %v6381_v63 = vcombine.high %v228_v53, %v244_v54  ;;  %v6411_v5 = vcombine.high %v259_v57, %v275_v58  ;;  %v6410_v9 = vcombine.low %v259_v57, %v275_v58  ;;  %v229_v54 = vld [vmem:[#allocation5 + $0x560] sm:$0xff]  ;;  %v230_v58 = vld [vmem:[#allocation5 + $0x568] sm:$0xff] }
  0xc4   :  { %2102 = vmatpush1.bf16.msra.mxu0 %v6406_v3  ;;  %2143 = vmatpush1.bf16.msra.mxu1 %v6408_v6  ;;  %v307_v3 = vld [vmem:[#allocation5 + $0x7d0] sm:$0xff]  ;;  %v292_v6 = vld [vmem:[#allocation5 + $0x758] sm:$0xff] }
  0xc5   :  { %2103 = vmatprep.subr.bf16.mxu0 %v6439_v7  ;;  %2144 = vmatprep.subr.bf16.mxu1 %v6441_v8  ;;  %v308_v7 = vld [vmem:[#allocation5 + $0x7d8] sm:$0xff]  ;;  %v6413_v8 = vcombine.high %v260_v61, %v276_v62  ;;  %v6443_v14 = vcombine.high %v291_v2, %v307_v3 }
  0xc8   :  { %2104 = vmatpush1.bf16.msra.mxu0 %v6438_v13  ;;  %2145 = vmatpush1.bf16.msra.mxu1 %v6440_v16  ;;  %v6412_v13 = vcombine.low %v260_v61, %v276_v62  ;;  %v86_v16 = vld [vmem:[#allocation5 + $0xe8] sm:$0xff]  ;;  %v261_v62 = vld [vmem:[#allocation5 + $0x660] sm:$0xff] }
  0xc9   :  { %2171 = vmatprep.subr.bf16.mxu0 %v6219_v17  ;;  %2212 = vmatprep.subr.bf16.mxu1 %v6221_v18  ;;  %v6445_v17 = vcombine.high %v292_v6, %v308_v7  ;;  %v6442_v18 = vcombine.low %v291_v2, %v307_v3  ;;  %v262_v3 = vld [vmem:[#allocation5 + $0x668] sm:$0xff] }
  0xcb   :  { %2122 = vmatmul.mubr.bf16.vlgmr.msra.gmra.mrb[16].mxu0 %v7787_v30  ;;  %2163 = vmatmul.mubr.bf16.vlgmr.msra.gmra.mrb[16].mxu1 %v7787_v30 }
  0xcc   :  { %2172 = vmatpush1.bf16.msra.mxu0 %v6218_v22  ;;  %2213 = vmatpush1.bf16.msra.mxu1 %v6220_v25  ;;  %v6444_v22 = vcombine.low %v292_v6, %v308_v7  ;;  %v118_v25 = vld [vmem:[#allocation5 + $0x1e8] sm:$0xff]  ;;  %v293_v7 = vld [vmem:[#allocation5 + $0x760] sm:$0xff] }
  0xcd   :  { %2173 = vmatprep.subr.bf16.mxu0 %v6251_v26  ;;  %2214 = vmatprep.subr.bf16.mxu1 %v6253_v29  ;;  %v6225_v26 = vcombine.high %v70_v15, %v86_v16  ;;  %v149_v29 = vld [vmem:[#allocation5 + $0x2e0] sm:$0xff] }
  0xce   :  { %2203 = vmatprep.mubr.bf16.mxu0 %v7693_v0  ;;  %2244 = vmatprep.mubr.bf16.mxu1 %v7693_v0  ;;  %v6287_v39 = vcombine.high %v133_v28, %v149_v29  ;;  %v6286_v43 = vcombine.low %v133_v28, %v149_v29  ;;  %v104_v29 = vld [vmem:[#allocation5 + $0x178] sm:$0xff] }
  0xd0   :  { %2174 = vmatpush1.bf16.msra.mxu0 %v6250_v31  ;;  %2215 = vmatpush1.bf16.msra.mxu1 %v6252_v34  ;;  %v6224_v31 = vcombine.low %v70_v15, %v86_v16  ;;  %v150_v34 = vld [vmem:[#allocation5 + $0x2e8] sm:$0xff]  ;;  %v71_v16 = vld [vmem:[#allocation5 + $0x70] sm:$0xff] }
  0xd1   :  { %2175 = vmatprep.subr.bf16.mxu0 %v6283_v35  ;;  %2216 = vmatprep.subr.bf16.mxu1 %v6285_v37  ;;  %v6257_v35 = vcombine.high %v102_v24, %v118_v25  ;;  %v181_v37 = vld [vmem:[#allocation5 + $0x3e0] sm:$0xff] }
  0xd2   :  { %v6319_v49 = vcombine.high %v165_v12, %v181_v37  ;;  %v6318_v53 = vcombine.low %v165_v12, %v181_v37  ;;  %v136_v37 = vld [vmem:[#allocation5 + $0x278] sm:$0xff] }
  0xd4   :  { %2176 = vmatpush1.bf16.msra.mxu0 %v6282_v38  ;;  %2217 = vmatpush1.bf16.msra.mxu1 %v6284_v41  ;;  %v6256_v38 = vcombine.low %v102_v24, %v118_v25  ;;  %v182_v41 = vld [vmem:[#allocation5 + $0x3e8] sm:$0xff]  ;;  %v103_v25 = vld [vmem:[#allocation5 + $0x170] sm:$0xff] }
  0xd5   :  { %2177 = vmatprep.subr.bf16.mxu0 %v6315_v42  ;;  %2218 = vmatprep.subr.bf16.mxu1 %v6317_v45  ;;  %v6289_v42 = vcombine.high %v134_v33, %v150_v34  ;;  %v213_v45 = vld [vmem:[#allocation5 + $0x4e0] sm:$0xff] }
  0xd6   :  { %v6351_v57 = vcombine.high %v197_v44, %v213_v45  ;;  %v6350_v61 = vcombine.low %v197_v44, %v213_v45  ;;  %v168_v45 = vld [vmem:[#allocation5 + $0x378] sm:$0xff] }
  0xd8   :  { %2178 = vmatpush1.bf16.msra.mxu0 %v6314_v48  ;;  %2219 = vmatpush1.bf16.msra.mxu1 %v6316_v51  ;;  %v6288_v48 = vcombine.low %v134_v33, %v150_v34  ;;  %v214_v51 = vld [vmem:[#allocation5 + $0x4e8] sm:$0xff]  ;;  %v135_v34 = vld [vmem:[#allocation5 + $0x270] sm:$0xff] }
  0xd9   :  { %2179 = vmatprep.subr.bf16.mxu0 %v6347_v52  ;;  %2220 = vmatprep.subr.bf16.mxu1 %v6349_v55  ;;  %v6321_v52 = vcombine.high %v166_v40, %v182_v41  ;;  %v245_v55 = vld [vmem:[#allocation5 + $0x5e0] sm:$0xff] }
  0xda   :  { %v6383_v2 = vcombine.high %v229_v54, %v245_v55  ;;  %v6382_v6 = vcombine.low %v229_v54, %v245_v55 }
  0xdc   :  { %2180 = vmatpush1.bf16.msra.mxu0 %v6346_v56  ;;  %2221 = vmatpush1.bf16.msra.mxu1 %v6348_v59  ;;  %v6320_v56 = vcombine.low %v166_v40, %v182_v41  ;;  %v246_v59 = vld [vmem:[#allocation5 + $0x5e8] sm:$0xff]  ;;  %v167_v41 = vld [vmem:[#allocation5 + $0x370] sm:$0xff] }
  0xdd   :  { %2181 = vmatprep.subr.bf16.mxu0 %v6379_v60  ;;  %2222 = vmatprep.subr.bf16.mxu1 %v6381_v63  ;;  %v6353_v60 = vcombine.high %v198_v50, %v214_v51  ;;  %v277_v63 = vld [vmem:[#allocation5 + $0x6e0] sm:$0xff] }
  0xde   :  { %v6415_v10 = vcombine.high %v261_v62, %v277_v63  ;;  %v6414_v15 = vcombine.low %v261_v62, %v277_v63 }
  0xe0   :  { %2182 = vmatpush1.bf16.msra.mxu0 %v6378_v1  ;;  %2223 = vmatpush1.bf16.msra.mxu1 %v6380_v4  ;;  %v6352_v1 = vcombine.low %v198_v50, %v214_v51  ;;  %v278_v4 = vld [vmem:[#allocation5 + $0x6e8] sm:$0xff]  ;;  %v199_v51 = vld [vmem:[#allocation5 + $0x470] sm:$0xff] }
  0xe1   :  { %2183 = vmatprep.subr.bf16.mxu0 %v6411_v5  ;;  %2224 = vmatprep.subr.bf16.mxu1 %v6413_v8  ;;  %v6385_v5 = vcombine.high %v230_v58, %v246_v59  ;;  %v309_v8 = vld [vmem:[#allocation5 + $0x7e0] sm:$0xff] }
  0xe2   :  { %v6447_v19 = vcombine.high %v293_v7, %v309_v8  ;;  %v6446_v24 = vcombine.low %v293_v7, %v309_v8  ;;  %v279_v7 = vld [vmem:[#allocation5 + $0x6f0] sm:$0xff] }
  0xe4   :  { %2184 = vmatpush1.bf16.msra.mxu0 %v6410_v9  ;;  %2225 = vmatpush1.bf16.msra.mxu1 %v6412_v13  ;;  %v6384_v9 = vcombine.low %v230_v58, %v246_v59  ;;  %v310_v13 = vld [vmem:[#allocation5 + $0x7e8] sm:$0xff] }
  0xe5   :  { %2185 = vmatprep.subr.bf16.mxu0 %v6443_v14  ;;  %2226 = vmatprep.subr.bf16.mxu1 %v6445_v17  ;;  %v6417_v14 = vcombine.high %v262_v3, %v278_v4  ;;  %v87_v17 = vld [vmem:[#allocation5 + $0xf0] sm:$0xff] }
  0xe6   :  { %v6227_v28 = vcombine.high %v71_v16, %v87_v17  ;;  %v6226_v33 = vcombine.low %v71_v16, %v87_v17 }
  0xe8   :  { %2186 = vmatpush1.bf16.msra.mxu0 %v6442_v18  ;;  %2227 = vmatpush1.bf16.msra.mxu1 %v6444_v22  ;;  %v6416_v18 = vcombine.low %v262_v3, %v278_v4  ;;  %v88_v22 = vld [vmem:[#allocation5 + $0xf8] sm:$0xff]  ;;  %v7816_v4 = vld [vmem:[%s8239_s2] sm:$0xff] }
  0xe9   :  { %2253 = vmatprep.subr.bf16.mxu0 %v6223_v23  ;;  %2294 = vmatprep.subr.bf16.mxu1 %v6225_v26  ;;  %v6449_v23 = vcombine.high %v294_v11, %v310_v13  ;;  %v119_v26 = vld [vmem:[#allocation5 + $0x1f0] sm:$0xff] }
  0xea   :  { %v6259_v12 = vcombine.high %v103_v25, %v119_v26  ;;  %v6258_v40 = vcombine.low %v103_v25, %v119_v26 }
  0xeb   :  { %2204 = vmatmul.mubr.bf16.vlgmr.msra.gmra.mrb[20].mxu0 %v7787_v30  ;;  %2245 = vmatmul.mubr.bf16.vlgmr.msra.gmra.mrb[20].mxu1 %v7787_v30 }
  0xec   :  { %2254 = vmatpush1.bf16.msra.mxu0 %v6222_v27  ;;  %2295 = vmatpush1.bf16.msra.mxu1 %v6224_v31  ;;  %v6448_v27 = vcombine.low %v294_v11, %v310_v13  ;;  %v120_v31 = vld [vmem:[#allocation5 + $0x1f8] sm:$0xff] }
  0xed   :  { %2255 = vmatprep.subr.bf16.mxu0 %v6255_v32  ;;  %2296 = vmatprep.subr.bf16.mxu1 %v6257_v35  ;;  %v6229_v32 = vcombine.high %v72_v20, %v88_v22  ;;  %v151_v35 = vld [vmem:[#allocation5 + $0x2f0] sm:$0xff]  ;;  %v280_v11 = vld [vmem:[#allocation5 + $0x6f8] sm:$0xff] }
  0xee   :  { %2285 = vmatprep.mubr.bf16.mxu0 %v7693_v0  ;;  %2326 = vmatprep.mubr.bf16.mxu1 %v7693_v0  ;;  %v6291_v44 = vcombine.high %v135_v34, %v151_v35  ;;  %v6290_v50 = vcombine.low %v135_v34, %v151_v35 }
  0xf0   :  { %2256 = vmatpush1.bf16.msra.mxu0 %v6254_v36  ;;  %2297 = vmatpush1.bf16.msra.mxu1 %v6256_v38  ;;  %v6228_v36 = vcombine.low %v72_v20, %v88_v22  ;;  %v152_v38 = vld [vmem:[#allocation5 + $0x2f8] sm:$0xff] }
  0xf1   :  { %2257 = vmatprep.subr.bf16.mxu0 %v6287_v39  ;;  %2298 = vmatprep.subr.bf16.mxu1 %v6289_v42  ;;  %v6261_v39 = vcombine.high %v104_v29, %v120_v31  ;;  %v183_v42 = vld [vmem:[#allocation5 + $0x3f0] sm:$0xff]  ;;  %v6292_v54 = vcombine.low %v136_v37, %v152_v38 }
  0xf2   :  { %v6323_v55 = vcombine.high %v167_v41, %v183_v42  ;;  %v6322_v59 = vcombine.low %v167_v41, %v183_v42 }
  0xf4   :  { %2258 = vmatpush1.bf16.msra.mxu0 %v6286_v43  ;;  %2299 = vmatpush1.bf16.msra.mxu1 %v6288_v48  ;;  %v6260_v43 = vcombine.low %v104_v29, %v120_v31  ;;  %v184_v48 = vld [vmem:[#allocation5 + $0x3f8] sm:$0xff] }
  0xf5   :  { %2259 = vmatprep.subr.bf16.mxu0 %v6319_v49  ;;  %2300 = vmatprep.subr.bf16.mxu1 %v6321_v52  ;;  %v6293_v49 = vcombine.high %v136_v37, %v152_v38  ;;  %v7808_v52 = vsub.s32 1, %v7782_v21  ;;  %v6325_v58 = vcombine.high %v168_v45, %v184_v48  ;;  %v6324_v62 = vcombine.low %v168_v45, %v184_v48 }
  0xf7   :  { %v328_v16 = vrot.slane %v7816_v4, %v7808_v52 }
  0xf8   :  { %2260 = vmatpush1.bf16.msra.mxu0 %v6318_v53  ;;  %2301 = vmatpush1.bf16.msra.mxu1 %v6320_v56  ;;  %v7811_v53 = vsub.s32 3, %v7782_v21  ;;  %v200_v56 = vld [vmem:[#allocation5 + $0x478] sm:$0xff] }
  0xf9   :  { %2261 = vmatprep.subr.bf16.mxu0 %v6351_v57  ;;  %2302 = vmatprep.subr.bf16.mxu1 %v6353_v60  ;;  %v216_v57 = vld [vmem:[#allocation5 + $0x4f8] sm:$0xff]  ;;  %v231_v60 = vld [vmem:[#allocation5 + $0x570] sm:$0xff] }
  0xfa   :  { %v6357_v3 = vcombine.high %v200_v56, %v216_v57  ;;  %v6356_v8 = vcombine.low %v200_v56, %v216_v57  ;;  %v336_v20 = vrot.slane %v7816_v4, %v7811_v53  ;;  %v7264_v56 = vld [vmem:[%s8240_s3] sm:$0xff]   ;;  %v7265_v57 = vld [vmem:[%s8240_s3 + $0x48] sm:$0xff]  }
  0xfc   :  { %2262 = vmatpush1.bf16.msra.mxu0 %v6350_v61  ;;  %2303 = vmatpush1.bf16.msra.mxu1 %v6352_v1  ;;  %v247_v61 = vld [vmem:[#allocation5 + $0x5f0] sm:$0xff]  ;;  %v232_v1 = vld [vmem:[#allocation5 + $0x578] sm:$0xff] }
  0xfd   :  { %2263 = vmatprep.subr.bf16.mxu0 %v6383_v2  ;;  %2304 = vmatprep.subr.bf16.mxu1 %v6385_v5  ;;  %v248_v2 = vld [vmem:[#allocation5 + $0x5f8] sm:$0xff]  ;;  %v6386_v17 = vcombine.low %v231_v60, %v247_v61 }
  0xfe   :  { %v6389_v13 = vcombine.high %v232_v1, %v248_v2  ;;  %v6388_v22 = vcombine.low %v232_v1, %v248_v2  ;;  %v7268_v1 = vld [vmem:[%s8240_s3 + $0x10] sm:$0xff]   ;;  %v7858_v2 = vsub.s32 5, %v7782_v21 }
 0x100   :  { %2264 = vmatpush1.bf16.msra.mxu0 %v6382_v6  ;;  %2305 = vmatpush1.bf16.msra.mxu1 %v6384_v9  ;;  %v263_v6 = vld [vmem:[#allocation5 + $0x670] sm:$0xff]  ;;  %v6387_v9 = vcombine.high %v231_v60, %v247_v61  ;;  %v7848_v61 = vsub.s32 6, %v7782_v21 }
 0x101   :  { %2265 = vmatprep.subr.bf16.mxu0 %v6415_v10  ;;  %2306 = vmatprep.subr.bf16.mxu1 %v6417_v14  ;;  %v264_v10 = vld [vmem:[#allocation5 + $0x678] sm:$0xff]  ;;  %v324_v14 = vrot.slane %v7816_v4, %v7794_v46  ;;  %v7267_v60 = vld [vmem:[%s8240_s3 + $0x50] sm:$0xff]  }
 0x102   :  { %v6421_v26 = vcombine.high %v264_v10, %v280_v11 }
 0x104   :  { %2266 = vmatpush1.bf16.msra.mxu0 %v6414_v15  ;;  %2307 = vmatpush1.bf16.msra.mxu1 %v6416_v18  ;;  %v332_v15 = vrot.slane %v7816_v4, %v7797_v47  ;;  %v295_v18 = vld [vmem:[#allocation5 + $0x770] sm:$0xff] }
 0x105   :  { %2267 = vmatprep.subr.bf16.mxu0 %v6447_v19  ;;  %2308 = vmatprep.subr.bf16.mxu1 %v6449_v23  ;;  %v311_v19 = vld [vmem:[#allocation5 + $0x7f0] sm:$0xff]  ;;  %v6419_v23 = vcombine.high %v263_v6, %v279_v7 }
 0x106   :  { %v6451_v41 = vcombine.high %v295_v18, %v311_v19 }
 0x108   :  { %2268 = vmatpush1.bf16.msra.mxu0 %v6446_v24  ;;  %2309 = vmatpush1.bf16.msra.mxu1 %v6448_v27  ;;  %v296_v24 = vld [vmem:[#allocation5 + $0x778] sm:$0xff] }
 0x109   :  { %2335 = vmatprep.subr.bf16.mxu0 %v6227_v28  ;;  %2376 = vmatprep.subr.bf16.mxu1 %v6229_v32  ;;  %v312_v27 = vld [vmem:[#allocation5 + $0x7f8] sm:$0xff] }
 0x10a   :  { %v6453_v45 = vcombine.high %v296_v24, %v312_v27 }
 0x10b   :  { %2286 = vmatmul.mubr.bf16.vlgmr.msra.gmra.mrb[24].mxu0 %v7787_v30  ;;  %2327 = vmatmul.mubr.bf16.vlgmr.msra.gmra.mrb[24].mxu1 %v7787_v30  ;;  %v215_v30 = vld [vmem:[#allocation5 + $0x4f0] sm:$0xff] }
 0x10c   :  { %2336 = vmatpush1.bf16.msra.mxu0 %v6226_v33  ;;  %2377 = vmatpush1.bf16.msra.mxu1 %v6228_v36  ;;  %v6355_v63 = vcombine.high %v199_v51, %v215_v30  ;;  %v6354_v5 = vcombine.low %v199_v51, %v215_v30  ;;  %v6418_v36 = vcombine.low %v263_v6, %v279_v7  ;;  %v7263_v51 = vld [vmem:[%s8240_s3 + $0x40] sm:$0xff]   ;;  %v7273_v7 = vld [vmem:[%s8240_s3 + $0x68] sm:$0xff]  }
 0x10d   :  { %2337 = vmatprep.subr.bf16.mxu0 %v6259_v12  ;;  %2378 = vmatprep.subr.bf16.mxu1 %v6261_v39  ;;  %v6420_v12 = vcombine.low %v264_v10, %v280_v11  ;;  %v7271_v6 = vld [vmem:[%s8240_s3 + $0x60] sm:$0xff]   ;;  %v7275_v10 = vld [vmem:[%s8240_s3 + $0x70] sm:$0xff]   ;;  %v348_v11 = vrot.slane %v7816_v4, %v7848_v61 }
 0x10e   :  { %2367 = vmatprep.mubr.bf16.mxu0 %v7693_v0  ;;  %2408 = vmatprep.mubr.bf16.mxu1 %v7693_v0 }
 0x110   :  { %2338 = vmatpush1.bf16.msra.mxu0 %v6258_v40  ;;  %2379 = vmatpush1.bf16.msra.mxu1 %v6260_v43 }
 0x111   :  { %2339 = vmatprep.subr.bf16.mxu0 %v6291_v44  ;;  %2380 = vmatprep.subr.bf16.mxu1 %v6293_v49 }
 0x114   :  { %2340 = vmatpush1.bf16.msra.mxu0 %v6290_v50  ;;  %2381 = vmatpush1.bf16.msra.mxu1 %v6292_v54  ;;  %v6450_v50 = vcombine.low %v295_v18, %v311_v19  ;;  %v6452_v54 = vcombine.low %v296_v24, %v312_v27 }
 0x115   :  { %2341 = vmatprep.subr.bf16.mxu0 %v6323_v55  ;;  %2382 = vmatprep.subr.bf16.mxu1 %v6325_v58  ;;  %v7830_v55 = vsub.s32 4, %v7782_v21  ;;  %v7266_v58 = vld [vmem:[%s8240_s3 + $0x8] sm:$0xff]  }
 0x118   :  { %2342 = vmatpush1.bf16.msra.mxu0 %v6322_v59  ;;  %2383 = vmatpush1.bf16.msra.mxu1 %v6324_v62  ;;  %v7614_v59 = vld [vmem:[%s8237_s0] sm:$0xf]  ;;  %v7851_v62 = vsub.s32 7, %v7782_v21 }
 0x119   :  { %2343 = vmatprep.subr.bf16.mxu0 %v6355_v63  ;;  %2384 = vmatprep.subr.bf16.mxu1 %v6357_v3  ;;  %v7269_v3 = vld [vmem:[%s8240_s3 + $0x58] sm:$0xff]   ;;  %v7272_v21 = vld [vmem:[%s8240_s3 + $0x20] sm:$0xff]  }
 0x11c   :  { %2344 = vmatpush1.bf16.msra.mxu0 %v6354_v5  ;;  %2385 = vmatpush1.bf16.msra.mxu1 %v6356_v8  ;;  %v7270_v5 = vld [vmem:[%s8240_s3 + $0x18] sm:$0xff]   ;;  %v7274_v8 = vld [vmem:[%s8240_s3 + $0x28] sm:$0xff]  }
 0x11d   :  { %2345 = vmatprep.subr.bf16.mxu0 %v6387_v9  ;;  %2386 = vmatprep.subr.bf16.mxu1 %v6389_v13  ;;  %v340_v9 = vrot.slane %v7816_v4, %v7830_v55  ;;  %v344_v13 = vrot.slane %v7816_v4, %v7858_v2 }
 0x11e   :  { %v1795_v25 = vpop.f32.mrb[0].mxu0  ;;  %v1836_v29 = vpop.f32.mrb[0].mxu1 }
 0x11f   :  { %v1796_v28 = vadd.f32 %v1795_v25, %v324_v14  ;;  %v1797_v31 = vpop.f32.mrb[1].mxu0  ;;  %v1837_v32 = vadd.f32 %v1836_v29, %v332_v15  ;;  %v1838_v34 = vpop.f32.mrb[1].mxu1  ;;  %v352_v14 = vrot.slane %v7816_v4, %v7851_v62  ;;  %v7277_v4 = vld [vmem:[%s8240_s3 + $0x78] sm:$0xff]  }
 0x120   :  { %v1798_v33 = vadd.f32 %v1797_v31, %v328_v16  ;;  %v1799_v35 = vpop.f32.mrb[2].mxu0  ;;  %2346 = vmatpush1.bf16.msra.mxu0 %v6386_v17  ;;  %v1839_v38 = vadd.f32 %v1838_v34, %v336_v20  ;;  %v1840_v39 = vpop.f32.mrb[2].mxu1  ;;  %2387 = vmatpush1.bf16.msra.mxu1 %v6388_v22  ;;  %v7276_v16 = vld [vmem:[%s8240_s3 + $0x30] sm:$0xff]  }
 0x121   :  { %v2417_v37 = vpack.c.bf16 %v1796_v28, %v1796_v28  ;;  %v1800_v40 = vpop.f32.mrb[3].mxu0  ;;  %2347 = vmatprep.subr.bf16.mxu0 %v6419_v23  ;;  %v2421_v42 = vpack.c.bf16 %v1837_v32, %v1837_v32  ;;  %v1841_v44 = vpop.f32.mrb[3].mxu1  ;;  %2388 = vmatprep.subr.bf16.mxu1 %v6421_v26  ;;  %v7278_v35 = vld [vmem:[%s8240_s3 + $0x38] sm:$0xff]   ;;  %v314_v39 = vld [vmem:[%s8239_s2 + $0x8] sm:$0xff] }
 0x122   :  { %v2418_v43 = vpack.c.bf16 %v1798_v33, %v1798_v33  ;;  %v2422_v48 = vpack.c.bf16 %v1839_v38, %v1839_v38  ;;  %v356_v40 = vrot.slane %v314_v39, %v7794_v46 }
 0x123   :  { %2419 = vst [vmem:[#allocation2] sm:$0xf] %v2417_v37  ;;  %v2425_v49 = vrot.slane %v2421_v42, 4  ;;  %v360_v42 = vrot.slane %v314_v39, %v7808_v52 }
 0x124   :  { %2420 = vst [vmem:[#allocation2 + $0x8] sm:$0xf] %v2418_v43  ;;  %2348 = vmatpush1.bf16.msra.mxu0 %v6418_v36  ;;  %v2426_v30 = vrot.slane %v2422_v48, 4  ;;  %2389 = vmatpush1.bf16.msra.mxu1 %v6420_v12  ;;  %v368_v43 = vrot.slane %v314_v39, %v7811_v53 }
 0x125   :  { %2349 = vmatprep.subr.bf16.mxu0 %v6451_v41  ;;  %2429 = vst [vmem:[#allocation2] sm:$0xf0] %v2425_v49  ;;  %2390 = vmatprep.subr.bf16.mxu1 %v6453_v45  ;;  %v364_v41 = vrot.slane %v314_v39, %v7797_v47 }
 0x126   :  { %2430 = vst [vmem:[#allocation2 + $0x8] sm:$0xf0] %v2426_v30 }
 0x128   :  { %2350 = vmatpush1.bf16.msra.mxu0 %v6450_v50  ;;  %2391 = vmatpush1.bf16.msra.mxu1 %v6452_v54 }
 0x129   :  { %6839 = vmatprep.subr.bf16.mxu0 %v7263_v51 }
 0x12b   :  { %2368 = vmatmul.mubr.bf16.vlgmr.msra.gmra.mrb[28].mxu0 %v7614_v59  ;;  %2409 = vmatmul.mubr.bf16.vlgmr.msra.gmra.mrb[28].mxu1 %v7614_v59 }
 0x12c   :  { %6840 = vmatpush3.bf16.msra.mxu0 %v7264_v56  ;;  %3133 = vmatprep.mubr.bf16.mxu1 %v7693_v0  ;;  %v2529_v12 = vld [vmem:[#allocation2] sm:$0xff] }
 0x12d   :  { %6841 = vmatprep.subr.bf16.mxu0 %v7265_v57  ;;  %v2530_v63 = vld [vmem:[#allocation2 + $0x8] sm:$0xff] }
 0x12e   :  { %2705 = vmatprep.mubr.bf16.mxu0 %v2530_v63 }
 0x130   :  { %6842 = vmatpush3.bf16.msra.mxu0 %v7266_v58 }
 0x131   :  { %6843 = vmatprep.subr.bf16.mxu0 %v7267_v60 }
 0x134   :  { %6844 = vmatpush3.bf16.msra.mxu0 %v7268_v1 }
 0x135   :  { %6845 = vmatprep.subr.bf16.mxu0 %v7269_v3 }
 0x138   :  { %6846 = vmatpush3.bf16.msra.mxu0 %v7270_v5 }
 0x139   :  { %6847 = vmatprep.subr.bf16.mxu0 %v7271_v6 }
 0x13c   :  { %6848 = vmatpush3.bf16.msra.mxu0 %v7272_v21 }
 0x13d   :  { %6849 = vmatprep.subr.bf16.mxu0 %v7273_v7 }
 0x13e   :  { %v1877_v15 = vpop.f32.mrb[4].mxu0  ;;  %v1918_v18 = vpop.f32.mrb[4].mxu1 }
 0x13f   :  { %v1878_v17 = vadd.f32 %v1877_v15, %v340_v9  ;;  %v1879_v19 = vpop.f32.mrb[5].mxu0  ;;  %v1919_v20 = vadd.f32 %v1918_v18, %v348_v11  ;;  %v1920_v23 = vpop.f32.mrb[5].mxu1  ;;  %v380_v9 = vrot.slane %v314_v39, %v7848_v61  ;;  %v384_v11 = vrot.slane %v314_v39, %v7851_v62 }
 0x140   :  { %v1880_v22 = vadd.f32 %v1879_v19, %v344_v13  ;;  %v1881_v24 = vpop.f32.mrb[6].mxu0  ;;  %6850 = vmatpush3.bf16.msra.mxu0 %v7274_v8  ;;  %v1921_v26 = vadd.f32 %v1920_v23, %v352_v14  ;;  %v1922_v27 = vpop.f32.mrb[6].mxu1  ;;  %v372_v8 = vrot.slane %v314_v39, %v7830_v55 }
 0x141   :  { %v2431_v25 = vpack.c.bf16 %v1878_v17, %v1878_v17  ;;  %v1882_v28 = vpop.f32.mrb[7].mxu0  ;;  %6851 = vmatprep.subr.bf16.mxu0 %v7275_v10  ;;  %v2435_v29 = vpack.c.bf16 %v1919_v20, %v1919_v20  ;;  %v1923_v32 = vpop.f32.mrb[7].mxu1  ;;  %v376_v10 = vrot.slane %v314_v39, %v7858_v2 }
 0x142   :  { %v2432_v31 = vpack.c.bf16 %v1880_v22, %v1880_v22  ;;  %v2436_v33 = vpack.c.bf16 %v1921_v26, %v1921_v26 }
 0x143   :  { %2433 = vst [vmem:[#allocation2 + $0x10] sm:$0xf] %v2431_v25  ;;  %v2439_v34 = vrot.slane %v2435_v29, 4 }
 0x144   :  { %2434 = vst [vmem:[#allocation2 + $0x18] sm:$0xf] %v2432_v31  ;;  %6852 = vmatpush3.bf16.msra.mxu0 %v7276_v16  ;;  %v2440_v36 = vrot.slane %v2436_v33, 4 }
 0x145   :  { %6853 = vmatprep.subr.bf16.mxu0 %v7277_v4  ;;  %2443 = vst [vmem:[#allocation2 + $0x10] sm:$0xf0] %v2439_v34  ;;  %v315_v34 = vld [vmem:[%s8239_s2 + $0x10] sm:$0xff] }
 0x146   :  { %2444 = vst [vmem:[#allocation2 + $0x18] sm:$0xf0] %v2440_v36  ;;  %v396_v36 = vrot.slane %v315_v34, %v7797_v47 }
 0x148   :  { %6854 = vmatpush3.bf16.msra.mxu0 %v7278_v35  ;;  %v388_v35 = vrot.slane %v315_v34, %v7794_v46 }
 0x14b   :  { %2706 = vmatmul.mubr.bf16.vlgmr.msra.gmra.mrb[32].mxu0 %v2529_v12  ;;  %v392_v12 = vrot.slane %v315_v34, %v7808_v52 }
 0x14c   :  { %v2531_v38 = vld [vmem:[#allocation2 + $0x10] sm:$0xff] }
 0x14d   :  { %v2532_v37 = vld [vmem:[#allocation2 + $0x18] sm:$0xff] }
 0x14e   :  { %2713 = vmatprep.mubr.bf16.mxu0 %v2532_v37  ;;  %v400_v37 = vrot.slane %v315_v34, %v7811_v53 }
 0x153   :  { %2714 = vmatmul.mubr.bf16.gmra.mrb[36].mxu0 %v2531_v38 }
 0x15e   :  { %v1959_v44 = vpop.f32.mrb[8].mxu0  ;;  %v2000_v48 = vpop.f32.mrb[8].mxu1 }
 0x15f   :  { %v1960_v45 = vadd.f32 %v1959_v44, %v356_v40  ;;  %v1961_v49 = vpop.f32.mrb[9].mxu0  ;;  %v2001_v50 = vadd.f32 %v2000_v48, %v364_v41  ;;  %v2002_v30 = vpop.f32.mrb[9].mxu1 }
 0x160   :  { %v1962_v51 = vadd.f32 %v1961_v49, %v360_v42  ;;  %v1963_v54 = vpop.f32.mrb[10].mxu0  ;;  %v2003_v57 = vadd.f32 %v2002_v30, %v368_v43  ;;  %v2004_v58 = vpop.f32.mrb[10].mxu1 }
 0x161   :  { %v2445_v56 = vpack.c.bf16 %v1960_v45, %v1960_v45  ;;  %v1964_v59 = vpop.f32.mrb[11].mxu0  ;;  %v2449_v60 = vpack.c.bf16 %v2001_v50, %v2001_v50  ;;  %v2005_v1 = vpop.f32.mrb[11].mxu1 }
 0x162   :  { %v2446_v63 = vpack.c.bf16 %v1962_v51, %v1962_v51  ;;  %v2450_v3 = vpack.c.bf16 %v2003_v57, %v2003_v57  ;;  %v404_v1 = vrot.slane %v315_v34, %v7830_v55 }
 0x163   :  { %2447 = vst [vmem:[#allocation2 + $0x20] sm:$0xf] %v2445_v56  ;;  %v2453_v5 = vrot.slane %v2449_v60, 4 }
 0x164   :  { %2448 = vst [vmem:[#allocation2 + $0x28] sm:$0xf] %v2446_v63  ;;  %v2454_v6 = vrot.slane %v2450_v3, 4  ;;  %v412_v3 = vrot.slane %v315_v34, %v7848_v61 }
 0x165   :  { %2457 = vst [vmem:[#allocation2 + $0x20] sm:$0xf0] %v2453_v5  ;;  %v408_v5 = vrot.slane %v315_v34, %v7858_v2 }
 0x166   :  { %2458 = vst [vmem:[#allocation2 + $0x28] sm:$0xf0] %v2454_v6  ;;  %v416_v6 = vrot.slane %v315_v34, %v7851_v62 }
 0x16c   :  { %v2533_v21 = vld [vmem:[#allocation2 + $0x20] sm:$0xff] }
 0x16d   :  { %v2534_v7 = vld [vmem:[#allocation2 + $0x28] sm:$0xff] }
 0x16e   :  { %2721 = vmatprep.mubr.bf16.mxu0 %v2534_v7 }
 0x16f   :  { %2722 = vmatmul.mubr.bf16.gmra.mrb[40].mxu0 %v2533_v21 }
 0x17e   :  { %v2041_v13 = vpop.f32.mrb[12].mxu0  ;;  %v2082_v15 = vpop.f32.mrb[12].mxu1 }
 0x17f   :  { %v2042_v14 = vadd.f32 %v2041_v13, %v372_v8  ;;  %v2043_v16 = vpop.f32.mrb[13].mxu0  ;;  %v2083_v17 = vadd.f32 %v2082_v15, %v380_v9  ;;  %v2084_v19 = vpop.f32.mrb[13].mxu1 }
 0x180   :  { %v2044_v18 = vadd.f32 %v2043_v16, %v376_v10  ;;  %v2045_v20 = vpop.f32.mrb[14].mxu0  ;;  %v2085_v23 = vadd.f32 %v2084_v19, %v384_v11  ;;  %v2086_v24 = vpop.f32.mrb[14].mxu1 }
 0x181   :  { %v2459_v22 = vpack.c.bf16 %v2042_v14, %v2042_v14  ;;  %v2046_v25 = vpop.f32.mrb[15].mxu0  ;;  %v2463_v26 = vpack.c.bf16 %v2083_v17, %v2083_v17  ;;  %v2087_v28 = vpop.f32.mrb[15].mxu1 }
 0x182   :  { %v2460_v27 = vpack.c.bf16 %v2044_v18, %v2044_v18  ;;  %v2464_v4 = vpack.c.bf16 %v2085_v23, %v2085_v23  ;;  %v316_v28 = vld [vmem:[%s8239_s2 + $0x18] sm:$0xff] }
 0x183   :  { %2461 = vst [vmem:[#allocation2 + $0x30] sm:$0xf] %v2459_v22  ;;  %v2467_v29 = vrot.slane %v2463_v26, 4 }
 0x184   :  { %2462 = vst [vmem:[#allocation2 + $0x38] sm:$0xf] %v2460_v27  ;;  %v2468_v31 = vrot.slane %v2464_v4, 4  ;;  %v420_v4 = vrot.slane %v316_v28, %v7794_v46 }
 0x185   :  { %2471 = vst [vmem:[#allocation2 + $0x30] sm:$0xf0] %v2467_v29  ;;  %v428_v29 = vrot.slane %v316_v28, %v7797_v47 }
 0x186   :  { %2472 = vst [vmem:[#allocation2 + $0x38] sm:$0xf0] %v2468_v31  ;;  %v424_v31 = vrot.slane %v316_v28, %v7808_v52 }
 0x18c   :  { %v2535_v32 = vld [vmem:[#allocation2 + $0x30] sm:$0xff] }
 0x18d   :  { %v2536_v33 = vld [vmem:[#allocation2 + $0x38] sm:$0xff] }
 0x18e   :  { %2729 = vmatprep.mubr.bf16.mxu0 %v2536_v33 }
 0x18f   :  { %2730 = vmatmul.mubr.bf16.gmra.mrb[44].mxu0 %v2535_v32  ;;  %v432_v32 = vrot.slane %v316_v28, %v7811_v53 }
 0x19e   :  { %v2123_v38 = vpop.f32.mrb[16].mxu0  ;;  %v2164_v40 = vpop.f32.mrb[16].mxu1 }
 0x19f   :  { %v2124_v39 = vadd.f32 %v2123_v38, %v388_v35  ;;  %v2125_v41 = vpop.f32.mrb[17].mxu0  ;;  %v2165_v42 = vadd.f32 %v2164_v40, %v396_v36  ;;  %v2166_v44 = vpop.f32.mrb[17].mxu1 }
 0x1a0   :  { %v2126_v43 = vadd.f32 %v2125_v41, %v392_v12  ;;  %v2127_v45 = vpop.f32.mrb[18].mxu0  ;;  %v2167_v49 = vadd.f32 %v2166_v44, %v400_v37  ;;  %v2168_v50 = vpop.f32.mrb[18].mxu1 }
 0x1a1   :  { %v2473_v48 = vpack.c.bf16 %v2124_v39, %v2124_v39  ;;  %v2128_v51 = vpop.f32.mrb[19].mxu0  ;;  %v2477_v30 = vpack.c.bf16 %v2165_v42, %v2165_v42  ;;  %v2169_v56 = vpop.f32.mrb[19].mxu1  ;;  %v436_v50 = vrot.slane %v316_v28, %v7830_v55 }
 0x1a2   :  { %v2474_v54 = vpack.c.bf16 %v2126_v43, %v2126_v43  ;;  %v2478_v57 = vpack.c.bf16 %v2167_v49, %v2167_v49  ;;  %v444_v51 = vrot.slane %v316_v28, %v7848_v61 }
 0x1a3   :  { %2475 = vst [vmem:[#allocation2 + $0x40] sm:$0xf] %v2473_v48  ;;  %v2481_v58 = vrot.slane %v2477_v30, 4  ;;  %v440_v30 = vrot.slane %v316_v28, %v7858_v2 }
 0x1a4   :  { %2476 = vst [vmem:[#allocation2 + $0x48] sm:$0xf] %v2474_v54  ;;  %v2482_v59 = vrot.slane %v2478_v57, 4  ;;  %v448_v54 = vrot.slane %v316_v28, %v7851_v62 }
 0x1a5   :  { %2485 = vst [vmem:[#allocation2 + $0x40] sm:$0xf0] %v2481_v58 }
 0x1a6   :  { %2486 = vst [vmem:[#allocation2 + $0x48] sm:$0xf0] %v2482_v59 }
 0x1ac   :  { %v2537_v60 = vld [vmem:[#allocation2 + $0x40] sm:$0xff] }
 0x1ad   :  { %v2538_v63 = vld [vmem:[#allocation2 + $0x48] sm:$0xff] }
 0x1ae   :  { %2737 = vmatprep.mubr.bf16.mxu0 %v2538_v63 }
 0x1af   :  { %2738 = vmatmul.mubr.bf16.gmra.mrb[48].mxu0 %v2537_v60 }
 0x1be   :  { %v2205_v21 = vpop.f32.mrb[20].mxu0  ;;  %v2246_v8 = vpop.f32.mrb[20].mxu1 }
 0x1bf   :  { %v2206_v7 = vadd.f32 %v2205_v21, %v404_v1  ;;  %v2207_v9 = vpop.f32.mrb[21].mxu0  ;;  %v2247_v10 = vadd.f32 %v2246_v8, %v412_v3  ;;  %v2248_v13 = vpop.f32.mrb[21].mxu1 }
 0x1c0   :  { %v2208_v11 = vadd.f32 %v2207_v9, %v408_v5  ;;  %v2209_v14 = vpop.f32.mrb[22].mxu0  ;;  %v2249_v16 = vadd.f32 %v2248_v13, %v416_v6  ;;  %v2250_v17 = vpop.f32.mrb[22].mxu1 }
 0x1c1   :  { %v2487_v15 = vpack.c.bf16 %v2206_v7, %v2206_v7  ;;  %v2210_v18 = vpop.f32.mrb[23].mxu0  ;;  %v2491_v19 = vpack.c.bf16 %v2247_v10, %v2247_v10  ;;  %v2251_v22 = vpop.f32.mrb[23].mxu1 }
 0x1c2   :  { %v2488_v20 = vpack.c.bf16 %v2208_v11, %v2208_v11  ;;  %v2492_v23 = vpack.c.bf16 %v2249_v16, %v2249_v16 }
 0x1c3   :  { %2489 = vst [vmem:[#allocation2 + $0x50] sm:$0xf] %v2487_v15  ;;  %v2495_v24 = vrot.slane %v2491_v19, 4 }
 0x1c4   :  { %2490 = vst [vmem:[#allocation2 + $0x58] sm:$0xf] %v2488_v20  ;;  %v2496_v25 = vrot.slane %v2492_v23, 4 }
 0x1c5   :  { %2499 = vst [vmem:[#allocation2 + $0x50] sm:$0xf0] %v2495_v24 }
 0x1c6   :  { %2500 = vst [vmem:[#allocation2 + $0x58] sm:$0xf0] %v2496_v25 }
 0x1cc   :  { %v2539_v26 = vld [vmem:[#allocation2 + $0x50] sm:$0xff] }
 0x1cd   :  { %v2540_v27 = vld [vmem:[#allocation2 + $0x58] sm:$0xff] }
 0x1ce   :  { %2745 = vmatprep.mubr.bf16.mxu0 %v2540_v27 }
 0x1cf   :  { %2746 = vmatmul.mubr.bf16.gmra.mrb[52].mxu0 %v2539_v26 }
 0x1de   :  { %v2287_v33 = vpop.f32.mrb[24].mxu0  ;;  %v2328_v35 = vpop.f32.mrb[24].mxu1 }
 0x1df   :  { %v2288_v34 = vadd.f32 %v2287_v33, %v420_v4  ;;  %v2289_v36 = vpop.f32.mrb[25].mxu0  ;;  %v2329_v12 = vadd.f32 %v2328_v35, %v428_v29  ;;  %v2330_v38 = vpop.f32.mrb[25].mxu1 }
 0x1e0   :  { %v2290_v37 = vadd.f32 %v2289_v36, %v424_v31  ;;  %v2291_v39 = vpop.f32.mrb[26].mxu0  ;;  %v2331_v41 = vadd.f32 %v2330_v38, %v432_v32  ;;  %v2332_v42 = vpop.f32.mrb[26].mxu1 }
 0x1e1   :  { %v2501_v40 = vpack.c.bf16 %v2288_v34, %v2288_v34  ;;  %v2292_v43 = vpop.f32.mrb[27].mxu0  ;;  %v2505_v44 = vpack.c.bf16 %v2329_v12, %v2329_v12  ;;  %v2333_v45 = vpop.f32.mrb[27].mxu1 }
 0x1e2   :  { %v2502_v46 = vpack.c.bf16 %v2290_v37, %v2290_v37  ;;  %v2506_v47 = vpack.c.bf16 %v2331_v41, %v2331_v41 }
 0x1e3   :  { %2503 = vst [vmem:[#allocation2 + $0x60] sm:$0xf] %v2501_v40  ;;  %v2509_v52 = vrot.slane %v2505_v44, 4 }
 0x1e4   :  { %2504 = vst [vmem:[#allocation2 + $0x68] sm:$0xf] %v2502_v46  ;;  %v2510_v53 = vrot.slane %v2506_v47, 4 }
 0x1e5   :  { %2513 = vst [vmem:[#allocation2 + $0x60] sm:$0xf0] %v2509_v52 }
 0x1e6   :  { %2514 = vst [vmem:[#allocation2 + $0x68] sm:$0xf0] %v2510_v53 }
 0x1ec   :  { %v2541_v48 = vld [vmem:[#allocation2 + $0x60] sm:$0xff] }
 0x1ed   :  { %v2542_v49 = vld [vmem:[#allocation2 + $0x68] sm:$0xff] }
 0x1ee   :  { %2753 = vmatprep.mubr.bf16.mxu0 %v2542_v49 }
 0x1ef   :  { %2754 = vmatmul.mubr.bf16.gmra.mrb[56].mxu0 %v2541_v48 }
 0x1fe   :  { %v2369_v56 = vpop.f32.mrb[28].mxu0  ;;  %v2410_v58 = vpop.f32.mrb[28].mxu1 }
 0x1ff   :  { %v2370_v57 = vadd.f32 %v2369_v56, %v436_v50  ;;  %v2371_v59 = vpop.f32.mrb[29].mxu0  ;;  %v2411_v60 = vadd.f32 %v2410_v58, %v444_v51  ;;  %v2412_v1 = vpop.f32.mrb[29].mxu1 }
 0x200   :  { %v2372_v63 = vadd.f32 %v2371_v59, %v440_v30  ;;  %v2373_v3 = vpop.f32.mrb[30].mxu0  ;;  %v2413_v6 = vadd.f32 %v2412_v1, %v448_v54  ;;  %v2414_v21 = vpop.f32.mrb[30].mxu1 }
 0x201   :  { %v2515_v5 = vpack.c.bf16 %v2370_v57, %v2370_v57  ;;  %v2374_v7 = vpop.f32.mrb[31].mxu0  ;;  %v2519_v8 = vpack.c.bf16 %v2411_v60, %v2411_v60  ;;  %v2415_v9 = vpop.f32.mrb[31].mxu1 }
 0x202   :  { %v2516_v55 = vpack.c.bf16 %v2372_v63, %v2372_v63  ;;  %v2520_v61 = vpack.c.bf16 %v2413_v6, %v2413_v6 }
 0x203   :  { %2517 = vst [vmem:[#allocation2 + $0x70] sm:$0xf] %v2515_v5  ;;  %v2523_v2 = vrot.slane %v2519_v8, 4 }
 0x204   :  { %2518 = vst [vmem:[#allocation2 + $0x78] sm:$0xf] %v2516_v55  ;;  %v2524_v62 = vrot.slane %v2520_v61, 4 }
 0x205   :  { %2527 = vst [vmem:[#allocation2 + $0x70] sm:$0xf0] %v2523_v2 }
 0x206   :  { %2528 = vst [vmem:[#allocation2 + $0x78] sm:$0xf0] %v2524_v62 }
 0x20c   :  { %v2543_v11 = vld [vmem:[#allocation2 + $0x70] sm:$0xff] }
 0x20d   :  { %v2544_v10 = vld [vmem:[#allocation2 + $0x78] sm:$0xff] }
 0x20e   :  { %2761 = vmatprep.mubr.bf16.mxu0 %v2544_v10 }
 0x20f   :  { %2762 = vmatmul.mubr.bf16.gmra.mrb[60].mxu0 %v2543_v11 }
 0x21e   :  { %v6855_v13 = vpop.f32.mrb[32].mxu0 }
 0x21f   :  { %v6856_v14 = vpop.f32.mrb[33].mxu0 }
 0x220   :  { %v7931_v15 = vadd.f32 %v6856_v14, %v6855_v13  ;;  %v6858_v16 = vpop.f32.mrb[34].mxu0 }
 0x221   :  { %v6859_v17 = vpop.f32.mrb[35].mxu0 }
 0x222   :  { %v7933_v18 = vadd.f32 %v6859_v17, %v6858_v16 }
 0x224   :  { %v2770_v19 = vmax.f32 %v7931_v15, %v7933_v18 }
 0x226   :  { %v6861_v20 = vpop.f32.mrb[36].mxu0 }
 0x227   :  { %v6862_v22 = vpop.f32.mrb[37].mxu0 }
 0x228   :  { %v7937_v23 = vadd.f32 %v6862_v22, %v6861_v20  ;;  %v6864_v24 = vpop.f32.mrb[38].mxu0 }
 0x229   :  { %v6865_v25 = vpop.f32.mrb[39].mxu0 }
 0x22a   :  { %v2771_v26 = vmax.f32 %v2770_v19, %v7937_v23  ;;  %v7940_v27 = vadd.f32 %v6865_v25, %v6864_v24 }
 0x22c   :  { %v2772_v28 = vmax.f32 %v2771_v26, %v7940_v27 }
 0x242   :  { %v6867_v4 = vpop.f32.mrb[40].mxu0 }
 0x243   :  { %v6868_v29 = vpop.f32.mrb[41].mxu0 }
 0x244   :  { %v7943_v31 = vadd.f32 %v6868_v29, %v6867_v4  ;;  %v6870_v32 = vpop.f32.mrb[42].mxu0 }
 0x245   :  { %v6871_v33 = vpop.f32.mrb[43].mxu0 }
 0x246   :  { %v2773_v34 = vmax.f32 %v2772_v28, %v7943_v31  ;;  %v7946_v35 = vadd.f32 %v6871_v33, %v6870_v32 }
 0x248   :  { %v2774_v36 = vmax.f32 %v2773_v34, %v7946_v35 }
 0x262   :  { %v6873_v12 = vpop.f32.mrb[44].mxu0 }
 0x263   :  { %v6874_v37 = vpop.f32.mrb[45].mxu0 }
 0x264   :  { %v7949_v38 = vadd.f32 %v6874_v37, %v6873_v12  ;;  %v6876_v39 = vpop.f32.mrb[46].mxu0 }
 0x265   :  { %v6877_v40 = vpop.f32.mrb[47].mxu0 }
 0x266   :  { %v2775_v41 = vmax.f32 %v2774_v36, %v7949_v38  ;;  %v7952_v42 = vadd.f32 %v6877_v40, %v6876_v39 }
 0x268   :  { %v2776_v43 = vmax.f32 %v2775_v41, %v7952_v42 }
 0x282   :  { %v6879_v44 = vpop.f32.mrb[48].mxu0 }
 0x283   :  { %v6880_v46 = vpop.f32.mrb[49].mxu0 }
 0x284   :  { %v7955_v45 = vadd.f32 %v6880_v46, %v6879_v44  ;;  %v6882_v47 = vpop.f32.mrb[50].mxu0 }
 0x285   :  { %v6883_v52 = vpop.f32.mrb[51].mxu0 }
 0x286   :  { %v2777_v53 = vmax.f32 %v2776_v43, %v7955_v45  ;;  %v7958_v48 = vadd.f32 %v6883_v52, %v6882_v47 }
 0x288   :  { %v2778_v49 = vmax.f32 %v2777_v53, %v7958_v48 }
 0x2a2   :  { %v6885_v50 = vpop.f32.mrb[52].mxu0 }
 0x2a3   :  { %v6886_v51 = vpop.f32.mrb[53].mxu0 }
 0x2a4   :  { %v7961_v30 = vadd.f32 %v6886_v51, %v6885_v50  ;;  %v6888_v54 = vpop.f32.mrb[54].mxu0 }
 0x2a5   :  { %v6889_v56 = vpop.f32.mrb[55].mxu0 }
 0x2a6   :  { %v2779_v57 = vmax.f32 %v2778_v49, %v7961_v30  ;;  %v7964_v58 = vadd.f32 %v6889_v56, %v6888_v54 }
 0x2a8   :  { %v2780_v59 = vmax.f32 %v2779_v57, %v7964_v58 }
 0x2c2   :  { %v6891_v60 = vpop.f32.mrb[56].mxu0 }
 0x2c3   :  { %v6892_v63 = vpop.f32.mrb[57].mxu0 }
 0x2c4   :  { %v7967_v1 = vadd.f32 %v6892_v63, %v6891_v60  ;;  %v6894_v3 = vpop.f32.mrb[58].mxu0 }
 0x2c5   :  { %v6895_v5 = vpop.f32.mrb[59].mxu0 }
 0x2c6   :  { %v2781_v6 = vmax.f32 %v2780_v59, %v7967_v1  ;;  %v7970_v21 = vadd.f32 %v6895_v5, %v6894_v3 }
 0x2c8   :  { %v2782_v7 = vmax.f32 %v2781_v6, %v7970_v21 }
 0x2e2   :  { %v6897_v8 = vpop.f32.mrb[60].mxu0 }
 0x2e3   :  { %v6898_v55 = vpop.f32.mrb[61].mxu0 }
 0x2e4   :  { %v7973_v9 = vadd.f32 %v6898_v55, %v6897_v8  ;;  %v6900_v61 = vpop.f32.mrb[62].mxu0 }
 0x2e5   :  { %v6901_v2 = vpop.f32.mrb[63].mxu0 }
 0x2e6   :  { %v2783_v62 = vmax.f32 %v2782_v7, %v7973_v9  ;;  %v6902_v10 = vadd.f32 %v6901_v2, %v6900_v61 }
 0x2e8   :  { %v2784_v11 = vmax.f32 %v2783_v62, %v6902_v10 }
 0x2ea   :  { %v2830_v13 = vsub.f32 %v6902_v10, %v2784_v11  ;;  %v2785_v14 = vsub.f32 %v7931_v15, %v2784_v11  ;;  %v2788_v16 = vsub.f32 %v7933_v18, %v2784_v11  ;;  %v2791_v17 = vsub.f32 %v7937_v23, %v2784_v11 }
 0x2eb   :  { %v2794_v19 = vsub.f32 %v7940_v27, %v2784_v11  ;;  %v2797_v20 = vsub.f32 %v7943_v31, %v2784_v11  ;;  %v2800_v22 = vsub.f32 %v7946_v35, %v2784_v11  ;;  %v2803_v24 = vsub.f32 %v7949_v38, %v2784_v11 }
 0x2ec   :  { %v2786_v25 = vmul.f32 1.442695, %v2785_v14  ;;  %v2789_v26 = vmul.f32 1.442695, %v2788_v16  ;;  %v2806_v28 = vsub.f32 %v7952_v42, %v2784_v11  ;;  %v2809_v4 = vsub.f32 %v7955_v45, %v2784_v11 }
 0x2ed   :  { %v2792_v29 = vmul.f32 1.442695, %v2791_v17  ;;  %v2795_v15 = vmul.f32 1.442695, %v2794_v19  ;;  %v2812_v18 = vsub.f32 %v7958_v48, %v2784_v11  ;;  %v2815_v23 = vsub.f32 %v7961_v30, %v2784_v11 }
 0x2ee   :  { %7547 = vpow2.f32 %v2786_v25  ;;  %v2818_v27 = vsub.f32 %v7964_v58, %v2784_v11  ;;  %v2821_v31 = vsub.f32 %v7967_v1, %v2784_v11  ;;  %v2824_v32 = vsub.f32 %v7970_v21, %v2784_v11 }
 0x2ef   :  { %7549 = vpow2.f32 %v2789_v26  ;;  %v2827_v33 = vsub.f32 %v7973_v9, %v2784_v11  ;;  %v2798_v34 = vmul.f32 1.442695, %v2797_v20  ;;  %v2801_v35 = vmul.f32 1.442695, %v2800_v22 }
 0x2f0   :  { %7551 = vpow2.f32 %v2792_v29  ;;  %v2804_v36 = vmul.f32 1.442695, %v2803_v24  ;;  %v2807_v12 = vmul.f32 1.442695, %v2806_v28  ;;  %v2810_v39 = vmul.f32 1.442695, %v2809_v4 }
 0x2f1   :  { %7553 = vpow2.f32 %v2795_v15  ;;  %v2813_v42 = vmul.f32 1.442695, %v2812_v18  ;;  %v2816_v46 = vmul.f32 1.442695, %v2815_v23  ;;  %v2819_v52 = vmul.f32 1.442695, %v2818_v27 }
 0x2f2   :  { %7555 = vpow2.f32 %v2798_v34  ;;  %v2822_v49 = vmul.f32 1.442695, %v2821_v31  ;;  %v2825_v30 = vmul.f32 1.442695, %v2824_v32  ;;  %v2828_v57 = vmul.f32 1.442695, %v2827_v33 }
 0x2f3   :  { %7557 = vpow2.f32 %v2801_v35  ;;  %v2831_v60 = vmul.f32 1.442695, %v2830_v13 }
 0x2f4   :  { %7559 = vpow2.f32 %v2804_v36 }
 0x2f5   :  { %7561 = vpow2.f32 %v2807_v12 }
 0x2f6   :  { %7563 = vpow2.f32 %v2810_v39 }
 0x2f7   :  { %7565 = vpow2.f32 %v2813_v42 }
 0x2f8   :  { %v7548_v37 = vpop.eup %7547  ;;  %7567 = vpow2.f32 %v2816_v46 }
 0x2f9   :  { %v7550_v38 = vpop.eup %7549  ;;  %7569 = vpow2.f32 %v2819_v52  ;;  %v7284_v52 = vld [vmem:[%s8241_s4 + $0x14] ss:$8 sps:$4 sm:$0xff]  }
 0x2fa   :  { %v2833_v40 = vadd.f32 %v7550_v38, %v7548_v37  ;;  %v7552_v41 = vpop.eup %7551  ;;  %7571 = vpow2.f32 %v2822_v49  ;;  %v7285_v49 = vld [vmem:[%s8241_s4 + $0x20] ss:$8 sps:$4 sm:$0xff]  }
 0x2fb   :  { %v7554_v44 = vpop.eup %7553  ;;  %7573 = vpow2.f32 %v2825_v30  ;;  %v7291_v30 = vld [vmem:[#allocation8 + $0x40] sm:$0xff]  }
 0x2fc   :  { %v2834_v43 = vadd.f32 %v7552_v41, %v2833_v40  ;;  %v7556_v47 = vpop.eup %7555  ;;  %7575 = vpow2.f32 %v2828_v57  ;;  %v7297_v57 = vld [vmem:[#allocation8 + $0xc8] sm:$0xff]  }
 0x2fd   :  { %v7558_v48 = vpop.eup %7557  ;;  %7577 = vpow2.f32 %v2831_v60  ;;  %v7302_v60 = vld [vmem:[#allocation8 + $0x90] sm:$0xff]  }
 0x2fe   :  { %v2835_v45 = vadd.f32 %v7554_v44, %v2834_v43  ;;  %v7560_v51 = vpop.eup %7559 }
 0x2ff   :  { %v7562_v56 = vpop.eup %7561 }
 0x300   :  { %v2836_v53 = vadd.f32 %v7556_v47, %v2835_v45  ;;  %v7564_v59 = vpop.eup %7563  ;;  %v7281_v45 = vld [vmem:[%s8241_s4 + $0x4] ss:$8 sps:$4 sm:$0xff]  }
 0x301   :  { %v7566_v1 = vpop.eup %7565  ;;  %3101 = vmatprep.subr.bf16.mxu1 %v7281_v45 }
 0x302   :  { %v2837_v50 = vadd.f32 %v7558_v48, %v2836_v53  ;;  %v7568_v5 = vpop.eup %7567  ;;  %v7282_v53 = vld [vmem:[%s8241_s4 + $0x10] ss:$8 sps:$4 sm:$0xff]  }
 0x303   :  { %v7570_v21 = vpop.eup %7569 }
 0x304   :  { %v2838_v54 = vadd.f32 %v7560_v51, %v2837_v50  ;;  %v7572_v8 = vpop.eup %7571  ;;  %v7290_v50 = vld [vmem:[%s8241_s4 + $0x34] ss:$8 sps:$4 sm:$0xff]  }
 0x305   :  { %v7574_v9 = vpop.eup %7573 }
 0x306   :  { %v2839_v58 = vadd.f32 %v7562_v56, %v2838_v54  ;;  %v7576_v2 = vpop.eup %7575  ;;  %v7293_v54 = vld [vmem:[#allocation8 + $0xc0] sm:$0xff]  }
 0x307   :  { %v7578_v10 = vpop.eup %7577  ;;  %6925 = vmatprep.subr.bf16.mxu0 %v7293_v54 }
 0x308   :  { %v2840_v63 = vadd.f32 %v7564_v59, %v2839_v58  ;;  %v7298_v58 = vld [vmem:[#allocation8 + $0x88] sm:$0xff]  }
 0x30a   :  { %v2841_v3 = vadd.f32 %v7566_v1, %v2840_v63  ;;  %v7305_v63 = vld [vmem:[#allocation8 + $0xd8] sm:$0xff]  }
 0x30c   :  { %v2842_v6 = vadd.f32 %v7568_v5, %v2841_v3  ;;  %v7309_v3 = vld [vmem:[#allocation8 + $0xe0] sm:$0xff]  }
 0x30e   :  { %v2843_v7 = vadd.f32 %v7570_v21, %v2842_v6  ;;  %v7313_v6 = vld [vmem:[#allocation8 + $0xe8] sm:$0xff]  }
 0x310   :  { %v2844_v55 = vadd.f32 %v7572_v8, %v2843_v7  ;;  %v7317_v7 = vld [vmem:[#allocation8 + $0xf0] sm:$0xff]  }
 0x312   :  { %v2845_v61 = vadd.f32 %v7574_v9, %v2844_v55  ;;  %v7321_v55 = vld [vmem:[#allocation8 + $0xf8] sm:$0xff]  }
 0x314   :  { %v2846_v62 = vadd.f32 %v7576_v2, %v2845_v61 }
 0x316   :  { %v2847_v11 = vadd.f32 %v7578_v10, %v2846_v62 }
 0x318   :  { %7579 = vrcp.f32 %v2847_v11 }
 0x322   :  { %v7580_v13 = vpop.eup %7579 }
 0x323   :  { %v7991_v14 = vmul.f32 %v7580_v13, %v7554_v44  ;;  %v7993_v16 = vmul.f32 %v7580_v13, %v7550_v38  ;;  %v7995_v17 = vmul.f32 %v7580_v13, %v7552_v41  ;;  %v7997_v19 = vmul.f32 %v7580_v13, %v7548_v37 }
 0x324   :  { %v7999_v20 = vmul.f32 %v7580_v13, %v7556_v47  ;;  %v8001_v22 = vmul.f32 %v7580_v13, %v7558_v48  ;;  %v8003_v24 = vmul.f32 %v7580_v13, %v7560_v51  ;;  %v8005_v25 = vmul.f32 %v7580_v13, %v7562_v56  ;;  %v7279_v47 = vld [vmem:[%s8241_s4] ss:$8 sps:$4 sm:$0xff]   ;;  %v7287_v48 = vld [vmem:[%s8241_s4 + $0x24] ss:$8 sps:$4 sm:$0xff]   ;;  %v7288_v51 = vld [vmem:[%s8241_s4 + $0x30] ss:$8 sps:$4 sm:$0xff]  }
 0x325   :  { %v2884_v26 = vsel %vm2851_vm0, %v7991_v14, 0.0  ;;  %v2862_v28 = vsel %vm2851_vm0, %v7993_v16, 0.0  ;;  %v8011_v4 = vmul.f32 %v7580_v13, %v7564_v59  ;;  %v8013_v29 = vmul.f32 %v7580_v13, %v7566_v1  ;;  %3102 = vmatpush1.bf16.msra.mxu1 %v7279_v47  ;;  %v7294_v56 = vld [vmem:[#allocation8 + $0x80] sm:$0xff]   ;;  %v7301_v59 = vld [vmem:[#allocation8 + $0xd0] sm:$0xff]   ;;  %v7306_v1 = vld [vmem:[#allocation8 + $0x98] sm:$0xff]  }
 0x326   :  { %2885 = vadd.xlane.f32.xlu1 %v2884_v26  ;;  %2863 = vadd.xlane.f32.xlu0 %v2862_v28  ;;  %v8015_v15 = vmul.f32 %v7580_v13, %v7568_v5  ;;  %v8017_v18 = vmul.f32 %v7580_v13, %v7570_v21  ;;  %v8019_v23 = vmul.f32 %v7580_v13, %v7572_v8  ;;  %v2875_v33 = vsel %vm2851_vm0, %v7995_v17, 0.0  ;;  %v7310_v5 = vld [vmem:[#allocation8 + $0xa0] sm:$0xff]   ;;  %v7314_v21 = vld [vmem:[#allocation8 + $0xa8] sm:$0xff]   ;;  %v7318_v8 = vld [vmem:[#allocation8 + $0xb0] sm:$0xff]  }
 0x327   :  { %v8021_v27 = vmul.f32 %v7580_v13, %v7574_v9  ;;  %v8023_v31 = vmul.f32 %v7580_v13, %v7576_v2  ;;  %v8025_v32 = vmul.f32 %v7580_v13, %v7578_v10  ;;  %v2852_v34 = vsel %vm2851_vm0, %v7997_v19, 0.0  ;;  %3103 = vmatprep.subr.bf16.mxu1 %v7284_v52  ;;  %6926 = vmatpush3.bf16.msra.mxu0 %v7294_v56  ;;  %v7322_v9 = vld [vmem:[#allocation8 + $0xb8] sm:$0xff]  }
 0x328   :  { %v2896_v35 = vsel %vm2851_vm0, %v7999_v20, 0.0  ;;  %v2905_v36 = vsel %vm2851_vm0, %v8001_v22, 0.0  ;;  %v2917_v12 = vsel %vm2851_vm0, %v8003_v24, 0.0  ;;  %v2926_v37 = vsel %vm2851_vm0, %v8005_v25, 0.0  ;;  %6927 = vmatprep.subr.bf16.mxu0 %v7297_v57 }
 0x329   :  { %v2938_v38 = vsel %vm2851_vm0, %v8011_v4, 0.0  ;;  %v2947_v39 = vsel %vm2851_vm0, %v8013_v29, 0.0  ;;  %v2959_v40 = vsel %vm2851_vm0, %v8015_v15, 0.0  ;;  %v2968_v41 = vsel %vm2851_vm0, %v8017_v18, 0.0  ;;  %3104 = vmatpush1.bf16.msra.mxu1 %v7282_v53 }
 0x32a   :  { %2876 = vadd.xlane.f32.xlu1 %v2875_v33  ;;  %2853 = vadd.xlane.f32.xlu0 %v2852_v34  ;;  %v2980_v42 = vsel %vm2851_vm0, %v8019_v23, 0.0  ;;  %v2989_v43 = vsel %vm2851_vm0, %v8021_v27, 0.0  ;;  %v3001_v44 = vsel %vm2851_vm0, %v8023_v31, 0.0  ;;  %v3010_v46 = vsel %vm2851_vm0, %v8025_v32, 0.0 }
 0x32b   :  { %3105 = vmatprep.subr.bf16.mxu1 %v7287_v48  ;;  %6928 = vmatpush3.bf16.msra.mxu0 %v7298_v58 }
 0x32c   :  { %6929 = vmatprep.subr.bf16.mxu0 %v7301_v59 }
 0x32d   :  { %3106 = vmatpush1.bf16.msra.mxu1 %v7285_v49 }
 0x32e   :  { %2897 = vadd.xlane.f32.xlu1 %v2896_v35  ;;  %2906 = vadd.xlane.f32.xlu0 %v2905_v36 }
 0x32f   :  { %3107 = vmatprep.subr.bf16.mxu1 %v7290_v50  ;;  %6930 = vmatpush3.bf16.msra.mxu0 %v7302_v60 }
 0x330   :  { %6931 = vmatprep.subr.bf16.mxu0 %v7305_v63 }
 0x331   :  { %3108 = vmatpush1.bf16.msra.mxu1 %v7288_v51 }
 0x332   :  { %2918 = vadd.xlane.f32.xlu1 %v2917_v12  ;;  %2927 = vadd.xlane.f32.xlu0 %v2926_v37 }
 0x333   :  { %6903 = vmatprep.subr.bf16.mxu1 %v7291_v30  ;;  %6932 = vmatpush3.bf16.msra.mxu0 %v7306_v1 }
 0x334   :  { %6933 = vmatprep.subr.bf16.mxu0 %v7309_v3 }
 0x336   :  { %2939 = vadd.xlane.f32.xlu1 %v2938_v38  ;;  %2948 = vadd.xlane.f32.xlu0 %v2947_v39 }
 0x337   :  { %6934 = vmatpush3.bf16.msra.mxu0 %v7310_v5 }
 0x338   :  { %6935 = vmatprep.subr.bf16.mxu0 %v7313_v6 }
 0x33a   :  { %2960 = vadd.xlane.f32.xlu1 %v2959_v40  ;;  %2969 = vadd.xlane.f32.xlu0 %v2968_v41 }
 0x33b   :  { %6936 = vmatpush3.bf16.msra.mxu0 %v7314_v21 }
 0x33c   :  { %6937 = vmatprep.subr.bf16.mxu0 %v7317_v7 }
 0x33e   :  { %2981 = vadd.xlane.f32.xlu1 %v2980_v42  ;;  %2990 = vadd.xlane.f32.xlu0 %v2989_v43 }
 0x33f   :  { %6938 = vmatpush3.bf16.msra.mxu0 %v7318_v8 }
 0x340   :  { %6939 = vmatprep.subr.bf16.mxu0 %v7321_v55 }
 0x342   :  { %3002 = vadd.xlane.f32.xlu1 %v3001_v44  ;;  %3011 = vadd.xlane.f32.xlu0 %v3010_v46 }
 0x343   :  { %6940 = vmatpush3.bf16.msra.mxu0 %v7322_v9 }
 0x3b3   :  { %v2886_v61 = vpop.xlane.xlu1 %2885  ;;  %v2864_v2 = vpop.xlane.xlu0 %2863 }
 0x3b4   :  { %v2887_v62 = vadd.f32 1e-09, %v2886_v61  ;;  %v2865_v10 = vadd.f32 1e-09, %v2864_v2 }
 0x3b6   :  { %7581 = vrcp.f32 %v2887_v62 }
 0x3b7   :  { %7583 = vrcp.f32 %v2865_v10  ;;  %v2877_v11 = vpop.xlane.xlu1 %2876  ;;  %v2854_v13 = vpop.xlane.xlu0 %2853  ;;  %v7292_v10 = vld [vmem:[#allocation8] sm:$0xff]  }
 0x3b8   :  { %v2878_v26 = vadd.f32 1e-09, %v2877_v11  ;;  %v2855_v28 = vadd.f32 1e-09, %v2854_v13 }
 0x3ba   :  { %7585 = vrcp.f32 %v2878_v26 }
 0x3bb   :  { %7587 = vrcp.f32 %v2855_v28  ;;  %v2898_v33 = vpop.xlane.xlu1 %2897  ;;  %v2907_v34 = vpop.xlane.xlu0 %2906 }
 0x3bc   :  { %v2899_v35 = vadd.f32 1e-09, %v2898_v33  ;;  %v2908_v36 = vadd.f32 1e-09, %v2907_v34  ;;  %v7295_v33 = vld [vmem:[#allocation8 + $0x48] sm:$0xff]  }
 0x3be   :  { %7589 = vrcp.f32 %v2899_v35 }
 0x3bf   :  { %7591 = vrcp.f32 %v2908_v36  ;;  %v2919_v12 = vpop.xlane.xlu1 %2918  ;;  %v2928_v37 = vpop.xlane.xlu0 %2927 }
 0x3c0   :  { %v7582_v38 = vpop.eup %7581  ;;  %v2920_v39 = vadd.f32 1e-09, %v2919_v12  ;;  %v2929_v40 = vadd.f32 1e-09, %v2928_v37  ;;  %v7296_v37 = vld [vmem:[#allocation8 + $0x8] sm:$0xff]  }
 0x3c1   :  { %v7584_v41 = vpop.eup %7583  ;;  %v2889_v42 = vmul.f32 %v7582_v38, %v7991_v14 }
 0x3c2   :  { %v2867_v43 = vmul.f32 %v7584_v41, %v7993_v16  ;;  %7593 = vrcp.f32 %v2920_v39 }
 0x3c3   :  { %v2890_v44 = vpack.c.bf16 %v2889_v42, %v2889_v42  ;;  %7595 = vrcp.f32 %v2929_v40  ;;  %v2940_v46 = vpop.xlane.xlu1 %2939  ;;  %v2949_v45 = vpop.xlane.xlu0 %2948  ;;  %v7299_v40 = vld [vmem:[#allocation8 + $0x50] sm:$0xff]  }
 0x3c4   :  { %v7586_v47 = vpop.eup %7585  ;;  %v2868_v52 = vpack.c.bf16 %v2867_v43, %v2867_v43  ;;  %v2941_v53 = vadd.f32 1e-09, %v2940_v46  ;;  %v2950_v48 = vadd.f32 1e-09, %v2949_v45 }
 0x3c5   :  { %v7588_v49 = vpop.eup %7587  ;;  %v2892_v50 = vrot.slane %v2890_v44, 4  ;;  %v2880_v51 = vmul.f32 %v7586_v47, %v7995_v17  ;;  %v7300_v44 = vld [vmem:[#allocation8 + $0x10] sm:$0xff]   ;;  %v7303_v47 = vld [vmem:[#allocation8 + $0x58] sm:$0xff]  }
 0x3c6   :  { %v2870_v30 = vrot.slane %v2868_v52, 4  ;;  %v2857_v14 = vmul.f32 %v7588_v49, %v7997_v19  ;;  %7597 = vrcp.f32 %v2941_v53 }
 0x3c7   :  { %2894 = vst.msk [vmem:[#allocation3 + $0x8] sm:$0xf0] %vm2872_vm1, %v2892_v50  ;;  %v2881_v16 = vpack.c.bf16 %v2880_v51, %v2880_v51  ;;  %7599 = vrcp.f32 %v2950_v48  ;;  %v2961_v54 = vpop.xlane.xlu1 %2960  ;;  %v2970_v56 = vpop.xlane.xlu0 %2969  ;;  %v7304_v50 = vld [vmem:[#allocation8 + $0x18] sm:$0xff]  }
 0x3c8   :  { %v7590_v57 = vpop.eup %7589  ;;  %2873 = vst.msk [vmem:[#allocation3] sm:$0xf0] %vm2872_vm1, %v2870_v30  ;;  %v2858_v58 = vpack.c.bf16 %v2857_v14, %v2857_v14  ;;  %v2962_v59 = vadd.f32 1e-09, %v2961_v54  ;;  %v2971_v60 = vadd.f32 1e-09, %v2970_v56 }
 0x3c9   :  { %v7592_v63 = vpop.eup %7591  ;;  %2882 = vst.msk [vmem:[#allocation3 + $0x8] sm:$0xf] %vm2859_vm2, %v2881_v16  ;;  %v2901_v17 = vmul.f32 %v7590_v57, %v7999_v20  ;;  %v7307_v14 = vld [vmem:[#allocation8 + $0x60] sm:$0xff]  }
 0x3ca   :  { %2860 = vst.msk [vmem:[#allocation3] sm:$0xf] %vm2859_vm2, %v2858_v58  ;;  %v2910_v19 = vmul.f32 %v7592_v63, %v8001_v22  ;;  %7601 = vrcp.f32 %v2962_v59  ;;  %v7308_v57 = vld [vmem:[#allocation8 + $0x20] sm:$0xff]   ;;  %v7311_v59 = vld [vmem:[#allocation8 + $0x68] sm:$0xff]  }
 0x3cb   :  { %v2902_v1 = vpack.c.bf16 %v2901_v17, %v2901_v17  ;;  %7603 = vrcp.f32 %v2971_v60  ;;  %v2982_v3 = vpop.xlane.xlu1 %2981  ;;  %v2991_v5 = vpop.xlane.xlu0 %2990  ;;  %v7316_v17 = vld [vmem:[#allocation8 + $0x30] sm:$0xff]  }
 0x3cc   :  { %v7594_v6 = vpop.eup %7593  ;;  %v2911_v21 = vpack.c.bf16 %v2910_v19, %v2910_v19  ;;  %v2983_v7 = vadd.f32 1e-09, %v2982_v3  ;;  %v2992_v8 = vadd.f32 1e-09, %v2991_v5  ;;  %v7319_v19 = vld [vmem:[#allocation8 + $0x78] sm:$0xff]  }
 0x3cd   :  { %v7596_v55 = vpop.eup %7595  ;;  %2903 = vst.msk [vmem:[#allocation3 + $0x10] sm:$0xf] %vm2859_vm2, %v2902_v1  ;;  %v2922_v9 = vmul.f32 %v7594_v6, %v8003_v24  ;;  %v7320_v3 = vld [vmem:[#allocation8 + $0x38] sm:$0xff]  }
 0x3ce   :  { %v2913_v61 = vrot.slane %v2911_v21, 4  ;;  %v2931_v20 = vmul.f32 %v7596_v55, %v8005_v25  ;;  %7605 = vrcp.f32 %v2983_v7  ;;  %v7325_v55 = vld [vmem:[#allocation8 + $0x1c0] sm:$0xff]  }
 0x3cf   :  { %v2923_v2 = vpack.c.bf16 %v2922_v9, %v2922_v9  ;;  %7607 = vrcp.f32 %v2992_v8  ;;  %v3003_v22 = vpop.xlane.xlu1 %3002  ;;  %v3012_v62 = vpop.xlane.xlu0 %3011  ;;  %v7323_v8 = vld [vmem:[#allocation8 + $0x140] sm:$0xff]   ;;  %6969 = vmatprep.subr.bf16.mxu0 %v7325_v55 }
 0x3d0   :  { %v7598_v11 = vpop.eup %7597  ;;  %2915 = vst.msk [vmem:[#allocation3 + $0x10] sm:$0xf0] %vm2872_vm1, %v2913_v61  ;;  %v2932_v13 = vpack.c.bf16 %v2931_v20, %v2931_v20  ;;  %v3004_v26 = vadd.f32 1e-09, %v3003_v22  ;;  %v3013_v28 = vadd.f32 1e-09, %v3012_v62 }
 0x3d1   :  { %v7600_v34 = vpop.eup %7599  ;;  %2924 = vst.msk [vmem:[#allocation3 + $0x18] sm:$0xf] %vm2859_vm2, %v2923_v2  ;;  %v2943_v24 = vmul.f32 %v7598_v11, %v8011_v4  ;;  %v3021_v35 = vld [vmem:[#allocation3] sm:$0xff]  ;;  %v3022_v48 = vld [vmem:[#allocation3 + $0x8] sm:$0xff] }
 0x3d2   :  { %v2934_v25 = vrot.slane %v2932_v13, 4  ;;  %v2952_v36 = vmul.f32 %v7600_v34, %v8013_v29  ;;  %7609 = vrcp.f32 %v3004_v26  ;;  %6478 = vmatmul.mubr.msk.bf16.vlgmr.msra.gmra.mrb[32].mxu1 %vm2851_vm0, %v3021_v35  ;;  %v7324_v22 = vld [vmem:[#allocation8 + $0x100] sm:$0xff]   ;;  %v7327_v11 = vld [vmem:[#allocation8 + $0x148] sm:$0xff]   ;;  %v7331_v34 = vld [vmem:[#allocation8 + $0x150] sm:$0xff]  }
 0x3d3   :  { %v2944_v12 = vpack.c.bf16 %v2943_v24, %v2943_v24  ;;  %7611 = vrcp.f32 %v3013_v28  ;;  %3143 = vmatprep.mubr.bf16.mxu1 %v7693_v0  ;;  %6904 = vmatpush3.bf16.msra.mxu1 %v7292_v10  ;;  %v7326_v26 = vld [vmem:[#allocation8 + $0x180] sm:$0xff]   ;;  %v7330_v35 = vld [vmem:[#allocation8 + $0x188] sm:$0xff]  }
 0x3d4   :  { %v7602_v38 = vpop.eup %7601  ;;  %2936 = vst.msk [vmem:[#allocation3 + $0x18] sm:$0xf0] %vm2872_vm1, %v2934_v25  ;;  %v2953_v39 = vpack.c.bf16 %v2952_v36, %v2952_v36  ;;  %6905 = vmatprep.subr.bf16.mxu1 %v7295_v33  ;;  %v7328_v33 = vld [vmem:[#allocation8 + $0x108] sm:$0xff]   ;;  %v7333_v36 = vld [vmem:[#allocation8 + $0x1d0] sm:$0xff]  }
 0x3d5   :  { %v7604_v4 = vpop.eup %7603  ;;  %2945 = vst.msk [vmem:[#allocation3 + $0x20] sm:$0xf] %vm2859_vm2, %v2944_v12  ;;  %v2964_v29 = vmul.f32 %v7602_v38, %v8015_v15  ;;  %v7332_v38 = vld [vmem:[#allocation8 + $0x110] sm:$0xff]  }
 0x3d6   :  { %v2955_v41 = vrot.slane %v2953_v39, 4  ;;  %v2973_v42 = vmul.f32 %v7604_v4, %v8017_v18 }
 0x3d7   :  { %v2965_v43 = vpack.c.bf16 %v2964_v29, %v2964_v29  ;;  %6906 = vmatpush3.bf16.msra.mxu1 %v7296_v37  ;;  %v3023_v60 = vld [vmem:[#allocation3 + $0x10] sm:$0xff] }
 0x3d8   :  { %v7606_v46 = vpop.eup %7605  ;;  %2957 = vst.msk [vmem:[#allocation3 + $0x20] sm:$0xf0] %vm2872_vm1, %v2955_v41  ;;  %v2974_v45 = vpack.c.bf16 %v2973_v42, %v2973_v42  ;;  %6907 = vmatprep.subr.bf16.mxu1 %v7299_v40  ;;  %v7335_v40 = vld [vmem:[#allocation8 + $0x158] sm:$0xff]   ;;  %v7334_v29 = vld [vmem:[#allocation8 + $0x190] sm:$0xff]  }
 0x3d9   :  { %v7608_v52 = vpop.eup %7607  ;;  %2966 = vst.msk [vmem:[#allocation3 + $0x28] sm:$0xf] %vm2859_vm2, %v2965_v43  ;;  %v2985_v53 = vmul.f32 %v7606_v46, %v8019_v23  ;;  %v7337_v41 = vld [vmem:[#allocation8 + $0x1d8] sm:$0xff]   ;;  %v7339_v43 = vld [vmem:[#allocation8 + $0x160] sm:$0xff]  }
 0x3da   :  { %v2976_v49 = vrot.slane %v2974_v45, 4  ;;  %v2994_v15 = vmul.f32 %v7608_v52, %v8021_v27  ;;  %6479 = vmatmul.mubr.msk.bf16.gmra.mrb[36].mxu1 %vm2851_vm0, %v3022_v48  ;;  %v7336_v42 = vld [vmem:[#allocation8 + $0x118] sm:$0xff]  }
 0x3db   :  { %v2986_v18 = vpack.c.bf16 %v2985_v53, %v2985_v53  ;;  %3153 = vmatprep.mubr.bf16.mxu1 %v7693_v0  ;;  %6908 = vmatpush3.bf16.msra.mxu1 %v7300_v44  ;;  %v3024_v1 = vld [vmem:[#allocation3 + $0x18] sm:$0xff]  ;;  %v7340_v53 = vld [vmem:[#allocation8 + $0x120] sm:$0xff]  }
 0x3dc   :  { %v7610_v51 = vpop.eup %7609  ;;  %2978 = vst.msk [vmem:[#allocation3 + $0x28] sm:$0xf0] %vm2872_vm1, %v2976_v49  ;;  %v2995_v30 = vpack.c.bf16 %v2994_v15, %v2994_v15  ;;  %6909 = vmatprep.subr.bf16.mxu1 %v7303_v47  ;;  %v7338_v46 = vld [vmem:[#allocation8 + $0x198] sm:$0xff]   ;;  %v7341_v47 = vld [vmem:[#allocation8 + $0x1e0] sm:$0xff]   ;;  %v7343_v49 = vld [vmem:[#allocation8 + $0x168] sm:$0xff]  }
 0x3dd   :  { %v7612_v16 = vpop.eup %7611  ;;  %2987 = vst.msk [vmem:[#allocation3 + $0x30] sm:$0xf] %vm2859_vm2, %v2986_v18  ;;  %v3006_v23 = vmul.f32 %v7610_v51, %v8023_v31  ;;  %v7312_v31 = vld [vmem:[#allocation8 + $0x28] sm:$0xff]   ;;  %v7342_v15 = vld [vmem:[#allocation8 + $0x1a0] sm:$0xff]   ;;  %v7347_v51 = vld [vmem:[#allocation8 + $0x170] sm:$0xff]  }
 0x3de   :  { %v2997_v54 = vrot.slane %v2995_v30, 4  ;;  %v3015_v27 = vmul.f32 %v7612_v16, %v8025_v32  ;;  %v7315_v32 = vld [vmem:[#allocation8 + $0x70] sm:$0xff]   ;;  %v7345_v18 = vld [vmem:[#allocation8 + $0x1e8] sm:$0xff]  }
 0x3df   :  { %v3007_v56 = vpack.c.bf16 %v3006_v23, %v3006_v23  ;;  %6910 = vmatpush3.bf16.msra.mxu1 %v7304_v50  ;;  %v3025_v5 = vld [vmem:[#allocation3 + $0x20] sm:$0xff]  ;;  %v7344_v50 = vld [vmem:[#allocation8 + $0x128] sm:$0xff]   ;;  %v7349_v23 = vld [vmem:[#allocation8 + $0x1f0] sm:$0xff]  }
 0x3e0   :  { %2999 = vst.msk [vmem:[#allocation3 + $0x30] sm:$0xf0] %vm2872_vm1, %v2997_v54  ;;  %v3016_v58 = vpack.c.bf16 %v3015_v27, %v3015_v27  ;;  %6911 = vmatprep.subr.bf16.mxu1 %v7307_v14  ;;  %v7346_v14 = vld [vmem:[#allocation8 + $0x1a8] sm:$0xff]   ;;  %v7348_v27 = vld [vmem:[#allocation8 + $0x130] sm:$0xff]  }
 0x3e1   :  { %3008 = vst.msk [vmem:[#allocation3 + $0x38] sm:$0xf] %vm2859_vm2, %v3007_v56 }
 0x3e2   :  { %v3018_v63 = vrot.slane %v3016_v58, 4  ;;  %6480 = vmatmul.mubr.msk.bf16.gmra.mrb[40].mxu1 %vm2851_vm0, %v3023_v60  ;;  %v7350_v58 = vld [vmem:[#allocation8 + $0x1b0] sm:$0xff]   ;;  %v7352_v60 = vld [vmem:[#allocation8 + $0x138] sm:$0xff]  }
 0x3e3   :  { %3163 = vmatprep.mubr.bf16.mxu1 %v7693_v0  ;;  %6912 = vmatpush3.bf16.msra.mxu1 %v7308_v57  ;;  %v3026_v6 = vld [vmem:[#allocation3 + $0x28] sm:$0xff]  ;;  %v7351_v57 = vld [vmem:[#allocation8 + $0x178] sm:$0xff]  }
 0x3e4   :  { %3020 = vst.msk [vmem:[#allocation3 + $0x38] sm:$0xf0] %vm2872_vm1, %v3018_v63  ;;  %6913 = vmatprep.subr.bf16.mxu1 %v7311_v59  ;;  %v7353_v59 = vld [vmem:[#allocation8 + $0x1f8] sm:$0xff]   ;;  %v7355_v63 = vld [vmem:[#allocation8 + $0x240] sm:$0xff]  }
 0x3e7   :  { %6914 = vmatpush3.bf16.msra.mxu1 %v7312_v31  ;;  %v3027_v21 = vld [vmem:[#allocation3 + $0x30] sm:$0xff] }
 0x3e8   :  { %6915 = vmatprep.subr.bf16.mxu1 %v7315_v32  ;;  %v7354_v32 = vld [vmem:[#allocation8 + $0x1b8] sm:$0xff]  }
 0x3ea   :  { %6481 = vmatmul.mubr.msk.bf16.gmra.mrb[44].mxu1 %vm2851_vm0, %v3024_v1 }
 0x3eb   :  { %3173 = vmatprep.mubr.bf16.mxu1 %v7693_v0  ;;  %6916 = vmatpush3.bf16.msra.mxu1 %v7316_v17  ;;  %v3028_v7 = vld [vmem:[#allocation3 + $0x38] sm:$0xff] }
 0x3ec   :  { %6917 = vmatprep.subr.bf16.mxu1 %v7319_v19  ;;  %v7357_v19 = vld [vmem:[#allocation8 + $0x2c0] sm:$0xff]  }
 0x3ef   :  { %6918 = vmatpush3.bf16.msra.mxu1 %v7320_v3  ;;  %v7356_v3 = vld [vmem:[#allocation8 + $0x200] sm:$0xff]  }
 0x3f0   :  { %6947 = vmatprep.subr.bf16.mxu1 %v7323_v8  ;;  %v7358_v8 = vld [vmem:[#allocation8 + $0x280] sm:$0xff]  }
 0x3f2   :  { %6482 = vmatmul.mubr.msk.bf16.gmra.mrb[48].mxu1 %vm2851_vm0, %v3025_v5 }
 0x3f3   :  { %3183 = vmatprep.mubr.bf16.mxu1 %v7693_v0 }
 0x3fa   :  { %6483 = vmatmul.mubr.msk.bf16.gmra.mrb[52].mxu1 %vm2851_vm0, %v3026_v6 }
 0x3fb   :  { %3193 = vmatprep.mubr.bf16.mxu1 %v7693_v0 }
 0x402   :  { %6484 = vmatmul.mubr.msk.bf16.gmra.mrb[56].mxu1 %vm2851_vm0, %v3027_v21  ;;  %v7359_v21 = vld [vmem:[#allocation8 + $0x248] sm:$0xff]  }
 0x403   :  { %3203 = vmatprep.mubr.bf16.mxu1 %v7693_v0  ;;  %v7329_v0 = vld [vmem:[#allocation8 + $0x1c8] sm:$0xff]  }
 0x40a   :  { %6485 = vmatmul.mubr.msk.bf16.gmra.mrb[60].mxu1 %vm2851_vm0, %v3028_v7 }
 0x4a5   :  { %v3135_v9 = vpop.f32.mrb[32].mxu1 }
 0x4a6   :  { %v3137_v61 = vpop.f32.mrb[33].mxu1  ;;  %v6807_v62 = vpack.c.bf16 %v3135_v9, %v3135_v9  ;;  %v7361_v9 = vld [vmem:[#allocation8 + $0x2c8] sm:$0xff]  }
 0x4a7   :  { %v6808_v20 = vpack.c.bf16 %v3137_v61, %v3137_v61  ;;  %v3139_v2 = vpop.f32.mrb[34].mxu1 }
 0x4a8   :  { %v3141_v10 = vpop.f32.mrb[35].mxu1  ;;  %v6809_v28 = vpack.c.bf16 %v3139_v2, %v3139_v2  ;;  %v7363_v2 = vld [vmem:[#allocation8 + $0x250] sm:$0xff]  }
 0x4a9   :  { %v6810_v13 = vpack.c.bf16 %v3141_v10, %v3141_v10  ;;  %5573 = vmatprep.mubr.bf16.mxu1 %v6808_v20  ;;  %v7360_v20 = vld [vmem:[#allocation8 + $0x208] sm:$0xff]  }
 0x4aa   :  { %5574 = vmatmul.mubr.bf16.vlgmr.msra.gmra.mrb[64].mxu1 %v6807_v62  ;;  %v7362_v62 = vld [vmem:[#allocation8 + $0x288] sm:$0xff]  }
 0x4ab   :  { %6948 = vmatpush3.bf16.msra.mxu1 %v7324_v22  ;;  %5613 = vmatprep.mubr.bf16.mxu0 %v6810_v13 }
 0x4ac   :  { %5614 = vmatmul.mubr.bf16.vlgmr.msra.gmra.mrb[64].mxu0 %v6809_v28  ;;  %6949 = vmatprep.subr.bf16.mxu1 %v7327_v11  ;;  %v7365_v11 = vld [vmem:[#allocation8 + $0x2d0] sm:$0xff]  }
 0x4ad   :  { %6970 = vmatpush3.bf16.msra.mxu0 %v7326_v26  ;;  %v8126_v24 = vpop.f32.mrb[36].mxu1  ;;  %v7364_v26 = vld [vmem:[#allocation8 + $0x210] sm:$0xff]  }
 0x4ae   :  { %v3147_v25 = vpop.f32.mrb[37].mxu1  ;;  %6971 = vmatprep.subr.bf16.mxu0 %v7329_v0  ;;  %v6811_v5 = vpack.c.bf16 %v8126_v24, %v8126_v24  ;;  %v7367_v0 = vld [vmem:[#allocation8 + $0x258] sm:$0xff]  }
 0x4af   :  { %v6812_v12 = vpack.c.bf16 %v3147_v25, %v3147_v25  ;;  %6950 = vmatpush3.bf16.msra.mxu1 %v7328_v33  ;;  %v8128_v37 = vpop.f32.mrb[38].mxu1  ;;  %v7366_v33 = vld [vmem:[#allocation8 + $0x290] sm:$0xff]   ;;  %v7368_v24 = vld [vmem:[#allocation8 + $0x218] sm:$0xff]  }
 0x4b0   :  { %v3151_v39 = vpop.f32.mrb[39].mxu1  ;;  %6951 = vmatprep.subr.bf16.mxu1 %v7331_v34  ;;  %v6813_v55 = vpack.c.bf16 %v8128_v37, %v8128_v37  ;;  %v7369_v34 = vld [vmem:[#allocation8 + $0x2d8] sm:$0xff]   ;;  %v7373_v37 = vld [vmem:[#allocation8 + $0x2e0] sm:$0xff]  }
 0x4b1   :  { %v6814_v4 = vpack.c.bf16 %v3151_v39, %v3151_v39  ;;  %6972 = vmatpush3.bf16.msra.mxu0 %v7330_v35  ;;  %5653 = vmatprep.mubr.bf16.mxu1 %v6812_v12  ;;  %v7371_v35 = vld [vmem:[#allocation8 + $0x260] sm:$0xff]  }
 0x4b2   :  { %6973 = vmatprep.subr.bf16.mxu0 %v7333_v36  ;;  %v7370_v36 = vld [vmem:[#allocation8 + $0x298] sm:$0xff]   ;;  %v7372_v39 = vld [vmem:[#allocation8 + $0x220] sm:$0xff]  }
 0x4b3   :  { %6952 = vmatpush3.bf16.msra.mxu1 %v7332_v38  ;;  %5693 = vmatprep.mubr.bf16.mxu0 %v6814_v4  ;;  %v7375_v4 = vld [vmem:[#allocation8 + $0x268] sm:$0xff]  }
 0x4b4   :  { %6953 = vmatprep.subr.bf16.mxu1 %v7335_v40 }
 0x4b5   :  { %6974 = vmatpush3.bf16.msra.mxu0 %v7334_v29  ;;  %v8130_v44 = vpop.f32.mrb[40].mxu1  ;;  %v7374_v29 = vld [vmem:[#allocation8 + $0x2a0] sm:$0xff]  }
 0x4b6   :  { %v3157_v45 = vpop.f32.mrb[41].mxu1  ;;  %6975 = vmatprep.subr.bf16.mxu0 %v7337_v41  ;;  %v7377_v41 = vld [vmem:[#allocation8 + $0x2e8] sm:$0xff]  }
 0x4b7   :  { %6954 = vmatpush3.bf16.msra.mxu1 %v7336_v42  ;;  %v8132_v52 = vpop.f32.mrb[42].mxu1  ;;  %v6816_v7 = vpack.c.bf16 %v3157_v45, %v3157_v45  ;;  %v7376_v42 = vld [vmem:[#allocation8 + $0x228] sm:$0xff]  }
 0x4b8   :  { %v3161_v48 = vpop.f32.mrb[43].mxu1  ;;  %6955 = vmatprep.subr.bf16.mxu1 %v7339_v43  ;;  %v7379_v43 = vld [vmem:[#allocation8 + $0x270] sm:$0xff]   ;;  %v7378_v45 = vld [vmem:[#allocation8 + $0x2a8] sm:$0xff]  }
 0x4b9   :  { %6976 = vmatpush3.bf16.msra.mxu0 %v7338_v46  ;;  %v6818_v61 = vpack.c.bf16 %v3161_v48, %v3161_v48 }
 0x4ba   :  { %6977 = vmatprep.subr.bf16.mxu0 %v7341_v47 }
 0x4bb   :  { %6956 = vmatpush3.bf16.msra.mxu1 %v7340_v53  ;;  %v7381_v53 = vld [vmem:[#allocation8 + $0x2f0] sm:$0xff]  }
 0x4bc   :  { %6957 = vmatprep.subr.bf16.mxu1 %v7343_v49  ;;  %v7380_v49 = vld [vmem:[#allocation8 + $0x230] sm:$0xff]  }
 0x4bd   :  { %6978 = vmatpush3.bf16.msra.mxu0 %v7342_v15  ;;  %v8134_v30 = vpop.f32.mrb[44].mxu1 }
 0x4be   :  { %v8136_v16 = vpop.f32.mrb[45].mxu1  ;;  %6979 = vmatprep.subr.bf16.mxu0 %v7345_v18  ;;  %v7383_v18 = vld [vmem:[#allocation8 + $0x278] sm:$0xff]  }
 0x4bf   :  { %6958 = vmatpush3.bf16.msra.mxu1 %v7344_v50  ;;  %v8138_v54 = vpop.f32.mrb[46].mxu1  ;;  %v7382_v50 = vld [vmem:[#allocation8 + $0x2b0] sm:$0xff]  }
 0x4c0   :  { %v8140_v56 = vpop.f32.mrb[47].mxu1  ;;  %6959 = vmatprep.subr.bf16.mxu1 %v7347_v51  ;;  %v7385_v51 = vld [vmem:[#allocation8 + $0x2f8] sm:$0xff]  }
 0x4c1   :  { %6980 = vmatpush3.bf16.msra.mxu0 %v7346_v14  ;;  %v7384_v14 = vld [vmem:[#allocation8 + $0x238] sm:$0xff]  }
 0x4c2   :  { %6981 = vmatprep.subr.bf16.mxu0 %v7349_v23  ;;  %v7387_v23 = vld [vmem:[#allocation8 + $0x340] sm:$0xff]  }
 0x4c3   :  { %6960 = vmatpush3.bf16.msra.mxu1 %v7348_v27  ;;  %v7386_v27 = vld [vmem:[#allocation8 + $0x2b8] sm:$0xff]  }
 0x4c4   :  { %6961 = vmatprep.subr.bf16.mxu1 %v7351_v57  ;;  %v7389_v57 = vld [vmem:[#allocation8 + $0x3c0] sm:$0xff]  }
 0x4c5   :  { %6982 = vmatpush3.bf16.msra.mxu0 %v7350_v58  ;;  %v8142_v31 = vpop.f32.mrb[48].mxu1  ;;  %v7388_v58 = vld [vmem:[#allocation8 + $0x300] sm:$0xff]  }
 0x4c6   :  { %v8144_v17 = vpop.f32.mrb[49].mxu1  ;;  %6983 = vmatprep.subr.bf16.mxu0 %v7353_v59  ;;  %v6815_v59 = vpack.c.bf16 %v8130_v44, %v8130_v44  ;;  %v7395_v44 = vld [vmem:[#allocation8 + $0x350] sm:$0xff]  }
 0x4c7   :  { %6962 = vmatpush3.bf16.msra.mxu1 %v7352_v60  ;;  %v8146_v1 = vpop.f32.mrb[50].mxu1  ;;  %v7391_v60 = vld [vmem:[#allocation8 + $0x348] sm:$0xff]  }
 0x4c8   :  { %v8150_v6 = vpop.f32.mrb[51].mxu1  ;;  %6991 = vmatprep.subr.bf16.mxu1 %v7355_v63  ;;  %v6820_v63 = vpack.c.bf16 %v8136_v16, %v8136_v16  ;;  %v7394_v16 = vld [vmem:[#allocation8 + $0x388] sm:$0xff]  }
 0x4c9   :  { %6984 = vmatpush3.bf16.msra.mxu0 %v7354_v32  ;;  %v7390_v32 = vld [vmem:[#allocation8 + $0x380] sm:$0xff]  }
 0x4ca   :  { %5654 = vmatmul.mubr.bf16.vlgmr.msra.gmra.mrb[68].mxu1 %v6811_v5  ;;  %7013 = vmatprep.subr.bf16.mxu0 %v7357_v19  ;;  %v6817_v19 = vpack.c.bf16 %v8132_v52, %v8132_v52  ;;  %v6822_v5 = vpack.c.bf16 %v8140_v56, %v8140_v56  ;;  %v7399_v52 = vld [vmem:[#allocation8 + $0x358] sm:$0xff]  }
 0x4cb   :  { %6992 = vmatpush3.bf16.msra.mxu1 %v7356_v3  ;;  %5733 = vmatprep.mubr.bf16.mxu1 %v6816_v7  ;;  %v7393_v3 = vld [vmem:[#allocation8 + $0x3c8] sm:$0xff]   ;;  %v7397_v7 = vld [vmem:[#allocation8 + $0x3d0] sm:$0xff]   ;;  %v7400_v56 = vld [vmem:[#allocation8 + $0x318] sm:$0xff]  }
 0x4cc   :  { %5694 = vmatmul.mubr.bf16.vlgmr.msra.gmra.mrb[68].mxu0 %v6813_v55  ;;  %6993 = vmatprep.subr.bf16.mxu1 %v7359_v21  ;;  %v7392_v21 = vld [vmem:[#allocation8 + $0x308] sm:$0xff]   ;;  %v7398_v55 = vld [vmem:[#allocation8 + $0x390] sm:$0xff]  }
 0x4cd   :  { %7014 = vmatpush3.bf16.msra.mxu0 %v7358_v8  ;;  %5773 = vmatprep.mubr.bf16.mxu0 %v6818_v61  ;;  %v8154_v22 = vpop.f32.mrb[52].mxu1  ;;  %v7396_v8 = vld [vmem:[#allocation8 + $0x310] sm:$0xff]   ;;  %v7403_v61 = vld [vmem:[#allocation8 + $0x360] sm:$0xff]  }
 0x4ce   :  { %v8156_v10 = vpop.f32.mrb[53].mxu1  ;;  %7015 = vmatprep.subr.bf16.mxu0 %v7361_v9  ;;  %v7401_v9 = vld [vmem:[#allocation8 + $0x3d8] sm:$0xff]  }
 0x4cf   :  { %6994 = vmatpush3.bf16.msra.mxu1 %v7360_v20  ;;  %v8158_v13 = vpop.f32.mrb[54].mxu1  ;;  %v7402_v20 = vld [vmem:[#allocation8 + $0x398] sm:$0xff]  }
 0x4d0   :  { %v8160_v28 = vpop.f32.mrb[55].mxu1  ;;  %6995 = vmatprep.subr.bf16.mxu1 %v7363_v2  ;;  %v7405_v2 = vld [vmem:[#allocation8 + $0x3e0] sm:$0xff]  }
 0x4d1   :  { %7016 = vmatpush3.bf16.msra.mxu0 %v7362_v62  ;;  %v7404_v62 = vld [vmem:[#allocation8 + $0x320] sm:$0xff]  }
 0x4d2   :  { %7017 = vmatprep.subr.bf16.mxu0 %v7365_v11  ;;  %v7407_v11 = vld [vmem:[#allocation8 + $0x368] sm:$0xff]  }
 0x4d3   :  { %6996 = vmatpush3.bf16.msra.mxu1 %v7364_v26  ;;  %v7406_v26 = vld [vmem:[#allocation8 + $0x3a0] sm:$0xff]  }
 0x4d4   :  { %6997 = vmatprep.subr.bf16.mxu1 %v7367_v0  ;;  %v7409_v0 = vld [vmem:[#allocation8 + $0x3e8] sm:$0xff]  }
 0x4d5   :  { %7018 = vmatpush3.bf16.msra.mxu0 %v7366_v33  ;;  %v8162_v25 = vpop.f32.mrb[56].mxu1  ;;  %v7408_v33 = vld [vmem:[#allocation8 + $0x328] sm:$0xff]  }
 0x4d6   :  { %v8164_v12 = vpop.f32.mrb[57].mxu1  ;;  %7019 = vmatprep.subr.bf16.mxu0 %v7369_v34  ;;  %v7411_v34 = vld [vmem:[#allocation8 + $0x370] sm:$0xff]  }
 0x4d7   :  { %6998 = vmatpush3.bf16.msra.mxu1 %v7368_v24  ;;  %v8166_v38 = vpop.f32.mrb[58].mxu1  ;;  %v7410_v24 = vld [vmem:[#allocation8 + $0x3a8] sm:$0xff]  }
 0x4d8   :  { %v8168_v40 = vpop.f32.mrb[59].mxu1  ;;  %6999 = vmatprep.subr.bf16.mxu1 %v7371_v35  ;;  %v7413_v35 = vld [vmem:[#allocation8 + $0x3f0] sm:$0xff]  }
 0x4d9   :  { %7020 = vmatpush3.bf16.msra.mxu0 %v7370_v36  ;;  %v7412_v36 = vld [vmem:[#allocation8 + $0x330] sm:$0xff]  }
 0x4da   :  { %7021 = vmatprep.subr.bf16.mxu0 %v7373_v37  ;;  %v7415_v37 = vld [vmem:[#allocation8 + $0x378] sm:$0xff]  }
 0x4db   :  { %7000 = vmatpush3.bf16.msra.mxu1 %v7372_v39  ;;  %v7414_v39 = vld [vmem:[#allocation8 + $0x3b0] sm:$0xff]  }
 0x4dc   :  { %7001 = vmatprep.subr.bf16.mxu1 %v7375_v4  ;;  %v7417_v4 = vld [vmem:[#allocation8 + $0x3f8] sm:$0xff]  }
 0x4dd   :  { %7022 = vmatpush3.bf16.msra.mxu0 %v7374_v29  ;;  %v8170_v46 = vpop.f32.mrb[60].mxu1  ;;  %v7416_v29 = vld [vmem:[#allocation8 + $0x338] sm:$0xff]  }
 0x4de   :  { %v8172_v47 = vpop.f32.mrb[61].mxu1  ;;  %7023 = vmatprep.subr.bf16.mxu0 %v7377_v41  ;;  %v7419_v41 = vld [vmem:[#allocation8 + $0x440] sm:$0xff]  }
 0x4df   :  { %7002 = vmatpush3.bf16.msra.mxu1 %v7376_v42  ;;  %v8174_v48 = vpop.f32.mrb[62].mxu1  ;;  %v7418_v42 = vld [vmem:[#allocation8 + $0x3b8] sm:$0xff]  }
 0x4e0   :  { %v8176_v15 = vpop.f32.mrb[63].mxu1  ;;  %7003 = vmatprep.subr.bf16.mxu1 %v7379_v43  ;;  %v7421_v43 = vld [vmem:[#allocation8 + $0x4c0] sm:$0xff]  }
 0x4e1   :  { %7024 = vmatpush3.bf16.msra.mxu0 %v7378_v45  ;;  %v7420_v45 = vld [vmem:[#allocation8 + $0x400] sm:$0xff]  }
 0x4e2   :  { %7025 = vmatprep.subr.bf16.mxu0 %v7381_v53  ;;  %v6819_v53 = vpack.c.bf16 %v8134_v30, %v8134_v30  ;;  %v7427_v30 = vld [vmem:[#allocation8 + $0x450] sm:$0xff]  }
 0x4e3   :  { %7004 = vmatpush3.bf16.msra.mxu1 %v7380_v49  ;;  %v7423_v49 = vld [vmem:[#allocation8 + $0x448] sm:$0xff]  }
 0x4e4   :  { %7005 = vmatprep.subr.bf16.mxu1 %v7383_v18  ;;  %v6824_v18 = vpack.c.bf16 %v8144_v17, %v8144_v17  ;;  %v7426_v17 = vld [vmem:[#allocation8 + $0x488] sm:$0xff]  }
 0x4e5   :  { %7026 = vmatpush3.bf16.msra.mxu0 %v7382_v50  ;;  %v7422_v50 = vld [vmem:[#allocation8 + $0x480] sm:$0xff]  }
 0x4e6   :  { %7027 = vmatprep.subr.bf16.mxu0 %v7385_v51  ;;  %v6821_v51 = vpack.c.bf16 %v8138_v54, %v8138_v54  ;;  %v7431_v54 = vld [vmem:[#allocation8 + $0x458] sm:$0xff]  }
 0x4e7   :  { %7006 = vmatpush3.bf16.msra.mxu1 %v7384_v14  ;;  %v7425_v14 = vld [vmem:[#allocation8 + $0x4c8] sm:$0xff]  }
 0x4e8   :  { %7035 = vmatprep.subr.bf16.mxu1 %v7387_v23  ;;  %v6826_v23 = vpack.c.bf16 %v8150_v6, %v8150_v6  ;;  %v7432_v6 = vld [vmem:[#allocation8 + $0x418] sm:$0xff]  }
 0x4e9   :  { %7028 = vmatpush3.bf16.msra.mxu0 %v7386_v27  ;;  %v7424_v27 = vld [vmem:[#allocation8 + $0x408] sm:$0xff]  }
 0x4ea   :  { %5734 = vmatmul.mubr.bf16.vlgmr.msra.gmra.mrb[72].mxu1 %v6815_v59  ;;  %7057 = vmatprep.subr.bf16.mxu0 %v7389_v57  ;;  %v7429_v57 = vld [vmem:[#allocation8 + $0x4d0] sm:$0xff]  }
 0x4eb   :  { %7036 = vmatpush3.bf16.msra.mxu1 %v7388_v58  ;;  %5813 = vmatprep.mubr.bf16.mxu1 %v6820_v63  ;;  %v7428_v58 = vld [vmem:[#allocation8 + $0x410] sm:$0xff]   ;;  %v7435_v63 = vld [vmem:[#allocation8 + $0x460] sm:$0xff]  }
 0x4ec   :  { %5774 = vmatmul.mubr.bf16.vlgmr.msra.gmra.mrb[72].mxu0 %v6817_v19  ;;  %7037 = vmatprep.subr.bf16.mxu1 %v7391_v60  ;;  %v7430_v59 = vld [vmem:[#allocation8 + $0x490] sm:$0xff]   ;;  %v7433_v60 = vld [vmem:[#allocation8 + $0x4d8] sm:$0xff]   ;;  %v7437_v19 = vld [vmem:[#allocation8 + $0x4e0] sm:$0xff]  }
 0x4ed   :  { %7058 = vmatpush3.bf16.msra.mxu0 %v7390_v32  ;;  %5853 = vmatprep.mubr.bf16.mxu0 %v6822_v5  ;;  %v7434_v32 = vld [vmem:[#allocation8 + $0x498] sm:$0xff]   ;;  %v7439_v5 = vld [vmem:[#allocation8 + $0x468] sm:$0xff]  }
 0x4ee   :  { %7059 = vmatprep.subr.bf16.mxu0 %v7393_v3  ;;  %v7436_v3 = vld [vmem:[#allocation8 + $0x420] sm:$0xff]  }
 0x4ef   :  { %7038 = vmatpush3.bf16.msra.mxu1 %v7392_v21  ;;  %v7438_v21 = vld [vmem:[#allocation8 + $0x4a0] sm:$0xff]  }
 0x4f0   :  { %7039 = vmatprep.subr.bf16.mxu1 %v7395_v44  ;;  %v7441_v44 = vld [vmem:[#allocation8 + $0x4e8] sm:$0xff]  }
 0x4f1   :  { %7060 = vmatpush3.bf16.msra.mxu0 %v7394_v16  ;;  %v7440_v16 = vld [vmem:[#allocation8 + $0x428] sm:$0xff]  }
 0x4f2   :  { %7061 = vmatprep.subr.bf16.mxu0 %v7397_v7  ;;  %v7443_v7 = vld [vmem:[#allocation8 + $0x470] sm:$0xff]  }
 0x4f3   :  { %7040 = vmatpush3.bf16.msra.mxu1 %v7396_v8  ;;  %v7442_v8 = vld [vmem:[#allocation8 + $0x4a8] sm:$0xff]  }
 0x4f4   :  { %7041 = vmatprep.subr.bf16.mxu1 %v7399_v52  ;;  %v7445_v52 = vld [vmem:[#allocation8 + $0x4f0] sm:$0xff]  }
 0x4f5   :  { %7062 = vmatpush3.bf16.msra.mxu0 %v7398_v55  ;;  %v7444_v55 = vld [vmem:[#allocation8 + $0x430] sm:$0xff]  }
 0x4f6   :  { %7063 = vmatprep.subr.bf16.mxu0 %v7401_v9  ;;  %v7447_v9 = vld [vmem:[#allocation8 + $0x478] sm:$0xff]  }
 0x4f7   :  { %7042 = vmatpush3.bf16.msra.mxu1 %v7400_v56  ;;  %v7446_v56 = vld [vmem:[#allocation8 + $0x4b0] sm:$0xff]  }
 0x4f8   :  { %7043 = vmatprep.subr.bf16.mxu1 %v7403_v61  ;;  %v7449_v61 = vld [vmem:[#allocation8 + $0x4f8] sm:$0xff]  }
 0x4f9   :  { %7064 = vmatpush3.bf16.msra.mxu0 %v7402_v20  ;;  %v7448_v20 = vld [vmem:[#allocation8 + $0x438] sm:$0xff]  }
 0x4fa   :  { %7065 = vmatprep.subr.bf16.mxu0 %v7405_v2  ;;  %v7451_v2 = vld [vmem:[#allocation8 + $0x540] sm:$0xff]  }
 0x4fb   :  { %7044 = vmatpush3.bf16.msra.mxu1 %v7404_v62  ;;  %v7450_v62 = vld [vmem:[#allocation8 + $0x4b8] sm:$0xff]  }
 0x4fc   :  { %7045 = vmatprep.subr.bf16.mxu1 %v7407_v11  ;;  %v7453_v11 = vld [vmem:[#allocation8 + $0x5c0] sm:$0xff]  }
 0x4fd   :  { %7066 = vmatpush3.bf16.msra.mxu0 %v7406_v26  ;;  %v7452_v26 = vld [vmem:[#allocation8 + $0x500] sm:$0xff]  }
 0x4fe   :  { %7067 = vmatprep.subr.bf16.mxu0 %v7409_v0  ;;  %v6823_v0 = vpack.c.bf16 %v8142_v31, %v8142_v31  ;;  %v7459_v31 = vld [vmem:[#allocation8 + $0x550] sm:$0xff]  }
 0x4ff   :  { %7046 = vmatpush3.bf16.msra.mxu1 %v7408_v33  ;;  %v7455_v33 = vld [vmem:[#allocation8 + $0x548] sm:$0xff]  }
 0x500   :  { %7047 = vmatprep.subr.bf16.mxu1 %v7411_v34  ;;  %v6828_v34 = vpack.c.bf16 %v8156_v10, %v8156_v10  ;;  %v7458_v10 = vld [vmem:[#allocation8 + $0x588] sm:$0xff]  }
 0x501   :  { %7068 = vmatpush3.bf16.msra.mxu0 %v7410_v24  ;;  %v7454_v24 = vld [vmem:[#allocation8 + $0x580] sm:$0xff]  }
 0x502   :  { %7069 = vmatprep.subr.bf16.mxu0 %v7413_v35  ;;  %v6825_v35 = vpack.c.bf16 %v8146_v1, %v8146_v1  ;;  %v7463_v1 = vld [vmem:[#allocation8 + $0x558] sm:$0xff]  }
 0x503   :  { %7048 = vmatpush3.bf16.msra.mxu1 %v7412_v36  ;;  %v7457_v36 = vld [vmem:[#allocation8 + $0x5c8] sm:$0xff]  }
 0x504   :  { %7049 = vmatprep.subr.bf16.mxu1 %v7415_v37  ;;  %v6830_v37 = vpack.c.bf16 %v8160_v28, %v8160_v28  ;;  %v7464_v28 = vld [vmem:[#allocation8 + $0x518] sm:$0xff]  }
 0x505   :  { %7070 = vmatpush3.bf16.msra.mxu0 %v7414_v39  ;;  %v7456_v39 = vld [vmem:[#allocation8 + $0x508] sm:$0xff]  }
 0x506   :  { %7071 = vmatprep.subr.bf16.mxu0 %v7417_v4  ;;  %v7461_v4 = vld [vmem:[#allocation8 + $0x5d0] sm:$0xff]  }
 0x507   :  { %7050 = vmatpush3.bf16.msra.mxu1 %v7416_v29  ;;  %v7460_v29 = vld [vmem:[#allocation8 + $0x510] sm:$0xff]  }
 0x508   :  { %7079 = vmatprep.subr.bf16.mxu1 %v7419_v41  ;;  %v7462_v41 = vld [vmem:[#allocation8 + $0x590] sm:$0xff]  }
 0x509   :  { %7072 = vmatpush3.bf16.msra.mxu0 %v7418_v42  ;;  %v7465_v42 = vld [vmem:[#allocation8 + $0x5d8] sm:$0xff]  }
 0x50a   :  { %5814 = vmatmul.mubr.bf16.vlgmr.msra.gmra.mrb[76].mxu1 %v6819_v53  ;;  %7101 = vmatprep.subr.bf16.mxu0 %v7421_v43  ;;  %v7467_v43 = vld [vmem:[#allocation8 + $0x560] sm:$0xff]  }
 0x50b   :  { %7080 = vmatpush3.bf16.msra.mxu1 %v7420_v45  ;;  %5893 = vmatprep.mubr.bf16.mxu1 %v6824_v18  ;;  %v7466_v45 = vld [vmem:[#allocation8 + $0x598] sm:$0xff]   ;;  %v7469_v53 = vld [vmem:[#allocation8 + $0x5e0] sm:$0xff]   ;;  %v7471_v18 = vld [vmem:[#allocation8 + $0x568] sm:$0xff]  }
 0x50c   :  { %5854 = vmatmul.mubr.bf16.vlgmr.msra.gmra.mrb[76].mxu0 %v6821_v51  ;;  %7081 = vmatprep.subr.bf16.mxu1 %v7423_v49  ;;  %v7468_v49 = vld [vmem:[#allocation8 + $0x520] sm:$0xff]   ;;  %v7473_v51 = vld [vmem:[#allocation8 + $0x5e8] sm:$0xff]  }
 0x50d   :  { %7102 = vmatpush3.bf16.msra.mxu0 %v7422_v50  ;;  %5933 = vmatprep.mubr.bf16.mxu0 %v6826_v23  ;;  %v7470_v50 = vld [vmem:[#allocation8 + $0x5a0] sm:$0xff]   ;;  %v7475_v23 = vld [vmem:[#allocation8 + $0x570] sm:$0xff]  }
 0x50e   :  { %7103 = vmatprep.subr.bf16.mxu0 %v7425_v14  ;;  %v7472_v14 = vld [vmem:[#allocation8 + $0x528] sm:$0xff]  }
 0x50f   :  { %7082 = vmatpush3.bf16.msra.mxu1 %v7424_v27  ;;  %v7474_v27 = vld [vmem:[#allocation8 + $0x5a8] sm:$0xff]  }
 0x510   :  { %7083 = vmatprep.subr.bf16.mxu1 %v7427_v30  ;;  %v7477_v30 = vld [vmem:[#allocation8 + $0x5f0] sm:$0xff]  }
 0x511   :  { %7104 = vmatpush3.bf16.msra.mxu0 %v7426_v17  ;;  %v7476_v17 = vld [vmem:[#allocation8 + $0x530] sm:$0xff]  }
 0x512   :  { %7105 = vmatprep.subr.bf16.mxu0 %v7429_v57  ;;  %v7479_v57 = vld [vmem:[#allocation8 + $0x578] sm:$0xff]  }
 0x513   :  { %7084 = vmatpush3.bf16.msra.mxu1 %v7428_v58  ;;  %v7478_v58 = vld [vmem:[#allocation8 + $0x5b0] sm:$0xff]  }
 0x514   :  { %7085 = vmatprep.subr.bf16.mxu1 %v7431_v54  ;;  %v7481_v54 = vld [vmem:[#allocation8 + $0x5f8] sm:$0xff]  }
 0x515   :  { %7106 = vmatpush3.bf16.msra.mxu0 %v7430_v59  ;;  %v7480_v59 = vld [vmem:[#allocation8 + $0x538] sm:$0xff]  }
 0x516   :  { %7107 = vmatprep.subr.bf16.mxu0 %v7433_v60  ;;  %v7483_v60 = vld [vmem:[#allocation8 + $0x640] sm:$0xff]  }
 0x517   :  { %7086 = vmatpush3.bf16.msra.mxu1 %v7432_v6  ;;  %v7482_v6 = vld [vmem:[#allocation8 + $0x5b8] sm:$0xff]  }
 0x518   :  { %7087 = vmatprep.subr.bf16.mxu1 %v7435_v63  ;;  %v7485_v63 = vld [vmem:[#allocation8 + $0x6c0] sm:$0xff]  }
 0x519   :  { %7108 = vmatpush3.bf16.msra.mxu0 %v7434_v32  ;;  %v7484_v32 = vld [vmem:[#allocation8 + $0x600] sm:$0xff]  }
 0x51a   :  { %7109 = vmatprep.subr.bf16.mxu0 %v7437_v19  ;;  %v6827_v19 = vpack.c.bf16 %v8154_v22, %v8154_v22  ;;  %v7491_v22 = vld [vmem:[#allocation8 + $0x650] sm:$0xff]  }
 0x51b   :  { %7088 = vmatpush3.bf16.msra.mxu1 %v7436_v3  ;;  %v7487_v3 = vld [vmem:[#allocation8 + $0x648] sm:$0xff]  }
 0x51c   :  { %7089 = vmatprep.subr.bf16.mxu1 %v7439_v5  ;;  %v6832_v5 = vpack.c.bf16 %v8164_v12, %v8164_v12  ;;  %v7490_v12 = vld [vmem:[#allocation8 + $0x688] sm:$0xff]  }
 0x51d   :  { %7110 = vmatpush3.bf16.msra.mxu0 %v7438_v21  ;;  %v7486_v21 = vld [vmem:[#allocation8 + $0x680] sm:$0xff]  }
 0x51e   :  { %7111 = vmatprep.subr.bf16.mxu0 %v7441_v44  ;;  %v6829_v44 = vpack.c.bf16 %v8158_v13, %v8158_v13  ;;  %v7495_v13 = vld [vmem:[#allocation8 + $0x658] sm:$0xff]  }
 0x51f   :  { %7090 = vmatpush3.bf16.msra.mxu1 %v7440_v16  ;;  %v7489_v16 = vld [vmem:[#allocation8 + $0x6c8] sm:$0xff]  }
 0x520   :  { %7091 = vmatprep.subr.bf16.mxu1 %v7443_v7  ;;  %v6834_v7 = vpack.c.bf16 %v8168_v40, %v8168_v40  ;;  %v7496_v40 = vld [vmem:[#allocation8 + $0x618] sm:$0xff]  }
 0x521   :  { %7112 = vmatpush3.bf16.msra.mxu0 %v7442_v8  ;;  %v7488_v8 = vld [vmem:[#allocation8 + $0x608] sm:$0xff]  }
 0x522   :  { %7113 = vmatprep.subr.bf16.mxu0 %v7445_v52  ;;  %v7493_v52 = vld [vmem:[#allocation8 + $0x6d0] sm:$0xff]  }
 0x523   :  { %7092 = vmatpush3.bf16.msra.mxu1 %v7444_v55  ;;  %v7492_v55 = vld [vmem:[#allocation8 + $0x610] sm:$0xff]  }
 0x524   :  { %7093 = vmatprep.subr.bf16.mxu1 %v7447_v9  ;;  %v7494_v9 = vld [vmem:[#allocation8 + $0x690] sm:$0xff]  }
 0x525   :  { %7114 = vmatpush3.bf16.msra.mxu0 %v7446_v56  ;;  %v7497_v56 = vld [vmem:[#allocation8 + $0x6d8] sm:$0xff]  }
 0x526   :  { %7115 = vmatprep.subr.bf16.mxu0 %v7449_v61  ;;  %v7499_v61 = vld [vmem:[#allocation8 + $0x660] sm:$0xff]  }
 0x527   :  { %7094 = vmatpush3.bf16.msra.mxu1 %v7448_v20  ;;  %v7498_v20 = vld [vmem:[#allocation8 + $0x698] sm:$0xff]  }
 0x528   :  { %7123 = vmatprep.subr.bf16.mxu1 %v7451_v2  ;;  %v7501_v2 = vld [vmem:[#allocation8 + $0x6e0] sm:$0xff]  }
 0x529   :  { %7116 = vmatpush3.bf16.msra.mxu0 %v7450_v62  ;;  %v7500_v62 = vld [vmem:[#allocation8 + $0x620] sm:$0xff]  }
 0x52a   :  { %5894 = vmatmul.mubr.bf16.vlgmr.msra.gmra.mrb[80].mxu1 %v6823_v0  ;;  %7145 = vmatprep.subr.bf16.mxu0 %v7453_v11  ;;  %v7503_v11 = vld [vmem:[#allocation8 + $0x668] sm:$0xff]  }
 0x52b   :  { %7124 = vmatpush3.bf16.msra.mxu1 %v7452_v26  ;;  %5973 = vmatprep.mubr.bf16.mxu1 %v6828_v34  ;;  %v7502_v26 = vld [vmem:[#allocation8 + $0x6a0] sm:$0xff]   ;;  %v7505_v0 = vld [vmem:[#allocation8 + $0x6e8] sm:$0xff]   ;;  %v7507_v34 = vld [vmem:[#allocation8 + $0x670] sm:$0xff]  }
 0x52c   :  { %5934 = vmatmul.mubr.bf16.vlgmr.msra.gmra.mrb[80].mxu0 %v6825_v35  ;;  %7125 = vmatprep.subr.bf16.mxu1 %v7455_v33  ;;  %v7504_v33 = vld [vmem:[#allocation8 + $0x628] sm:$0xff]   ;;  %v7509_v35 = vld [vmem:[#allocation8 + $0x6f0] sm:$0xff]  }
 0x52d   :  { %7146 = vmatpush3.bf16.msra.mxu0 %v7454_v24  ;;  %6013 = vmatprep.mubr.bf16.mxu0 %v6830_v37  ;;  %v7506_v24 = vld [vmem:[#allocation8 + $0x6a8] sm:$0xff]   ;;  %v7511_v37 = vld [vmem:[#allocation8 + $0x678] sm:$0xff]  }
 0x52e   :  { %7147 = vmatprep.subr.bf16.mxu0 %v7457_v36  ;;  %v7508_v36 = vld [vmem:[#allocation8 + $0x630] sm:$0xff]  }
 0x52f   :  { %7126 = vmatpush3.bf16.msra.mxu1 %v7456_v39  ;;  %v7510_v39 = vld [vmem:[#allocation8 + $0x6b0] sm:$0xff]  }
 0x530   :  { %7127 = vmatprep.subr.bf16.mxu1 %v7459_v31  ;;  %v7513_v31 = vld [vmem:[#allocation8 + $0x6f8] sm:$0xff]  }
 0x531   :  { %7148 = vmatpush3.bf16.msra.mxu0 %v7458_v10  ;;  %v7512_v10 = vld [vmem:[#allocation8 + $0x638] sm:$0xff]  }
 0x532   :  { %7149 = vmatprep.subr.bf16.mxu0 %v7461_v4  ;;  %v7515_v4 = vld [vmem:[#allocation8 + $0x740] sm:$0xff]  }
 0x533   :  { %7128 = vmatpush3.bf16.msra.mxu1 %v7460_v29  ;;  %v7514_v29 = vld [vmem:[#allocation8 + $0x6b8] sm:$0xff]  }
 0x534   :  { %7129 = vmatprep.subr.bf16.mxu1 %v7463_v1  ;;  %v7517_v1 = vld [vmem:[#allocation8 + $0x7c0] sm:$0xff]  }
 0x535   :  { %7150 = vmatpush3.bf16.msra.mxu0 %v7462_v41  ;;  %v7516_v41 = vld [vmem:[#allocation8 + $0x700] sm:$0xff]  }
 0x536   :  { %7151 = vmatprep.subr.bf16.mxu0 %v7465_v42  ;;  %v6831_v42 = vpack.c.bf16 %v8162_v25, %v8162_v25  ;;  %v7523_v25 = vld [vmem:[#allocation8 + $0x750] sm:$0xff]  }
 0x537   :  { %7130 = vmatpush3.bf16.msra.mxu1 %v7464_v28  ;;  %v7519_v28 = vld [vmem:[#allocation8 + $0x748] sm:$0xff]  }
 0x538   :  { %7131 = vmatprep.subr.bf16.mxu1 %v7467_v43  ;;  %v6836_v43 = vpack.c.bf16 %v8172_v47, %v8172_v47  ;;  %v7522_v47 = vld [vmem:[#allocation8 + $0x788] sm:$0xff]  }
 0x539   :  { %7152 = vmatpush3.bf16.msra.mxu0 %v7466_v45  ;;  %v7518_v45 = vld [vmem:[#allocation8 + $0x780] sm:$0xff]  }
 0x53a   :  { %7153 = vmatprep.subr.bf16.mxu0 %v7469_v53  ;;  %v6833_v53 = vpack.c.bf16 %v8166_v38, %v8166_v38  ;;  %v7527_v38 = vld [vmem:[#allocation8 + $0x758] sm:$0xff]  }
 0x53b   :  { %7132 = vmatpush3.bf16.msra.mxu1 %v7468_v49  ;;  %v7521_v49 = vld [vmem:[#allocation8 + $0x7c8] sm:$0xff]  }
 0x53c   :  { %7133 = vmatprep.subr.bf16.mxu1 %v7471_v18  ;;  %v6838_v18 = vpack.c.bf16 %v8176_v15, %v8176_v15  ;;  %v7528_v15 = vld [vmem:[#allocation8 + $0x718] sm:$0xff]  }
 0x53d   :  { %7154 = vmatpush3.bf16.msra.mxu0 %v7470_v50  ;;  %v7520_v50 = vld [vmem:[#allocation8 + $0x708] sm:$0xff]  }
 0x53e   :  { %7155 = vmatprep.subr.bf16.mxu0 %v7473_v51  ;;  %v7525_v51 = vld [vmem:[#allocation8 + $0x7d0] sm:$0xff]  }
 0x53f   :  { %7134 = vmatpush3.bf16.msra.mxu1 %v7472_v14  ;;  %v7524_v14 = vld [vmem:[#allocation8 + $0x710] sm:$0xff]  }
 0x540   :  { %7135 = vmatprep.subr.bf16.mxu1 %v7475_v23  ;;  %v7526_v23 = vld [vmem:[#allocation8 + $0x790] sm:$0xff]  }
 0x541   :  { %7156 = vmatpush3.bf16.msra.mxu0 %v7474_v27  ;;  %v7529_v27 = vld [vmem:[#allocation8 + $0x7d8] sm:$0xff]  }
 0x542   :  { %7157 = vmatprep.subr.bf16.mxu0 %v7477_v30  ;;  %v7531_v30 = vld [vmem:[#allocation8 + $0x760] sm:$0xff]  }
 0x543   :  { %7136 = vmatpush3.bf16.msra.mxu1 %v7476_v17  ;;  %v7530_v17 = vld [vmem:[#allocation8 + $0x798] sm:$0xff]  }
 0x544   :  { %7137 = vmatprep.subr.bf16.mxu1 %v7479_v57  ;;  %v7533_v57 = vld [vmem:[#allocation8 + $0x7e0] sm:$0xff]  }
 0x545   :  { %7158 = vmatpush3.bf16.msra.mxu0 %v7478_v58  ;;  %v7532_v58 = vld [vmem:[#allocation8 + $0x720] sm:$0xff]  }
 0x546   :  { %7159 = vmatprep.subr.bf16.mxu0 %v7481_v54  ;;  %v7535_v54 = vld [vmem:[#allocation8 + $0x768] sm:$0xff]  }
 0x547   :  { %7138 = vmatpush3.bf16.msra.mxu1 %v7480_v59  ;;  %v7534_v59 = vld [vmem:[#allocation8 + $0x7a0] sm:$0xff]  }
 0x548   :  { %7167 = vmatprep.subr.bf16.mxu1 %v7483_v60  ;;  %v7537_v60 = vld [vmem:[#allocation8 + $0x7e8] sm:$0xff]  }
 0x549   :  { %7160 = vmatpush3.bf16.msra.mxu0 %v7482_v6  ;;  %v7536_v6 = vld [vmem:[#allocation8 + $0x728] sm:$0xff]  }
 0x54a   :  { %5974 = vmatmul.mubr.bf16.vlgmr.msra.gmra.mrb[84].mxu1 %v6827_v19  ;;  %7189 = vmatprep.subr.bf16.mxu0 %v7485_v63  ;;  %v7539_v63 = vld [vmem:[#allocation8 + $0x770] sm:$0xff]   ;;  %v7538_v19 = vld [vmem:[#allocation8 + $0x7a8] sm:$0xff]  }
 0x54b   :  { %7168 = vmatpush3.bf16.msra.mxu1 %v7484_v32  ;;  %6053 = vmatprep.mubr.bf16.mxu1 %v6832_v5 }
 0x54c   :  { %6014 = vmatmul.mubr.bf16.vlgmr.msra.gmra.mrb[84].mxu0 %v6829_v44  ;;  %7169 = vmatprep.subr.bf16.mxu1 %v7487_v3  ;;  %v6502_v3 = vld [vmem:[%s8243_s6] ss:$0 sm:$0xff]  ;;  %s7694_s6 = smov [#allocation10]  }
 0x54d   :  { %7190 = vmatpush3.bf16.msra.mxu0 %v7486_v21  ;;  %6093 = vmatprep.mubr.bf16.mxu0 %v6834_v7  ;;  %v7541_v21 = vld [vmem:[#allocation8 + $0x7f0] sm:$0xff]   ;;  %s6188_s13 = sshll.u32 %s7694_s6, 4  ;;  %s6189_s13 = int_to_ptr.vmem [resolvable:$true] %s6188_s13 }
 0x54e   :  { %7191 = vmatprep.subr.bf16.mxu0 %v7489_v16  ;;  %s7659_s14 = scalar_lea.vmem %s6189_s13, 128  ;;  %p7664_p3 = scmp.lt.s32.totalorder %s6189_s13, %s6189_s13 }
 0x54f   :  { %7170 = vmatpush3.bf16.msra.mxu1 %v7488_v8  ;;  %v7540_v8 = vld [vmem:[#allocation8 + $0x730] sm:$0xff]   ;;  %p7660_p2 = scmp.ne.s32.totalorder %s6189_s13, %s7659_s14  ;;  %p7665_p4 = scmp.lt.s32.totalorder %s7659_s14, %s7659_s14 }
 0x550   :  { %7171 = vmatprep.subr.bf16.mxu1 %v7491_v22 }
 0x551   :  { %7192 = vmatpush3.bf16.msra.mxu0 %v7490_v12  ;;  %p7666_p5 = por %p7665_p4, %p7664_p3 }
 0x552   :  { %7193 = vmatprep.subr.bf16.mxu0 %v7493_v52  ;;  %v7543_v52 = vld [vmem:[#allocation8 + $0x778] sm:$0xff]  }
 0x553   :  { %7172 = vmatpush3.bf16.msra.mxu1 %v7492_v55  ;;  %p7667_p6 = pnand %p7666_p5, %p7660_p2 }
 0x554   :  { %7173 = vmatprep.subr.bf16.mxu1 %v7495_v13 }
 0x555   :  { %7194 = vmatpush3.bf16.msra.mxu0 %v7494_v9 }
 0x556   :  { %7195 = vmatprep.subr.bf16.mxu0 %v7497_v56  ;;  %v7542_v56 = vld [vmem:[#allocation8 + $0x7b0] sm:$0xff]  }
 0x557   :  { %7174 = vmatpush3.bf16.msra.mxu1 %v7496_v40 }
 0x558   :  { %7175 = vmatprep.subr.bf16.mxu1 %v7499_v61  ;;  %v7545_v61 = vld [vmem:[#allocation8 + $0x7f8] sm:$0xff]  }
 0x559   :  { %7196 = vmatpush3.bf16.msra.mxu0 %v7498_v20 }
 0x55a   :  { %7197 = vmatprep.subr.bf16.mxu0 %v7501_v2  ;;  %v7544_v2 = vld [vmem:[#allocation8 + $0x738] sm:$0xff]  }
 0x55b   :  { %7176 = vmatpush3.bf16.msra.mxu1 %v7500_v62  ;;  %v7546_v62 = vld [vmem:[#allocation8 + $0x7b8] sm:$0xff]  }
 0x55c   :  { %7177 = vmatprep.subr.bf16.mxu1 %v7503_v11  ;;  %v6835_v11 = vpack.c.bf16 %v8170_v46, %v8170_v46 }
 0x55d   :  { %7198 = vmatpush3.bf16.msra.mxu0 %v7502_v26  ;;  %v6837_v26 = vpack.c.bf16 %v8174_v48, %v8174_v48 }
 0x55e   :  { %7199 = vmatprep.subr.bf16.mxu0 %v7505_v0 }
 0x55f   :  { %7178 = vmatpush3.bf16.msra.mxu1 %v7504_v33 }
 0x560   :  { %7179 = vmatprep.subr.bf16.mxu1 %v7507_v34 }
 0x561   :  { %7200 = vmatpush3.bf16.msra.mxu0 %v7506_v24 }
 0x562   :  { %7201 = vmatprep.subr.bf16.mxu0 %v7509_v35 }
 0x563   :  { %7180 = vmatpush3.bf16.msra.mxu1 %v7508_v36 }
 0x564   :  { %7181 = vmatprep.subr.bf16.mxu1 %v7511_v37 }
 0x565   :  { %7202 = vmatpush3.bf16.msra.mxu0 %v7510_v39 }
 0x566   :  { %7203 = vmatprep.subr.bf16.mxu0 %v7513_v31 }
 0x567   :  { %7182 = vmatpush3.bf16.msra.mxu1 %v7512_v10 }
 0x568   :  { %7211 = vmatprep.subr.bf16.mxu1 %v7515_v4 }
 0x569   :  { %7204 = vmatpush3.bf16.msra.mxu0 %v7514_v29 }
 0x56a   :  { %6054 = vmatmul.mubr.bf16.vlgmr.msra.gmra.mrb[88].mxu1 %v6831_v42  ;;  %7233 = vmatprep.subr.bf16.mxu0 %v7517_v1 }
 0x56b   :  { %7212 = vmatpush3.bf16.msra.mxu1 %v7516_v41  ;;  %6133 = vmatprep.mubr.bf16.mxu1 %v6836_v43 }
 0x56c   :  { %6094 = vmatmul.mubr.bf16.vlgmr.msra.gmra.mrb[88].mxu0 %v6833_v53  ;;  %7213 = vmatprep.subr.bf16.mxu1 %v7519_v28 }
 0x56d   :  { %7234 = vmatpush3.bf16.msra.mxu0 %v7518_v45  ;;  %6173 = vmatprep.mubr.bf16.mxu0 %v6838_v18 }
 0x56e   :  { %7235 = vmatprep.subr.bf16.mxu0 %v7521_v49 }
 0x56f   :  { %7214 = vmatpush3.bf16.msra.mxu1 %v7520_v50 }
 0x570   :  { %7215 = vmatprep.subr.bf16.mxu1 %v7523_v25 }
 0x571   :  { %7236 = vmatpush3.bf16.msra.mxu0 %v7522_v47 }
 0x572   :  { %7237 = vmatprep.subr.bf16.mxu0 %v7525_v51 }
 0x573   :  { %7216 = vmatpush3.bf16.msra.mxu1 %v7524_v14 }
 0x574   :  { %7217 = vmatprep.subr.bf16.mxu1 %v7527_v38 }
 0x575   :  { %7238 = vmatpush3.bf16.msra.mxu0 %v7526_v23 }
 0x576   :  { %7239 = vmatprep.subr.bf16.mxu0 %v7529_v27 }
 0x577   :  { %7218 = vmatpush3.bf16.msra.mxu1 %v7528_v15 }
 0x578   :  { %7219 = vmatprep.subr.bf16.mxu1 %v7531_v30 }
 0x579   :  { %7240 = vmatpush3.bf16.msra.mxu0 %v7530_v17 }
 0x57a   :  { %7241 = vmatprep.subr.bf16.mxu0 %v7533_v57 }
 0x57b   :  { %7220 = vmatpush3.bf16.msra.mxu1 %v7532_v58 }
 0x57c   :  { %7221 = vmatprep.subr.bf16.mxu1 %v7535_v54 }
 0x57d   :  { %7242 = vmatpush3.bf16.msra.mxu0 %v7534_v59  ;;  %v6919_v32 = vpop.f32.mrb[64].mxu1 }
 0x57e   :  { %v6920_v5 = vpop.f32.mrb[65].mxu1  ;;  %7243 = vmatprep.subr.bf16.mxu0 %v7537_v60 }
 0x57f   :  { %v6921_v44 = vadd.f32 %v6920_v5, %v6919_v32  ;;  %7222 = vmatpush3.bf16.msra.mxu1 %v7536_v6  ;;  %v6922_v16 = vpop.f32.mrb[66].mxu1  ;;  %v6941_v7 = vpop.f32.mrb[64].mxu0 }
 0x580   :  { %v6923_v22 = vpop.f32.mrb[67].mxu1  ;;  %v6942_v12 = vpop.f32.mrb[65].mxu0  ;;  %7223 = vmatprep.subr.bf16.mxu1 %v7539_v63 }
 0x581   :  { %v5576_v55 = vadd.f32 %v6921_v44, %v6502_v3  ;;  %v6943_v13 = vadd.f32 %v6942_v12, %v6941_v7  ;;  %7244 = vmatpush3.bf16.msra.mxu0 %v7538_v19  ;;  %v6944_v9 = vpop.f32.mrb[66].mxu0 }
 0x582   :  { %v6945_v40 = vpop.f32.mrb[67].mxu0  ;;  %7245 = vmatprep.subr.bf16.mxu0 %v7541_v21 }
 0x583   :  { %v5616_v20 = vadd.f32 %v6943_v13, %v5576_v55  ;;  %7224 = vmatpush3.bf16.msra.mxu1 %v7540_v8 }
 0x584   :  { %7225 = vmatprep.subr.bf16.mxu1 %v7543_v52 }
 0x585   :  { %7246 = vmatpush3.bf16.msra.mxu0 %v7542_v56 }
 0x586   :  { %7247 = vmatprep.subr.bf16.mxu0 %v7545_v61 }
 0x587   :  { %7226 = vmatpush3.bf16.msra.mxu1 %v7544_v2 }
 0x589   :  { %7248 = vmatpush3.bf16.msra.mxu0 %v7546_v62 }
 0x58a   :  { %6134 = vmatmul.mubr.bf16.vlgmr.msra.gmra.mrb[92].mxu1 %v6835_v11 }
 0x58c   :  { %6174 = vmatmul.mubr.bf16.vlgmr.msra.gmra.mrb[92].mxu0 %v6837_v26 }
 0x59d   :  { %v6963_v0 = vpop.f32.mrb[68].mxu1 }
 0x59e   :  { %v6964_v33 = vpop.f32.mrb[69].mxu1 }
 0x59f   :  { %v6965_v34 = vadd.f32 %v6964_v33, %v6963_v0  ;;  %v6966_v24 = vpop.f32.mrb[70].mxu1  ;;  %v6985_v35 = vpop.f32.mrb[68].mxu0 }
 0x5a0   :  { %v6967_v36 = vpop.f32.mrb[71].mxu1  ;;  %v6986_v37 = vpop.f32.mrb[69].mxu0 }
 0x5a1   :  { %v5656_v39 = vadd.f32 %v6965_v34, %v5616_v20  ;;  %v6987_v31 = vadd.f32 %v6986_v37, %v6985_v35  ;;  %v6988_v10 = vpop.f32.mrb[70].mxu0 }
 0x5a2   :  { %v6989_v4 = vpop.f32.mrb[71].mxu0 }
 0x5a3   :  { %v5696_v29 = vadd.f32 %v6987_v31, %v5656_v39 }
 0x5bd   :  { %v7007_v1 = vpop.f32.mrb[72].mxu1 }
 0x5be   :  { %v7008_v46 = vpop.f32.mrb[73].mxu1 }
 0x5bf   :  { %v7009_v41 = vadd.f32 %v7008_v46, %v7007_v1  ;;  %v7010_v42 = vpop.f32.mrb[74].mxu1  ;;  %v7029_v28 = vpop.f32.mrb[72].mxu0 }
 0x5c0   :  { %v7011_v48 = vpop.f32.mrb[75].mxu1  ;;  %v7030_v43 = vpop.f32.mrb[73].mxu0 }
 0x5c1   :  { %v5736_v45 = vadd.f32 %v7009_v41, %v5696_v29  ;;  %v7031_v53 = vadd.f32 %v7030_v43, %v7029_v28  ;;  %v7032_v49 = vpop.f32.mrb[74].mxu0 }
 0x5c2   :  { %v7033_v18 = vpop.f32.mrb[75].mxu0 }
 0x5c3   :  { %v5776_v50 = vadd.f32 %v7031_v53, %v5736_v45 }
 0x5dd   :  { %v7051_v25 = vpop.f32.mrb[76].mxu1 }
 0x5de   :  { %v7052_v47 = vpop.f32.mrb[77].mxu1 }
 0x5df   :  { %v7053_v51 = vadd.f32 %v7052_v47, %v7051_v25  ;;  %v7054_v14 = vpop.f32.mrb[78].mxu1  ;;  %v7073_v38 = vpop.f32.mrb[76].mxu0 }
 0x5e0   :  { %v7055_v23 = vpop.f32.mrb[79].mxu1  ;;  %v7074_v27 = vpop.f32.mrb[77].mxu0 }
 0x5e1   :  { %v5816_v15 = vadd.f32 %v7053_v51, %v5776_v50  ;;  %v7075_v30 = vadd.f32 %v7074_v27, %v7073_v38  ;;  %v7076_v17 = vpop.f32.mrb[78].mxu0 }
 0x5e2   :  { %v7077_v57 = vpop.f32.mrb[79].mxu0 }
 0x5e3   :  { %v5856_v58 = vadd.f32 %v7075_v30, %v5816_v15 }
 0x5fd   :  { %v7095_v54 = vpop.f32.mrb[80].mxu1 }
 0x5fe   :  { %v7096_v59 = vpop.f32.mrb[81].mxu1 }
 0x5ff   :  { %v7097_v60 = vadd.f32 %v7096_v59, %v7095_v54  ;;  %v7098_v6 = vpop.f32.mrb[82].mxu1  ;;  %v7117_v63 = vpop.f32.mrb[80].mxu0 }
 0x600   :  { %v7099_v32 = vpop.f32.mrb[83].mxu1  ;;  %v7118_v19 = vpop.f32.mrb[81].mxu0 }
 0x601   :  { %v5896_v3 = vadd.f32 %v7097_v60, %v5856_v58  ;;  %v7119_v5 = vadd.f32 %v7118_v19, %v7117_v63  ;;  %v7120_v21 = vpop.f32.mrb[82].mxu0 }
 0x602   :  { %v7121_v44 = vpop.f32.mrb[83].mxu0 }
 0x603   :  { %v5936_v16 = vadd.f32 %v7119_v5, %v5896_v3 }
 0x61d   :  { %v7139_v7 = vpop.f32.mrb[84].mxu1 }
 0x61e   :  { %v7140_v8 = vpop.f32.mrb[85].mxu1 }
 0x61f   :  { %v7141_v22 = vadd.f32 %v7140_v8, %v7139_v7  ;;  %v7142_v12 = vpop.f32.mrb[86].mxu1  ;;  %v7161_v52 = vpop.f32.mrb[84].mxu0 }
 0x620   :  { %v7143_v55 = vpop.f32.mrb[87].mxu1  ;;  %v7162_v13 = vpop.f32.mrb[85].mxu0 }
 0x621   :  { %v5976_v9 = vadd.f32 %v7141_v22, %v5936_v16  ;;  %v7163_v56 = vadd.f32 %v7162_v13, %v7161_v52  ;;  %v7164_v40 = vpop.f32.mrb[86].mxu0 }
 0x622   :  { %v7165_v61 = vpop.f32.mrb[87].mxu0 }
 0x623   :  { %v6016_v20 = vadd.f32 %v7163_v56, %v5976_v9 }
 0x63d   :  { %v7183_v2 = vpop.f32.mrb[88].mxu1 }
 0x63e   :  { %v7184_v62 = vpop.f32.mrb[89].mxu1 }
 0x63f   :  { %v7185_v11 = vadd.f32 %v7184_v62, %v7183_v2  ;;  %v7186_v26 = vpop.f32.mrb[90].mxu1  ;;  %v7205_v0 = vpop.f32.mrb[88].mxu0 }
 0x640   :  { %v7187_v33 = vpop.f32.mrb[91].mxu1  ;;  %v7206_v34 = vpop.f32.mrb[89].mxu0 }
 0x641   :  { %v6056_v24 = vadd.f32 %v7185_v11, %v6016_v20  ;;  %v7207_v35 = vadd.f32 %v7206_v34, %v7205_v0  ;;  %v7208_v36 = vpop.f32.mrb[90].mxu0 }
 0x642   :  { %v7209_v37 = vpop.f32.mrb[91].mxu0 }
 0x643   :  { %v6096_v39 = vadd.f32 %v7207_v35, %v6056_v24 }
 0x65d   :  { %v7227_v31 = vpop.f32.mrb[92].mxu1 }
 0x65e   :  { %v7228_v10 = vpop.f32.mrb[93].mxu1 }
 0x65f   :  { %v7229_v4 = vadd.f32 %v7228_v10, %v7227_v31  ;;  %v7230_v29 = vpop.f32.mrb[94].mxu1  ;;  %v7249_v1 = vpop.f32.mrb[92].mxu0 }
 0x660   :  { %v7231_v46 = vpop.f32.mrb[95].mxu1  ;;  %v7250_v41 = vpop.f32.mrb[93].mxu0 }
 0x661   :  { %v6136_v42 = vadd.f32 %v7229_v4, %v6096_v39  ;;  %v7251_v28 = vadd.f32 %v7250_v41, %v7249_v1  ;;  %v7252_v48 = vpop.f32.mrb[94].mxu0 }
 0x662   :  { %v7253_v43 = vpop.f32.mrb[95].mxu0 }
 0x663   :  { %v6176_v45 = vadd.f32 %v7251_v28, %v6136_v42 }
 0x665   :  { %6181 = vst [vmem:[#allocation10] sm:$0xff] %v6176_v45 }
 0x666   :  { %7670 = shalt.err (!%p7667_p6)
}
 0x667   :  { %s7671_s17 = scalar_lea.hbm %s8244_s7, 128 }
 0x668   :  { %p7672_p7 = scmp.ne.s32.totalorder %s8244_s7, %s7671_s17  ;;  %p7675_p8 = scmp.lt.u32.totalorder %s7671_s17, %s8244_s7 }
 0x66a   :  { %p7677_p9 = pnand %p7675_p8, %p7672_p7 }
 0x66c   :  { %7680 = shalt.err (!%p7677_p9)
}
 0x66d   :  { %6191 = dma.vmem_to_hbm [thread:$0]  %s6189_s13, 128, %s8244_s7, [#allocation7]  }
 0x66e   :  { %7685 = dma.done.wait [#allocation7], 128  }
 0x66f   :  { %7686 = vsyncadd [#allocation7], 4294967168 }
 0x670   :  { %6195 = vsyncpa [#allocation6], 1 }
 0x671   :  { %6196 = vsyncpa [#allocation9], 1 }
 0x672   :  { %6197 = vsyncpa [#allocation7], 1 }

</bundles_post_ra>
